<compile_context>
chip_gen: v6e
topology: v6e:2x2x1
jax: 0.10.0
libtpu: 0.0.40
codegen_flags: <defaults>
</compile_context>

<pallas_src>
import functools

import jax
import jax.numpy as jnp
from jax.experimental import pallas as pl
from jax.experimental.pallas import tpu as pltpu


def _round_up(x, m):
    return (x + m - 1) // m * m


# ---------------------------------------------------------------------------
# Pallas kernel: fused (x @ w + b) with optional ReLU, tiled over rows.
# bf16 MXU operands, f32 accumulate, bias+ReLU in f32, store in out dtype.
# ---------------------------------------------------------------------------
def _matmul_bias_kernel(x_ref, w_ref, b_ref, o_ref, *, relu):
    acc = jnp.dot(x_ref[...], w_ref[...], preferred_element_type=jnp.float32)
    acc = acc + b_ref[...]
    if relu:
        acc = jnp.maximum(acc, 0.0)
    o_ref[...] = acc.astype(o_ref.dtype)


def _pick_tm(M, tm_max):
    """Row tile: single block if it fits, two balanced blocks if <= 2*tm_max,
    else tm_max tiles with a (masked) ragged last block."""
    if M <= tm_max:
        return M
    if M <= 2 * tm_max:
        return _round_up(pl.cdiv(M, 2), 16)
    return tm_max


def matmul_bias(x, w, b, *, relu, out_dtype=jnp.bfloat16, tm_max=1024):
    """(M, K) bf16 @ (K, N) bf16 + b (1, N) f32, optional ReLU.  Returns (M, N)."""
    M, K = x.shape
    Kw, N = w.shape
    assert K == Kw, (K, Kw)

    tm = _pick_tm(M, tm_max)
    grid = (pl.cdiv(M, tm),)

    cost = pl.CostEstimate(
        flops=2 * M * K * N,
        transcendentals=0,
        bytes_accessed=(M * K * x.dtype.itemsize + K * N * w.dtype.itemsize
                        + N * 4 + M * N * jnp.dtype(out_dtype).itemsize),
    )

    out = pl.pallas_call(
        functools.partial(_matmul_bias_kernel, relu=relu),
        out_shape=jax.ShapeDtypeStruct((M, N), out_dtype),
        grid=grid,
        in_specs=[
            pl.BlockSpec((tm, K), lambda i: (i, 0)),   # K unpadded: block == full dim
            pl.BlockSpec((K, N), lambda i: (0, 0)),    # weight fully VMEM-resident
            pl.BlockSpec((1, N), lambda i: (0, 0)),
        ],
        out_specs=pl.BlockSpec((tm, N), lambda i: (i, 0)),  # narrow, unpadded store
        compiler_params=pltpu.CompilerParams(
            dimension_semantics=("parallel",)),
        cost_estimate=cost,
    )(x, w, b)
    return out


# ---------------------------------------------------------------------------
# Fused classifier kernel: relu(x@w1+b1) @ ... one launch for all three Linears.
# ---------------------------------------------------------------------------
def _classifier_kernel(x_ref, w1_ref, b1_ref, w2_ref, b2_ref, w3_ref, b3_ref, o_ref):
    h = jnp.dot(x_ref[...], w1_ref[...], preferred_element_type=jnp.float32)
    h = jnp.maximum(h + b1_ref[...], 0.0).astype(jnp.bfloat16)
    h = jnp.dot(h, w2_ref[...], preferred_element_type=jnp.float32)
    h = jnp.maximum(h + b2_ref[...], 0.0).astype(jnp.bfloat16)
    h = jnp.dot(h, w3_ref[...], preferred_element_type=jnp.float32)
    o_ref[...] = h + b3_ref[...]


def classifier(x, q):
    M, F1 = x.shape
    H1 = q["f1w"].shape[1]
    H2 = q["f2w"].shape[1]
    NO = q["f3w"].shape[1]
    cost = pl.CostEstimate(
        flops=2 * M * (F1 * H1 + H1 * H2 + H2 * NO),
        transcendentals=0,
        bytes_accessed=(M * F1 * 2 + (F1 * H1 + H1 * H2 + H2 * NO) * 2
                        + (H1 + H2 + NO) * 4 + M * NO * 4),
    )
    return pl.pallas_call(
        _classifier_kernel,
        out_shape=jax.ShapeDtypeStruct((M, NO), jnp.float32),
        grid=(1,),
        in_specs=[
            pl.BlockSpec((M, F1), lambda i: (0, 0)),
            pl.BlockSpec((F1, H1), lambda i: (0, 0)),
            pl.BlockSpec((1, H1), lambda i: (0, 0)),
            pl.BlockSpec((H1, H2), lambda i: (0, 0)),
            pl.BlockSpec((1, H2), lambda i: (0, 0)),
            pl.BlockSpec((H2, NO), lambda i: (0, 0)),
            pl.BlockSpec((1, NO), lambda i: (0, 0)),
        ],
        out_specs=pl.BlockSpec((M, NO), lambda i: (0, 0)),
        compiler_params=pltpu.CompilerParams(dimension_semantics=("arbitrary",)),
        cost_estimate=cost,
    )(x, q["f1w"], q["f1b"], q["f2w"], q["f2b"], q["f3w"], q["f3b"])


# ---------------------------------------------------------------------------
# MaxPool2d(kernel_size=3, stride=2) on NHWC bf16: plain-JAX elementwise max tree.
# (C = 8..32 of 128 lanes: a Pallas kernel here would only waste lanes/BW.)
# ---------------------------------------------------------------------------
def maxpool2d_3x3s2(x):
    N, H, W, C = x.shape
    Ho = (H - 3) // 2 + 1
    Wo = (W - 3) // 2 + 1
    out = None
    for di in range(3):
        for dj in range(3):
            v = x[:, di:di + 2 * Ho:2, dj:dj + 2 * Wo:2, :]
            out = v if out is None else jnp.maximum(out, v)
    return out


# ---------------------------------------------------------------------------
# Conv = im2col (bf16, XLA index glue) + Pallas matmul kernel (bias+ReLU fused).
# ---------------------------------------------------------------------------
def conv2d_relu(x, w, b, ksize, *, stride, padding, relu=True):
    """x: NHWC bf16; w: (ksize*ksize*Cin, Cout) bf16; b: (1, Cout) f32."""
    N, H, W, Cin = x.shape
    cout = w.shape[1]
    xpad = jnp.pad(x, ((0, 0), (padding, padding), (padding, padding), (0, 0)))
    Hp, Wp = H + 2 * padding, W + 2 * padding
    Ho = (Hp - ksize) // stride + 1
    Wo = (Wp - ksize) // stride + 1
    patches = []
    for di in range(ksize):
        for dj in range(ksize):
            patches.append(
                xpad[:, di:di + stride * Ho:stride, dj:dj + stride * Wo:stride, :])
    # Column order (kh, kw, cin) matches the (KH, KW, Cin, Cout) weight reshape.
    cols = jnp.concatenate(patches, axis=-1).reshape(N * Ho * Wo, ksize * ksize * Cin)
    out = matmul_bias(cols, w, b, relu=relu, out_dtype=jnp.bfloat16)
    return out.reshape(N, Ho, Wo, cout)


# ---------------------------------------------------------------------------
# Parameters (raw) + one-time preprocessing (reshape to matmul form, bf16 cast).
# ---------------------------------------------------------------------------
def init_params(key, width):
    def w_init(k, shape):
        return 0.05 * jax.random.normal(k, shape, jnp.float32)

    ks = jax.random.split(key, 16)
    p = {}
    p["c1w"] = w_init(ks[0], (11, 11, width[0], width[1])); p["c1b"] = w_init(ks[1], (width[1],))
    p["c2w"] = w_init(ks[2], (5, 5, width[1], width[2]));   p["c2b"] = w_init(ks[3], (width[2],))
    p["c3w"] = w_init(ks[4], (3, 3, width[2], width[3]));   p["c3b"] = w_init(ks[5], (width[3],))
    p["c4w"] = w_init(ks[6], (3, 3, width[3], width[4]));   p["c4b"] = w_init(ks[7], (width[4],))
    p["c5w"] = w_init(ks[8], (3, 3, width[4], width[5]));   p["c5b"] = w_init(ks[9], (width[5],))
    p["f1w"] = w_init(ks[10], (width[5] * 6 * 6, width[6])); p["f1b"] = w_init(ks[11], (width[6],))
    p["f2w"] = w_init(ks[12], (width[6], width[7]));         p["f2b"] = w_init(ks[13], (width[7],))
    p["f3w"] = w_init(ks[14], (width[7], width[8]));         p["f3b"] = w_init(ks[15], (width[8],))
    return p


def prepare_params(p):
    """One-time (outside the forward) reshape + bf16 cast; no lane padding needed."""
    q = {}
    for name in ("c1", "c2", "c3", "c4", "c5"):
        w = p[name + "w"]
        q[name + "w"] = w.reshape(-1, w.shape[-1]).astype(jnp.bfloat16)
        q[name + "b"] = p[name + "b"].reshape(1, -1).astype(jnp.float32)
    for name in ("f1", "f2", "f3"):
        q[name + "w"] = p[name + "w"].astype(jnp.bfloat16)
        q[name + "b"] = p[name + "b"].reshape(1, -1).astype(jnp.float32)
    return q


# ---------------------------------------------------------------------------
# Forward pass.
# ---------------------------------------------------------------------------
def make_forward():
    def forward(q, x_nchw):
        # NCHW f32 -> NHWC bf16 (the only cast pass in the whole network).
        x = jnp.transpose(x_nchw, (0, 2, 3, 1)).astype(jnp.bfloat16)
        # features
        x = conv2d_relu(x, q["c1w"], q["c1b"], 11, stride=4, padding=2)
        x = maxpool2d_3x3s2(x)
        x = conv2d_relu(x, q["c2w"], q["c2b"], 5, stride=1, padding=2)
        x = maxpool2d_3x3s2(x)
        x = conv2d_relu(x, q["c3w"], q["c3b"], 3, stride=1, padding=1)
        x = conv2d_relu(x, q["c4w"], q["c4b"], 3, stride=1, padding=1)
        x = conv2d_relu(x, q["c5w"], q["c5b"], 3, stride=1, padding=1)
        x = maxpool2d_3x3s2(x)                                   # (N, 6, 6, C5) bf16
        # flatten matching PyTorch NCHW x.view(N, -1) (channel-major)
        x = jnp.transpose(x, (0, 3, 1, 2)).reshape(x.shape[0], -1)
        # classifier (Dropout is identity in eval mode); one fused pallas_call.
        return classifier(x, q)
    return forward


if __name__ == "__main__":
    # Small channel widths (the module's `width` arg); spatial 224 is required by
    # the architecture (features must emit 6x6 for the classifier flatten).
    width = [3, 8, 16, 16, 16, 16, 32, 32, 10]
    key = jax.random.PRNGKey(0)
    pkey, xkey = jax.random.split(key)
    raw_params = init_params(pkey, width)
    params = prepare_params(raw_params)   # one-time reshape / bf16 cast

    x = jax.random.normal(xkey, (2, width[0], 224, 224), jnp.float32)

    fwd = jax.jit(make_forward())
    out = fwd(params, x)
    out = jax.block_until_ready(out)

    assert out.shape == (2, width[8]), out.shape
    assert bool(jnp.all(jnp.isfinite(out)))
    print("KERNEL_OK")
</pallas_src>

<mosaic_0001>
module attributes {stable_mosaic.version = 11 : i64} {
  func.func @_matmul_bias_kernel(%arg0: i32, %arg1: memref<1024x363xbf16, #tpu.memory_space<vmem>>, %arg2: memref<363x8xbf16, #tpu.memory_space<vmem>>, %arg3: memref<1x8xf32, #tpu.memory_space<vmem>>, %arg4: memref<1024x8xbf16, #tpu.memory_space<vmem>>) attributes {dimension_semantics = [#tpu.dimension_semantics<parallel>], iteration_bounds = array<i64: 6>, scalar_prefetch = 0 : i64, scratch_operands = 0 : i64, tpu.core_type = #tpu.core_type<tc>, window_params = [{transform_indices = @transform_0, window_bounds = array<i64: 1024, 363>}, {pipeline_mode = #tpu.pipeline_mode<synchronous>, transform_indices = @transform_1, window_bounds = array<i64: 363, 8>}, {pipeline_mode = #tpu.pipeline_mode<synchronous>, transform_indices = @transform_2, window_bounds = array<i64: 1, 8>}, {transform_indices = @transform_3, window_bounds = array<i64: 1024, 8>}]} {
    %c0 = arith.constant 0 : index
    %c0_0 = arith.constant 0 : index
    %0 = vector.load %arg1[%c0, %c0_0] : memref<1024x363xbf16, #tpu.memory_space<vmem>>, vector<1024x363xbf16>
    %c0_1 = arith.constant 0 : index
    %c0_2 = arith.constant 0 : index
    %1 = vector.load %arg2[%c0_1, %c0_2] : memref<363x8xbf16, #tpu.memory_space<vmem>>, vector<363x8xbf16>
    %cst = arith.constant dense<0.000000e+00> : vector<1024x8xf32>
    %2 = tpu.matmul %0, %1, %cst {dimension_numbers = #tpu.dot_dimension_numbers<[1], [0], [0], [1], [0, 0, 1, 1], [], []>} : vector<1024x363xbf16>, vector<363x8xbf16>, vector<1024x8xf32> -> vector<1024x8xf32>
    %c0_3 = arith.constant 0 : index
    %c0_4 = arith.constant 0 : index
    %3 = vector.load %arg3[%c0_3, %c0_4] : memref<1x8xf32, #tpu.memory_space<vmem>>, vector<1x8xf32>
    %4 = vector.broadcast %3 : vector<1x8xf32> to vector<1024x8xf32>
    %5 = arith.addf %2, %4 : vector<1024x8xf32>
    %cst_5 = arith.constant 0.000000e+00 : f32
    %6 = vector.broadcast %cst_5 : f32 to vector<1024x8xf32>
    %7 = arith.maximumf %5, %6 : vector<1024x8xf32>
    %8 = arith.truncf %7 : vector<1024x8xf32> to vector<1024x8xbf16>
    %c0_6 = arith.constant 0 : index
    %c0_7 = arith.constant 0 : index
    %9 = vector.load %arg4[%c0_6, %c0_7] : memref<1024x8xbf16, #tpu.memory_space<vmem>>, vector<1024x8xbf16>
    tpu.vector_store %arg4[%c0_6, %c0_7], %8 {strides = array<i32>} : memref<1024x8xbf16, #tpu.memory_space<vmem>>, vector<1024x8xbf16>,
    return
  }
  func.func @transform_0(%arg0: i32) -> (i32, i32) {
    %c0_i32 = arith.constant 0 : i32
    %c0_i32_0 = arith.constant 0 : i32
    return %arg0, %c0_i32 : i32, i32
  }
  func.func @transform_1(%arg0: i32) -> (i32, i32) {
    %c0_i32 = arith.constant 0 : i32
    %c0_i32_0 = arith.constant 0 : i32
    %c0_i32_1 = arith.constant 0 : i32
    return %c0_i32, %c0_i32_0 : i32, i32
  }
  func.func @transform_2(%arg0: i32) -> (i32, i32) {
    %c0_i32 = arith.constant 0 : i32
    %c0_i32_0 = arith.constant 0 : i32
    %c0_i32_1 = arith.constant 0 : i32
    return %c0_i32, %c0_i32_0 : i32, i32
  }
  func.func @transform_3(%arg0: i32) -> (i32, i32) {
    %c0_i32 = arith.constant 0 : i32
    %c0_i32_0 = arith.constant 0 : i32
    return %arg0, %c0_i32 : i32, i32
  }
}

module attributes {stable_mosaic.version = 11 : i64} {
  func.func @_matmul_bias_kernel(%arg0: i32, %arg1: memref<736x200xbf16, #tpu.memory_space<vmem>>, %arg2: memref<200x16xbf16, #tpu.memory_space<vmem>>, %arg3: memref<1x16xf32, #tpu.memory_space<vmem>>, %arg4: memref<736x16xbf16, #tpu.memory_space<vmem>>) attributes {dimension_semantics = [#tpu.dimension_semantics<parallel>], iteration_bounds = array<i64: 2>, scalar_prefetch = 0 : i64, scratch_operands = 0 : i64, tpu.core_type = #tpu.core_type<tc>, window_params = [{transform_indices = @transform_0, window_bounds = array<i64: 736, 200>}, {pipeline_mode = #tpu.pipeline_mode<synchronous>, transform_indices = @transform_1, window_bounds = array<i64: 200, 16>}, {pipeline_mode = #tpu.pipeline_mode<synchronous>, transform_indices = @transform_2, window_bounds = array<i64: 1, 16>}, {transform_indices = @transform_3, window_bounds = array<i64: 736, 16>}]} {
    %c0 = arith.constant 0 : index
    %c0_0 = arith.constant 0 : index
    %0 = vector.load %arg1[%c0, %c0_0] : memref<736x200xbf16, #tpu.memory_space<vmem>>, vector<736x200xbf16>
    %c0_1 = arith.constant 0 : index
    %c0_2 = arith.constant 0 : index
    %1 = vector.load %arg2[%c0_1, %c0_2] : memref<200x16xbf16, #tpu.memory_space<vmem>>, vector<200x16xbf16>
    %cst = arith.constant dense<0.000000e+00> : vector<736x16xf32>
    %2 = tpu.matmul %0, %1, %cst {dimension_numbers = #tpu.dot_dimension_numbers<[1], [0], [0], [1], [0, 0, 1, 1], [], []>} : vector<736x200xbf16>, vector<200x16xbf16>, vector<736x16xf32> -> vector<736x16xf32>
    %c0_3 = arith.constant 0 : index
    %c0_4 = arith.constant 0 : index
    %3 = vector.load %arg3[%c0_3, %c0_4] : memref<1x16xf32, #tpu.memory_space<vmem>>, vector<1x16xf32>
    %4 = vector.broadcast %3 : vector<1x16xf32> to vector<736x16xf32>
    %5 = arith.addf %2, %4 : vector<736x16xf32>
    %cst_5 = arith.constant 0.000000e+00 : f32
    %6 = vector.broadcast %cst_5 : f32 to vector<736x16xf32>
    %7 = arith.maximumf %5, %6 : vector<736x16xf32>
    %8 = arith.truncf %7 : vector<736x16xf32> to vector<736x16xbf16>
    %c0_6 = arith.constant 0 : index
    %c0_7 = arith.constant 0 : index
    %9 = vector.load %arg4[%c0_6, %c0_7] : memref<736x16xbf16, #tpu.memory_space<vmem>>, vector<736x16xbf16>
    tpu.vector_store %arg4[%c0_6, %c0_7], %8 {strides = array<i32>} : memref<736x16xbf16, #tpu.memory_space<vmem>>, vector<736x16xbf16>,
    return
  }
  func.func @transform_0(%arg0: i32) -> (i32, i32) {
    %c0_i32 = arith.constant 0 : i32
    %c0_i32_0 = arith.constant 0 : i32
    return %arg0, %c0_i32 : i32, i32
  }
  func.func @transform_1(%arg0: i32) -> (i32, i32) {
    %c0_i32 = arith.constant 0 : i32
    %c0_i32_0 = arith.constant 0 : i32
    %c0_i32_1 = arith.constant 0 : i32
    return %c0_i32, %c0_i32_0 : i32, i32
  }
  func.func @transform_2(%arg0: i32) -> (i32, i32) {
    %c0_i32 = arith.constant 0 : i32
    %c0_i32_0 = arith.constant 0 : i32
    %c0_i32_1 = arith.constant 0 : i32
    return %c0_i32, %c0_i32_0 : i32, i32
  }
  func.func @transform_3(%arg0: i32) -> (i32, i32) {
    %c0_i32 = arith.constant 0 : i32
    %c0_i32_0 = arith.constant 0 : i32
    return %arg0, %c0_i32 : i32, i32
  }
}

module attributes {stable_mosaic.version = 11 : i64} {
  func.func @_matmul_bias_kernel(%arg0: i32, %arg1: memref<338x144xbf16, #tpu.memory_space<vmem>>, %arg2: memref<144x16xbf16, #tpu.memory_space<vmem>>, %arg3: memref<1x16xf32, #tpu.memory_space<vmem>>, %arg4: memref<338x16xbf16, #tpu.memory_space<vmem>>) attributes {dimension_semantics = [#tpu.dimension_semantics<parallel>], iteration_bounds = array<i64: 1>, scalar_prefetch = 0 : i64, scratch_operands = 0 : i64, tpu.core_type = #tpu.core_type<tc>, window_params = [{transform_indices = @transform_0, window_bounds = array<i64: 338, 144>}, {pipeline_mode = #tpu.pipeline_mode<synchronous>, transform_indices = @transform_1, window_bounds = array<i64: 144, 16>}, {pipeline_mode = #tpu.pipeline_mode<synchronous>, transform_indices = @transform_2, window_bounds = array<i64: 1, 16>}, {transform_indices = @transform_3, window_bounds = array<i64: 338, 16>}]} {
    %c0 = arith.constant 0 : index
    %c0_0 = arith.constant 0 : index
    %0 = vector.load %arg1[%c0, %c0_0] : memref<338x144xbf16, #tpu.memory_space<vmem>>, vector<338x144xbf16>
    %c0_1 = arith.constant 0 : index
    %c0_2 = arith.constant 0 : index
    %1 = vector.load %arg2[%c0_1, %c0_2] : memref<144x16xbf16, #tpu.memory_space<vmem>>, vector<144x16xbf16>
    %cst = arith.constant dense<0.000000e+00> : vector<338x16xf32>
    %2 = tpu.matmul %0, %1, %cst {dimension_numbers = #tpu.dot_dimension_numbers<[1], [0], [0], [1], [0, 0, 1, 1], [], []>} : vector<338x144xbf16>, vector<144x16xbf16>, vector<338x16xf32> -> vector<338x16xf32>
    %c0_3 = arith.constant 0 : index
    %c0_4 = arith.constant 0 : index
    %3 = vector.load %arg3[%c0_3, %c0_4] : memref<1x16xf32, #tpu.memory_space<vmem>>, vector<1x16xf32>
    %4 = vector.broadcast %3 : vector<1x16xf32> to vector<338x16xf32>
    %5 = arith.addf %2, %4 : vector<338x16xf32>
    %cst_5 = arith.constant 0.000000e+00 : f32
    %6 = vector.broadcast %cst_5 : f32 to vector<338x16xf32>
    %7 = arith.maximumf %5, %6 : vector<338x16xf32>
    %8 = arith.truncf %7 : vector<338x16xf32> to vector<338x16xbf16>
    %c0_6 = arith.constant 0 : index
    %c0_7 = arith.constant 0 : index
    %9 = vector.load %arg4[%c0_6, %c0_7] : memref<338x16xbf16, #tpu.memory_space<vmem>>, vector<338x16xbf16>
    tpu.vector_store %arg4[%c0_6, %c0_7], %8 {strides = array<i32>} : memref<338x16xbf16, #tpu.memory_space<vmem>>, vector<338x16xbf16>,
    return
  }
  func.func @transform_0(%arg0: i32) -> (i32, i32) {
    %c0_i32 = arith.constant 0 : i32
    %c0_i32_0 = arith.constant 0 : i32
    return %arg0, %c0_i32 : i32, i32
  }
  func.func @transform_1(%arg0: i32) -> (i32, i32) {
    %c0_i32 = arith.constant 0 : i32
    %c0_i32_0 = arith.constant 0 : i32
    %c0_i32_1 = arith.constant 0 : i32
    return %c0_i32, %c0_i32_0 : i32, i32
  }
  func.func @transform_2(%arg0: i32) -> (i32, i32) {
    %c0_i32 = arith.constant 0 : i32
    %c0_i32_0 = arith.constant 0 : i32
    %c0_i32_1 = arith.constant 0 : i32
    return %c0_i32, %c0_i32_0 : i32, i32
  }
  func.func @transform_3(%arg0: i32) -> (i32, i32) {
    %c0_i32 = arith.constant 0 : i32
    %c0_i32_0 = arith.constant 0 : i32
    return %arg0, %c0_i32 : i32, i32
  }
}

module attributes {stable_mosaic.version = 11 : i64} {
  func.func @_classifier_kernel(%arg0: i32, %arg1: memref<2x576xbf16, #tpu.memory_space<vmem>>, %arg2: memref<576x32xbf16, #tpu.memory_space<vmem>>, %arg3: memref<1x32xf32, #tpu.memory_space<vmem>>, %arg4: memref<32x32xbf16, #tpu.memory_space<vmem>>, %arg5: memref<1x32xf32, #tpu.memory_space<vmem>>, %arg6: memref<32x10xbf16, #tpu.memory_space<vmem>>, %arg7: memref<1x10xf32, #tpu.memory_space<vmem>>, %arg8: memref<2x10xf32, #tpu.memory_space<vmem>>) attributes {dimension_semantics = [#tpu.dimension_semantics<arbitrary>], iteration_bounds = array<i64: 1>, scalar_prefetch = 0 : i64, scratch_operands = 0 : i64, tpu.core_type = #tpu.core_type<tc>, window_params = [{pipeline_mode = #tpu.pipeline_mode<synchronous>, transform_indices = @transform_0, window_bounds = array<i64: 2, 576>}, {pipeline_mode = #tpu.pipeline_mode<synchronous>, transform_indices = @transform_1, window_bounds = array<i64: 576, 32>}, {pipeline_mode = #tpu.pipeline_mode<synchronous>, transform_indices = @transform_2, window_bounds = array<i64: 1, 32>}, {pipeline_mode = #tpu.pipeline_mode<synchronous>, transform_indices = @transform_3, window_bounds = array<i64: 32, 32>}, {pipeline_mode = #tpu.pipeline_mode<synchronous>, transform_indices = @transform_4, window_bounds = array<i64: 1, 32>}, {pipeline_mode = #tpu.pipeline_mode<synchronous>, transform_indices = @transform_5, window_bounds = array<i64: 32, 10>}, {pipeline_mode = #tpu.pipeline_mode<synchronous>, transform_indices = @transform_6, window_bounds = array<i64: 1, 10>}, {pipeline_mode = #tpu.pipeline_mode<synchronous>, transform_indices = @transform_7, window_bounds = array<i64: 2, 10>}]} {
    %c0 = arith.constant 0 : index
    %c0_0 = arith.constant 0 : index
    %0 = vector.load %arg1[%c0, %c0_0] : memref<2x576xbf16, #tpu.memory_space<vmem>>, vector<2x576xbf16>
    %c0_1 = arith.constant 0 : index
    %c0_2 = arith.constant 0 : index
    %1 = vector.load %arg2[%c0_1, %c0_2] : memref<576x32xbf16, #tpu.memory_space<vmem>>, vector<576x32xbf16>
    %cst = arith.constant dense<0.000000e+00> : vector<2x32xf32>
    %2 = tpu.matmul %0, %1, %cst {dimension_numbers = #tpu.dot_dimension_numbers<[1], [0], [0], [1], [0, 0, 1, 1], [], []>} : vector<2x576xbf16>, vector<576x32xbf16>, vector<2x32xf32> -> vector<2x32xf32>
    %c0_3 = arith.constant 0 : index
    %c0_4 = arith.constant 0 : index
    %3 = vector.load %arg3[%c0_3, %c0_4] : memref<1x32xf32, #tpu.memory_space<vmem>>, vector<1x32xf32>
    %4 = vector.broadcast %3 : vector<1x32xf32> to vector<2x32xf32>
    %5 = arith.addf %2, %4 : vector<2x32xf32>
    %cst_5 = arith.constant 0.000000e+00 : f32
    %6 = vector.broadcast %cst_5 : f32 to vector<2x32xf32>
    %7 = arith.maximumf %5, %6 : vector<2x32xf32>
    %8 = arith.truncf %7 : vector<2x32xf32> to vector<2x32xbf16>
    %c0_6 = arith.constant 0 : index
    %c0_7 = arith.constant 0 : index
    %9 = vector.load %arg4[%c0_6, %c0_7] : memref<32x32xbf16, #tpu.memory_space<vmem>>, vector<32x32xbf16>
    %cst_8 = arith.constant dense<0.000000e+00> : vector<2x32xf32>
    %10 = tpu.matmul %8, %9, %cst_8 {dimension_numbers = #tpu.dot_dimension_numbers<[1], [0], [0], [1], [0, 0, 1, 1], [], []>} : vector<2x32xbf16>, vector<32x32xbf16>, vector<2x32xf32> -> vector<2x32xf32>
    %c0_9 = arith.constant 0 : index
    %c0_10 = arith.constant 0 : index
    %11 = vector.load %arg5[%c0_9, %c0_10] : memref<1x32xf32, #tpu.memory_space<vmem>>, vector<1x32xf32>
    %12 = vector.broadcast %11 : vector<1x32xf32> to vector<2x32xf32>
    %13 = arith.addf %10, %12 : vector<2x32xf32>
    %cst_11 = arith.constant 0.000000e+00 : f32
    %14 = vector.broadcast %cst_11 : f32 to vector<2x32xf32>
    %15 = arith.maximumf %13, %14 : vector<2x32xf32>
    %16 = arith.truncf %15 : vector<2x32xf32> to vector<2x32xbf16>
    %c0_12 = arith.constant 0 : index
    %c0_13 = arith.constant 0 : index
    %17 = vector.load %arg6[%c0_12, %c0_13] : memref<32x10xbf16, #tpu.memory_space<vmem>>, vector<32x10xbf16>
    %cst_14 = arith.constant dense<0.000000e+00> : vector<2x10xf32>
    %18 = tpu.matmul %16, %17, %cst_14 {dimension_numbers = #tpu.dot_dimension_numbers<[1], [0], [0], [1], [0, 0, 1, 1], [], []>} : vector<2x32xbf16>, vector<32x10xbf16>, vector<2x10xf32> -> vector<2x10xf32>
    %c0_15 = arith.constant 0 : index
    %c0_16 = arith.constant 0 : index
    %19 = vector.load %arg7[%c0_15, %c0_16] : memref<1x10xf32, #tpu.memory_space<vmem>>, vector<1x10xf32>
    %20 = vector.broadcast %19 : vector<1x10xf32> to vector<2x10xf32>
    %21 = arith.addf %18, %20 : vector<2x10xf32>
    %c0_17 = arith.constant 0 : index
    %c0_18 = arith.constant 0 : index
    %22 = vector.load %arg8[%c0_17, %c0_18] : memref<2x10xf32, #tpu.memory_space<vmem>>, vector<2x10xf32>
    tpu.vector_store %arg8[%c0_17, %c0_18], %21 {strides = array<i32>} : memref<2x10xf32, #tpu.memory_space<vmem>>, vector<2x10xf32>,
    return
  }
  func.func @transform_0(%arg0: i32) -> (i32, i32) {
    %c0_i32 = arith.constant 0 : i32
    %c0_i32_0 = arith.constant 0 : i32
    %c0_i32_1 = arith.constant 0 : i32
    return %c0_i32, %c0_i32_0 : i32, i32
  }
  func.func @transform_1(%arg0: i32) -> (i32, i32) {
    %c0_i32 = arith.constant 0 : i32
    %c0_i32_0 = arith.constant 0 : i32
    %c0_i32_1 = arith.constant 0 : i32
    return %c0_i32, %c0_i32_0 : i32, i32
  }
  func.func @transform_2(%arg0: i32) -> (i32, i32) {
    %c0_i32 = arith.constant 0 : i32
    %c0_i32_0 = arith.constant 0 : i32
    %c0_i32_1 = arith.constant 0 : i32
    return %c0_i32, %c0_i32_0 : i32, i32
  }
  func.func @transform_3(%arg0: i32) -> (i32, i32) {
    %c0_i32 = arith.constant 0 : i32
    %c0_i32_0 = arith.constant 0 : i32
    %c0_i32_1 = arith.constant 0 : i32
    return %c0_i32, %c0_i32_0 : i32, i32
  }
  func.func @transform_4(%arg0: i32) -> (i32, i32) {
    %c0_i32 = arith.constant 0 : i32
    %c0_i32_0 = arith.constant 0 : i32
    %c0_i32_1 = arith.constant 0 : i32
    return %c0_i32, %c0_i32_0 : i32, i32
  }
  func.func @transform_5(%arg0: i32) -> (i32, i32) {
    %c0_i32 = arith.constant 0 : i32
    %c0_i32_0 = arith.constant 0 : i32
    %c0_i32_1 = arith.constant 0 : i32
    return %c0_i32, %c0_i32_0 : i32, i32
  }
  func.func @transform_6(%arg0: i32) -> (i32, i32) {
    %c0_i32 = arith.constant 0 : i32
    %c0_i32_0 = arith.constant 0 : i32
    %c0_i32_1 = arith.constant 0 : i32
    return %c0_i32, %c0_i32_0 : i32, i32
  }
  func.func @transform_7(%arg0: i32) -> (i32, i32) {
    %c0_i32 = arith.constant 0 : i32
    %c0_i32_0 = arith.constant 0 : i32
    %c0_i32_1 = arith.constant 0 : i32
    return %c0_i32, %c0_i32_0 : i32, i32
  }
}

</mosaic_0001>

<bundles_post_ra>
// kernel: forward.6
= control target key start
LH: loop header
LB: loop body
LE: loop exit
PB: predicated region body
PF: predicated region fallthrough
CT: control target
= control target key end

     0   :  { %s5423_s12 = smov 0   ;;  %s5425_s13 = smov 0   ;;  %s6727_s0 = inlined_call_operand.vmem [shape: bf16[6050,363], index: 0, kind: input, shape index: {}]   ;;  %s6728_s1 = inlined_call_operand.vmem [shape: bf16[363,8], index: 1, kind: input, shape index: {}]   ;;  %s6729_s2 = inlined_call_operand.vmem [shape: f32[1,8], index: 2, kind: input, shape index: {}]   ;;  %s6730_s3 = inlined_call_operand.vmem [shape: bf16[6050,8], index: 3, kind: output, shape index: {}]  }
   0x1   :  { %s5427_s14 = smov 0  }
   0x2 LB: > { %s5436_s15 = sadd.s32 4294967295, %s5367_s14   ;;  %s5438_s16 = sadd.s32 1, %s5367_s14   ;;  %s5367_s14 = sphi %s5427_s14, %s6773_s14   ;;  %s5363_s13 = sphi %s5425_s13, %s6772_s13   ;;  %s5359_s12 = sphi %s5423_s12, %s6771_s12  }
   0x3   : > { %s85_s17 = ssub.s32 %s5367_s14, %s5438_s16  ;;  %s88_s18 = sadd.s32 1, %s5363_s13 }
   0x4   : > { %p86_p0 = scmp.eq.s32.totalorder %s85_s17, 0  ;;  %p98_p1 = scmp.ne.s32.totalorder %s5363_s13, %s5359_s12 }
   0x5   : > { %p99_p2 = scmp.eq.s32.totalorder %s5436_s15, 5  ;;  %p4137_p3 = scmp.ge.s32.totalorder %s5367_s14, 1 }
   0x6   : > { %s5446_s19 = scalar_select %p86_p0, %s5363_s13, %s88_s18  }
   0x7   : > { %p5448_p4 = por %p99_p2, %p98_p1  ;;  %p149_p5 = scmp.lt.s32.totalorder %s5367_s14, 7 }
   0x9   : > { %p150_p6 = pnand %p4137_p3, %p149_p5 }
   0xb   : > { %153 = sbr.rel (%p150_p6) target bundleno = 744 (0x2e8), region = 32 }
  0x10   : > { %v5033_v0 = vld [vmem:[%s6728_s1 + $0x38] sm:$0xff]   ;;  %v5401_v1 = vmov 0   ;;  %s5458_s23 = sshll.u32 %s5436_s15, 7  ;;  %v5034_v2 = vld [vmem:[%s6728_s1 + $0x30] sm:$0xff]   ;;  %v5035_v3 = vld [vmem:[%s6728_s1 + $0x28] sm:$0xff]   ;;  %vm1800_vm0 = vcmask 1044480  }
  0x11   : > { %1807 = vmatprep.subr.bf16.mxu0 %v5401_v1  ;;  %4910 = vmatprep.subr.bf16.mxu1 %v5401_v1  ;;  %p184_p7 = scmp.lt.s32.totalorder %s5458_s23, 756  ;;  %v5036_v4 = vld [vmem:[%s6728_s1 + $0x20] sm:$0xff]   ;;  %v5037_v5 = vld [vmem:[%s6728_s1 + $0x18] sm:$0xff]   ;;  %v5038_v7 = vld [vmem:[%s6728_s1 + $0x10] sm:$0xff]   ;;  %vm1801_vm1 = vcmask 1045504   ;;  %v5402_v17 = vmov 65535  }
  0x12   : > { %1808 = vmatpush1.bf16.msra.mxu0 %v5033_v0  ;;  %4926 = vmatpush1.bf16.msra.mxu1 %v5033_v0  ;;  %v5039_v9 = vld [vmem:[%s6728_s1 + $0x8] sm:$0xff]   ;;  %v5040_v10 = vld [vmem:[%s6728_s1] sm:$0xff]   ;;  %v5041_v11 = vld [vmem:[%s6728_s1 + $0x78] sm:$0xff]   ;;  %v1802_v18 = vsel %vm1800_vm0, 4294967295, %v5402_v17  ;;  %vm1607_vm2 = vcmask 875520   ;;  %s175_s10 = sand.u32 1, %s5359_s12  }
  0x13   : > { %1809 = vmatprep.subr.bf16.mxu0 %v5401_v1  ;;  %4911 = vmatprep.subr.bf16.mxu1 %v5401_v1  ;;  %s185_s28 = scalar_select %p184_p7, %s5458_s23, 756  ;;  %v5042_v12 = vld [vmem:[%s6728_s1 + $0x70] sm:$0xff]   ;;  %v5043_v13 = vld [vmem:[%s6728_s1 + $0x68] sm:$0xff]   ;;  %v5044_v14 = vld [vmem:[%s6728_s1 + $0x60] sm:$0xff]   ;;  %v1803_v21 = vsel %vm1801_vm1, %v1802_v18, 0  ;;  %vm3537_vm3 = vcmask 60416  }
  0x14   : > { %v5045_v15 = vld [vmem:[%s6728_s1 + $0x58] sm:$0xff]   ;;  %v5046_v16 = vld [vmem:[%s6728_s1 + $0x50] sm:$0xff]   ;;  %v5047_v19 = vld [vmem:[%s6728_s1 + $0x48] sm:$0xff]   ;;  %s4138_s11 = sshll.u32 %s175_s10, 9  ;;  %s3674_s17 = ssub.s32 (%p5448_p4), 757, %s5458_s23 }
  0x15   : > { %s4942_s4 = smul.u32 12, %s185_s28  ;;  %v5055_v20 = vld [vmem:[%s6728_s1 + $0xb0] sm:$0x3f]   ;;  %v5048_v22 = vld [vmem:[%s6728_s1 + $0x40] sm:$0xff]   ;;  %v5068_v28 = vld [vmem:[%s6728_s1 + $0xa8] sm:$0xff]   ;;  %s5932_s12 = scalar_lea.vmem [#allocation2], %s4138_s11  }
  0x16   : > { %1810 = vmatpush1.bf16.msra.mxu0 %v5034_v2  ;;  %4927 = vmatpush1.bf16.msra.mxu1 %v5034_v2  ;;  %v1805_v23 = vand.u32 %v5055_v20, %v1803_v21  ;;  %v5081_v30 = vld [vmem:[%s6728_s1 + $0xa0] sm:$0xff]   ;;  %v5098_v34 = vld [vmem:[%s6728_s1 + $0x98] sm:$0xff]   ;;  %v5113_v35 = vld [vmem:[%s6728_s1 + $0x90] sm:$0xff]   ;;  %s4694_s18 = sshll.u32 (%p5448_p4), %s5436_s15, 9  ;;  %p3675_p8 = scmp.lt.s32.totalorder (%p5448_p4), %s3674_s17, 128 }
  0x17   : > { %1811 = vmatprep.subr.bf16.mxu0 %v5401_v1  ;;  %4912 = vmatprep.subr.bf16.mxu1 %v5401_v1  ;;  %s5483_s9 = scalar_lea.vmem %s6727_s0, %s4942_s4  ;;  %v5126_v40 = vld [vmem:[%s6728_s1 + $0x88] sm:$0xff]   ;;  %v5139_v41 = vld [vmem:[%s6728_s1 + $0x80] sm:$0xff]   ;;  %s6535_s24 = scalar_lea.vmem (%p5448_p4), %s6730_s3, %s4694_s18  }
  0x18   : > { %v5051_v6 = vld [vmem:[%s5483_s9 + $0x4] ss:$12 sps:$4 sm:$0xff]   ;;  %v5049_v24 = vld [vmem:[%s5483_s9] ss:$12 sps:$4 sm:$0xff]   ;;  %v5056_v26 = vld [vmem:[%s5483_s9 + $0x1c] ss:$12 sps:$4 sm:$0xff]  }
  0x19   : > { %v5054_v8 = vld [vmem:[%s5483_s9 + $0x484] ss:$12 sps:$4 sm:$0xff]   ;;  %1839 = vmatprep.mubr.bf16.mxu0 %v5051_v6  ;;  %v5052_v25 = vld [vmem:[%s5483_s9 + $0x480] ss:$12 sps:$4 sm:$0xff]   ;;  %v5058_v27 = vld [vmem:[%s5483_s9 + $0x49c] ss:$12 sps:$4 sm:$0xff]  }
  0x1a   : > { %1812 = vmatpush1.bf16.msra.mxu0 %v5035_v3  ;;  %4928 = vmatpush1.bf16.msra.mxu1 %v5035_v3  ;;  %v5060_v29 = vld [vmem:[%s5483_s9 + $0x18] ss:$12 sps:$4 sm:$0xff]   ;;  %v5062_v32 = vld [vmem:[%s5483_s9 + $0x34] ss:$12 sps:$4 sm:$0xff]   ;;  %v5066_v36 = vld [vmem:[%s5483_s9 + $0x30] ss:$12 sps:$4 sm:$0xff]  }
  0x1b   : > { %1813 = vmatprep.subr.bf16.mxu0 %v5401_v1  ;;  %4913 = vmatprep.subr.bf16.mxu1 %v5401_v1  ;;  %v5061_v31 = vld [vmem:[%s5483_s9 + $0x498] ss:$12 sps:$4 sm:$0xff]   ;;  %v5064_v33 = vld [vmem:[%s5483_s9 + $0x4b4] ss:$12 sps:$4 sm:$0xff]   ;;  %v5067_v37 = vld [vmem:[%s5483_s9 + $0x4b0] ss:$12 sps:$4 sm:$0xff]  }
  0x1c   : > { %2223 = vmatprep.mubr.bf16.mxu1 %v5054_v8  ;;  %v5069_v38 = vld [vmem:[%s5483_s9 + $0x4c] ss:$12 sps:$4 sm:$0xff]   ;;  %v5073_v42 = vld [vmem:[%s5483_s9 + $0x48] ss:$12 sps:$4 sm:$0xff]   ;;  %v5075_v44 = vld [vmem:[%s5483_s9 + $0x64] ss:$12 sps:$4 sm:$0xff]  }
  0x1d   : > { %v5071_v39 = vld [vmem:[%s5483_s9 + $0x4cc] ss:$12 sps:$4 sm:$0xff]   ;;  %v5074_v43 = vld [vmem:[%s5483_s9 + $0x4c8] ss:$12 sps:$4 sm:$0xff]   ;;  %v5077_v45 = vld [vmem:[%s5483_s9 + $0x4e4] ss:$12 sps:$4 sm:$0xff]  }
  0x1e   : > { %1814 = vmatpush1.bf16.msra.mxu0 %v5036_v4  ;;  %4929 = vmatpush1.bf16.msra.mxu1 %v5036_v4  ;;  %v5079_v46 = vld [vmem:[%s5483_s9 + $0x60] ss:$12 sps:$4 sm:$0xff]   ;;  %v5082_v48 = vld [vmem:[%s5483_s9 + $0x7c] ss:$12 sps:$4 sm:$0xff]   ;;  %v5086_v50 = vld [vmem:[%s5483_s9 + $0x78] ss:$12 sps:$4 sm:$0xff]  }
  0x1f   : > { %1815 = vmatprep.subr.bf16.mxu0 %v5401_v1  ;;  %4914 = vmatprep.subr.bf16.mxu1 %v5401_v1  ;;  %v5080_v47 = vld [vmem:[%s5483_s9 + $0x4e0] ss:$12 sps:$4 sm:$0xff]   ;;  %v5084_v49 = vld [vmem:[%s5483_s9 + $0x4fc] ss:$12 sps:$4 sm:$0xff]   ;;  %v5087_v51 = vld [vmem:[%s5483_s9 + $0x4f8] ss:$12 sps:$4 sm:$0xff]  }
  0x20   : > { %v5088_v52 = vld [vmem:[%s5483_s9 + $0x94] ss:$12 sps:$4 sm:$0xff]   ;;  %v5092_v54 = vld [vmem:[%s5483_s9 + $0x90] ss:$12 sps:$4 sm:$0xff]   ;;  %v5094_v56 = vld [vmem:[%s5483_s9 + $0xac] ss:$12 sps:$4 sm:$0xff]  }
  0x21   : > { %v5090_v53 = vld [vmem:[%s5483_s9 + $0x514] ss:$12 sps:$4 sm:$0xff]   ;;  %v5093_v55 = vld [vmem:[%s5483_s9 + $0x510] ss:$12 sps:$4 sm:$0xff]   ;;  %v5096_v57 = vld [vmem:[%s5483_s9 + $0x52c] ss:$12 sps:$4 sm:$0xff]  }
  0x22   : > { %1816 = vmatpush1.bf16.msra.mxu0 %v5037_v5  ;;  %4930 = vmatpush1.bf16.msra.mxu1 %v5037_v5  ;;  %v5099_v58 = vld [vmem:[%s5483_s9 + $0xa8] ss:$12 sps:$4 sm:$0xff]   ;;  %v5101_v60 = vld [vmem:[%s5483_s9 + $0xc4] ss:$12 sps:$4 sm:$0xff]   ;;  %v5105_v62 = vld [vmem:[%s5483_s9 + $0xc0] ss:$12 sps:$4 sm:$0xff]  }
  0x23   : > { %1817 = vmatprep.subr.bf16.mxu0 %v5401_v1  ;;  %4915 = vmatprep.subr.bf16.mxu1 %v5401_v1  ;;  %v5100_v59 = vld [vmem:[%s5483_s9 + $0x528] ss:$12 sps:$4 sm:$0xff]   ;;  %v5103_v61 = vld [vmem:[%s5483_s9 + $0x544] ss:$12 sps:$4 sm:$0xff]   ;;  %v5106_v63 = vld [vmem:[%s5483_s9 + $0x540] ss:$12 sps:$4 sm:$0xff]  }
  0x24   : > { %v5107_v0 = vld [vmem:[%s5483_s9 + $0xdc] ss:$12 sps:$4 sm:$0xff]   ;;  %v5111_v2 = vld [vmem:[%s5483_s9 + $0xd8] ss:$12 sps:$4 sm:$0xff]   ;;  %v5114_v4 = vld [vmem:[%s5483_s9 + $0xf4] ss:$12 sps:$4 sm:$0xff]  }
  0x25   : > { %v5112_v3 = vld [vmem:[%s5483_s9 + $0x558] ss:$12 sps:$4 sm:$0xff]   ;;  %v5116_v5 = vld [vmem:[%s5483_s9 + $0x574] ss:$12 sps:$4 sm:$0xff]   ;;  %v5118_v6 = vld [vmem:[%s5483_s9 + $0xf0] ss:$12 sps:$4 sm:$0xff]  }
  0x26   : > { %1818 = vmatpush1.bf16.msra.mxu0 %v5038_v7  ;;  %4931 = vmatpush1.bf16.msra.mxu1 %v5038_v7  ;;  %v5119_v7 = vld [vmem:[%s5483_s9 + $0x570] ss:$12 sps:$4 sm:$0xff]   ;;  %v5120_v8 = vld [vmem:[%s5483_s9 + $0x10c] ss:$12 sps:$4 sm:$0xff]   ;;  %v5140_v20 = vld [vmem:[%s5483_s9 + $0x154] ss:$12 sps:$4 sm:$0xff]  }
  0x27   : > { %1819 = vmatprep.subr.bf16.mxu0 %v5401_v1  ;;  %4916 = vmatprep.subr.bf16.mxu1 %v5401_v1  ;;  %v5135_v17 = vld [vmem:[%s5483_s9 + $0x5bc] ss:$12 sps:$4 sm:$0xff]   ;;  %v5137_v18 = vld [vmem:[%s5483_s9 + $0x138] ss:$12 sps:$4 sm:$0xff]   ;;  %v5142_v21 = vld [vmem:[%s5483_s9 + $0x5d4] ss:$12 sps:$4 sm:$0xff]  }
  0x2a   : > { %1820 = vmatpush1.bf16.msra.mxu0 %v5039_v9  ;;  %4932 = vmatpush1.bf16.msra.mxu1 %v5039_v9  ;;  %v5122_v9 = vld [vmem:[%s5483_s9 + $0x58c] ss:$12 sps:$4 sm:$0xff]  }
  0x2b   : > { %1821 = vmatprep.subr.bf16.mxu0 %v5401_v1  ;;  %4917 = vmatprep.subr.bf16.mxu1 %v5401_v1 }
  0x2e   : > { %1822 = vmatpush1.bf16.msra.mxu0 %v5040_v10  ;;  %4933 = vmatpush1.bf16.msra.mxu1 %v5040_v10  ;;  %v5124_v10 = vld [vmem:[%s5483_s9 + $0x108] ss:$12 sps:$4 sm:$0xff]  }
  0x2f   : > { %1823 = vmatprep.subr.bf16.mxu0 %v5401_v1  ;;  %4918 = vmatprep.subr.bf16.mxu1 %v5401_v1 }
  0x32   : > { %1824 = vmatpush2.bf16.msra.mxu0 %v5041_v11  ;;  %4934 = vmatpush2.bf16.msra.mxu1 %v5041_v11  ;;  %v5125_v11 = vld [vmem:[%s5483_s9 + $0x588] ss:$12 sps:$4 sm:$0xff]  }
  0x33   : > { %1825 = vmatprep.subr.bf16.mxu0 %v5401_v1  ;;  %4919 = vmatprep.subr.bf16.mxu1 %v5401_v1 }
  0x36   : > { %1826 = vmatpush2.bf16.msra.mxu0 %v5042_v12  ;;  %4935 = vmatpush2.bf16.msra.mxu1 %v5042_v12  ;;  %v5127_v12 = vld [vmem:[%s5483_s9 + $0x124] ss:$12 sps:$4 sm:$0xff]  }
  0x37   : > { %1827 = vmatprep.subr.bf16.mxu0 %v5401_v1  ;;  %4920 = vmatprep.subr.bf16.mxu1 %v5401_v1 }
  0x3a   : > { %1828 = vmatpush2.bf16.msra.mxu0 %v5043_v13  ;;  %4936 = vmatpush2.bf16.msra.mxu1 %v5043_v13  ;;  %v5129_v13 = vld [vmem:[%s5483_s9 + $0x5a4] ss:$12 sps:$4 sm:$0xff]  }
  0x3b   : > { %1829 = vmatprep.subr.bf16.mxu0 %v5401_v1  ;;  %4921 = vmatprep.subr.bf16.mxu1 %v5401_v1 }
  0x3e   : > { %1830 = vmatpush2.bf16.msra.mxu0 %v5044_v14  ;;  %4937 = vmatpush2.bf16.msra.mxu1 %v5044_v14  ;;  %v5131_v14 = vld [vmem:[%s5483_s9 + $0x120] ss:$12 sps:$4 sm:$0xff]  }
  0x3f   : > { %1831 = vmatprep.subr.bf16.mxu0 %v5401_v1  ;;  %4922 = vmatprep.subr.bf16.mxu1 %v5401_v1 }
  0x42   : > { %1832 = vmatpush2.bf16.msra.mxu0 %v5045_v15  ;;  %4938 = vmatpush2.bf16.msra.mxu1 %v5045_v15  ;;  %v5132_v15 = vld [vmem:[%s5483_s9 + $0x5a0] ss:$12 sps:$4 sm:$0xff]  }
  0x43   : > { %1833 = vmatprep.subr.bf16.mxu0 %v5401_v1  ;;  %4923 = vmatprep.subr.bf16.mxu1 %v5401_v1 }
  0x46   : > { %1834 = vmatpush2.bf16.msra.mxu0 %v5046_v16  ;;  %4939 = vmatpush2.bf16.msra.mxu1 %v5046_v16  ;;  %v5133_v16 = vld [vmem:[%s5483_s9 + $0x13c] ss:$12 sps:$4 sm:$0xff]  }
  0x47   : > { %1835 = vmatprep.subr.bf16.mxu0 %v5401_v1  ;;  %4924 = vmatprep.subr.bf16.mxu1 %v5401_v1 }
  0x4a   : > { %1836 = vmatpush2.bf16.msra.mxu0 %v5047_v19  ;;  %4940 = vmatpush2.bf16.msra.mxu1 %v5047_v19  ;;  %v5138_v19 = vld [vmem:[%s5483_s9 + $0x5b8] ss:$12 sps:$4 sm:$0xff]  }
  0x4b   : > { %1837 = vmatprep.subr.bf16.mxu0 %v5401_v1  ;;  %4925 = vmatprep.subr.bf16.mxu1 %v5401_v1  ;;  %v5109_v1 = vld [vmem:[%s5483_s9 + $0x55c] ss:$12 sps:$4 sm:$0xff]  }
  0x4e   : > { %1838 = vmatpush2.bf16.msra.mxu0 %v5048_v22  ;;  %4941 = vmatpush2.bf16.msra.mxu1 %v5048_v22  ;;  %v5144_v22 = vld [vmem:[%s5483_s9 + $0x150] ss:$12 sps:$4 sm:$0xff]  }
  0x4f   : > { %4768 = vmatprep.subr.bf16.mxu1 %v1805_v23 }
  0x51   : > { %1840 = vmatmul.mubr.bf16.vlgmr.msra.gmra.mxu0 %v5049_v24  ;;  %2224 = vmatmul.mubr.bf16.vlgmr.msra.gmra.mxu1 %v5052_v25  ;;  %v5146_v24 = vld [vmem:[%s5483_s9 + $0x16c] ss:$12 sps:$4 sm:$0xff]  }
  0x52   : > { %4769 = vmatpush3.bf16.msra.mxu1 %v1805_v23  ;;  %1847 = vmatprep.mubr.bf16.mxu0 %v5056_v26  ;;  %v5145_v23 = vld [vmem:[%s5483_s9 + $0x5d0] ss:$12 sps:$4 sm:$0xff]   ;;  %v5148_v25 = vld [vmem:[%s5483_s9 + $0x5ec] ss:$12 sps:$4 sm:$0xff]   ;;  %v5150_v26 = vld [vmem:[%s5483_s9 + $0x168] ss:$12 sps:$4 sm:$0xff]  }
  0x53   : > { %2231 = vmatprep.mubr.bf16.mxu1 %v5058_v27  ;;  %4770 = vmatprep.subr.bf16.mxu1 %v5068_v28  ;;  %v5151_v27 = vld [vmem:[%s5483_s9 + $0x5e8] ss:$12 sps:$4 sm:$0xff]  }
  0x56   : > { %4771 = vmatpush3.bf16.msra.mxu1 %v5068_v28  ;;  %v5152_v28 = vld [vmem:[%s5483_s9 + $0x184] ss:$12 sps:$4 sm:$0xff]  }
  0x57   : > { %4772 = vmatprep.subr.bf16.mxu1 %v5081_v30 }
  0x59   : > { %1848 = vmatmul.mubr.bf16.gmra.mxu0 %v5060_v29  ;;  %2232 = vmatmul.mubr.bf16.gmra.mxu1 %v5061_v31  ;;  %v5154_v29 = vld [vmem:[%s5483_s9 + $0x8] ss:$12 sps:$4 sm:$0xff]   ;;  %v5156_v31 = vld [vmem:[%s5483_s9 + $0x20] ss:$12 sps:$4 sm:$0xff]  }
  0x5a   : > { %1855 = vmatprep.mubr.bf16.mxu0 %v5062_v32  ;;  %2239 = vmatprep.mubr.bf16.mxu1 %v5064_v33  ;;  %v5157_v32 = vld [vmem:[%s5483_s9 + $0x19c] ss:$12 sps:$4 sm:$0xff]   ;;  %v5159_v33 = vld [vmem:[%s5483_s9 + $0x38] ss:$12 sps:$4 sm:$0xff]  }
  0x5b   : > { %4773 = vmatpush3.bf16.msra.mxu1 %v5081_v30  ;;  %v5155_v30 = vld [vmem:[%s5483_s9 + $0x180] ss:$12 sps:$4 sm:$0xff]  }
  0x5c   : > { %4774 = vmatprep.subr.bf16.mxu1 %v5098_v34 }
  0x5f   : > { %4775 = vmatpush3.bf16.msra.mxu1 %v5098_v34  ;;  %v5160_v34 = vld [vmem:[%s5483_s9 + $0x198] ss:$12 sps:$4 sm:$0xff]  }
  0x60   : > { %4776 = vmatprep.subr.bf16.mxu1 %v5113_v35 }
  0x61   : > { %1856 = vmatmul.mubr.bf16.gmra.mxu0 %v5066_v36  ;;  %2240 = vmatmul.mubr.bf16.gmra.mxu1 %v5067_v37  ;;  %v5162_v36 = vld [vmem:[%s5483_s9 + $0x1b4] ss:$12 sps:$4 sm:$0xff]  }
  0x62   : > { %1863 = vmatprep.mubr.bf16.mxu0 %v5069_v38  ;;  %2247 = vmatprep.mubr.bf16.mxu1 %v5071_v39  ;;  %v5164_v37 = vld [vmem:[%s5483_s9 + $0x68] ss:$12 sps:$4 sm:$0xff]   ;;  %v5165_v38 = vld [vmem:[%s5483_s9 + $0x1b0] ss:$12 sps:$4 sm:$0xff]   ;;  %v5166_v39 = vld [vmem:[%s5483_s9 + $0x80] ss:$12 sps:$4 sm:$0xff]  }
  0x63   : > { %4777 = vmatpush3.bf16.msra.mxu1 %v5113_v35  ;;  %v5161_v35 = vld [vmem:[%s5483_s9 + $0x50] ss:$12 sps:$4 sm:$0xff]  }
  0x64   : > { %4778 = vmatprep.subr.bf16.mxu1 %v5126_v40 }
  0x67   : > { %4779 = vmatpush3.bf16.msra.mxu1 %v5126_v40  ;;  %v5167_v40 = vld [vmem:[%s5483_s9 + $0x1cc] ss:$12 sps:$4 sm:$0xff]  }
  0x68   : > { %4780 = vmatprep.subr.bf16.mxu1 %v5139_v41 }
  0x69   : > { %1864 = vmatmul.mubr.bf16.gmra.mxu0 %v5073_v42  ;;  %2248 = vmatmul.mubr.bf16.gmra.mxu1 %v5074_v43  ;;  %v5170_v42 = vld [vmem:[%s5483_s9 + $0x1c8] ss:$12 sps:$4 sm:$0xff]   ;;  %v5171_v43 = vld [vmem:[%s5483_s9 + $0xb0] ss:$12 sps:$4 sm:$0xff]  }
  0x6a   : > { %1871 = vmatprep.mubr.bf16.mxu0 %v5075_v44  ;;  %2255 = vmatprep.mubr.bf16.mxu1 %v5077_v45  ;;  %v5172_v44 = vld [vmem:[%s5483_s9 + $0x1e4] ss:$12 sps:$4 sm:$0xff]   ;;  %v5174_v45 = vld [vmem:[%s5483_s9 + $0xc8] ss:$12 sps:$4 sm:$0xff]  }
  0x6b   : > { %4781 = vmatpush3.bf16.msra.mxu1 %v5139_v41  ;;  %v5169_v41 = vld [vmem:[%s5483_s9 + $0x98] ss:$12 sps:$4 sm:$0xff]  }
  0x71   : > { %1872 = vmatmul.mubr.bf16.gmra.mxu0 %v5079_v46  ;;  %2256 = vmatmul.mubr.bf16.gmra.mxu1 %v5080_v47  ;;  %v5175_v46 = vld [vmem:[%s5483_s9 + $0x1e0] ss:$12 sps:$4 sm:$0xff]  }
  0x72   : > { %1879 = vmatprep.mubr.bf16.mxu0 %v5082_v48  ;;  %2263 = vmatprep.mubr.bf16.mxu1 %v5084_v49  ;;  %v5176_v47 = vld [vmem:[%s5483_s9 + $0xe0] ss:$12 sps:$4 sm:$0xff]   ;;  %v5177_v48 = vld [vmem:[%s5483_s9 + $0x1fc] ss:$12 sps:$4 sm:$0xff]   ;;  %v5179_v49 = vld [vmem:[%s5483_s9 + $0xf8] ss:$12 sps:$4 sm:$0xff]  }
  0x79   : > { %1880 = vmatmul.mubr.bf16.gmra.mxu0 %v5086_v50  ;;  %2264 = vmatmul.mubr.bf16.gmra.mxu1 %v5087_v51  ;;  %v5180_v50 = vld [vmem:[%s5483_s9 + $0x1f8] ss:$12 sps:$4 sm:$0xff]   ;;  %v5181_v51 = vld [vmem:[%s5483_s9 + $0x110] ss:$12 sps:$4 sm:$0xff]  }
  0x7a   : > { %1887 = vmatprep.mubr.bf16.mxu0 %v5088_v52  ;;  %2271 = vmatprep.mubr.bf16.mxu1 %v5090_v53  ;;  %v5182_v52 = vld [vmem:[%s5483_s9 + $0x214] ss:$12 sps:$4 sm:$0xff]  }
  0x7b   : > { %v5184_v53 = vld [vmem:[%s5483_s9 + $0x128] ss:$12 sps:$4 sm:$0xff]  }
  0x81   : > { %1888 = vmatmul.mubr.bf16.gmra.mxu0 %v5092_v54  ;;  %2272 = vmatmul.mubr.bf16.gmra.mxu1 %v5093_v55  ;;  %v5185_v54 = vld [vmem:[%s5483_s9 + $0x210] ss:$12 sps:$4 sm:$0xff]   ;;  %v5186_v55 = vld [vmem:[%s5483_s9 + $0x140] ss:$12 sps:$4 sm:$0xff]  }
  0x82   : > { %1895 = vmatprep.mubr.bf16.mxu0 %v5094_v56  ;;  %2279 = vmatprep.mubr.bf16.mxu1 %v5096_v57  ;;  %v5187_v56 = vld [vmem:[%s5483_s9 + $0x22c] ss:$12 sps:$4 sm:$0xff]  }
  0x83   : > { %v5189_v57 = vld [vmem:[%s5483_s9 + $0x158] ss:$12 sps:$4 sm:$0xff]  }
  0x89   : > { %1896 = vmatmul.mubr.bf16.gmra.mxu0 %v5099_v58  ;;  %2280 = vmatmul.mubr.bf16.gmra.mxu1 %v5100_v59  ;;  %v5190_v58 = vld [vmem:[%s5483_s9 + $0x228] ss:$12 sps:$4 sm:$0xff]   ;;  %v5191_v59 = vld [vmem:[%s5483_s9 + $0x170] ss:$12 sps:$4 sm:$0xff]  }
  0x8a   : > { %1903 = vmatprep.mubr.bf16.mxu0 %v5101_v60  ;;  %2287 = vmatprep.mubr.bf16.mxu1 %v5103_v61  ;;  %v5192_v60 = vld [vmem:[%s5483_s9 + $0x244] ss:$12 sps:$4 sm:$0xff]   ;;  %v5194_v61 = vld [vmem:[%s5483_s9 + $0x188] ss:$12 sps:$4 sm:$0xff]  }
  0x91   : > { %1904 = vmatmul.mubr.bf16.gmra.mxu0 %v5105_v62  ;;  %2288 = vmatmul.mubr.bf16.gmra.mxu1 %v5106_v63  ;;  %v5195_v62 = vld [vmem:[%s5483_s9 + $0x240] ss:$12 sps:$4 sm:$0xff]  }
  0x92   : > { %1911 = vmatprep.mubr.bf16.mxu0 %v5107_v0  ;;  %2295 = vmatprep.mubr.bf16.mxu1 %v5109_v1  ;;  %v5196_v63 = vld [vmem:[%s5483_s9 + $0x1a0] ss:$12 sps:$4 sm:$0xff]   ;;  %v5197_v0 = vld [vmem:[%s5483_s9 + $0x25c] ss:$12 sps:$4 sm:$0xff]   ;;  %v5199_v1 = vld [vmem:[%s5483_s9 + $0x1b8] ss:$12 sps:$4 sm:$0xff]  }
  0x99   : > { %1912 = vmatmul.mubr.bf16.gmra.mxu0 %v5111_v2  ;;  %2296 = vmatmul.mubr.bf16.gmra.mxu1 %v5112_v3 }
  0x9a   : > { %1919 = vmatprep.mubr.bf16.mxu0 %v5114_v4  ;;  %2303 = vmatprep.mubr.bf16.mxu1 %v5116_v5 }
  0xa1   : > { %1920 = vmatmul.mubr.bf16.gmra.mxu0 %v5118_v6  ;;  %2304 = vmatmul.mubr.bf16.gmra.mxu1 %v5119_v7 }
  0xa2   : > { %1927 = vmatprep.mubr.bf16.mxu0 %v5120_v8  ;;  %2311 = vmatprep.mubr.bf16.mxu1 %v5122_v9  ;;  %v5200_v8 = vld [vmem:[%s5483_s9 + $0x258] ss:$12 sps:$4 sm:$0xff]   ;;  %v5201_v9 = vld [vmem:[%s5483_s9 + $0x1d0] ss:$12 sps:$4 sm:$0xff]  }
  0xa9   : > { %1928 = vmatmul.mubr.bf16.gmra.mxu0 %v5124_v10  ;;  %2312 = vmatmul.mubr.bf16.gmra.mxu1 %v5125_v11  ;;  %v5202_v10 = vld [vmem:[%s5483_s9 + $0x274] ss:$12 sps:$4 sm:$0xff]  }
  0xaa   : > { %1935 = vmatprep.mubr.bf16.mxu0 %v5127_v12  ;;  %2319 = vmatprep.mubr.bf16.mxu1 %v5129_v13  ;;  %v5204_v11 = vld [vmem:[%s5483_s9 + $0x1e8] ss:$12 sps:$4 sm:$0xff]  }
  0xb1   : > { %1936 = vmatmul.mubr.bf16.gmra.mxu0 %v5131_v14  ;;  %2320 = vmatmul.mubr.bf16.gmra.mxu1 %v5132_v15 }
  0xb2   : > { %1943 = vmatprep.mubr.bf16.mxu0 %v5133_v16  ;;  %2327 = vmatprep.mubr.bf16.mxu1 %v5135_v17 }
  0xb9   : > { %1944 = vmatmul.mubr.bf16.gmra.mxu0 %v5137_v18  ;;  %2328 = vmatmul.mubr.bf16.gmra.mxu1 %v5138_v19 }
  0xba   : > { %1951 = vmatprep.mubr.bf16.mxu0 %v5140_v20  ;;  %2335 = vmatprep.mubr.bf16.mxu1 %v5142_v21  ;;  %v5205_v20 = vld [vmem:[%s5483_s9 + $0x270] ss:$12 sps:$4 sm:$0xff]   ;;  %v5206_v21 = vld [vmem:[%s5483_s9 + $0x200] ss:$12 sps:$4 sm:$0xff]  }
  0xc1   : > { %1952 = vmatmul.mubr.bf16.gmra.mxu0 %v5144_v22  ;;  %2336 = vmatmul.mubr.bf16.gmra.mxu1 %v5145_v23  ;;  %v5207_v22 = vld [vmem:[%s5483_s9 + $0x28c] ss:$12 sps:$4 sm:$0xff]  }
  0xc2   : > { %1959 = vmatprep.mubr.bf16.mxu0 %v5146_v24  ;;  %2343 = vmatprep.mubr.bf16.mxu1 %v5148_v25  ;;  %v5209_v23 = vld [vmem:[%s5483_s9 + $0x218] ss:$12 sps:$4 sm:$0xff]  }
  0xc9   : > { %1960 = vmatmul.mubr.bf16.gmra.mxu0 %v5150_v26  ;;  %2344 = vmatmul.mubr.bf16.gmra.mxu1 %v5151_v27 }
  0xca   : > { %1967 = vmatprep.mubr.bf16.mxu0 %v5152_v28  ;;  %4782 = vmatprep.mubr.msk.bf16.mxu1 %vm1607_vm2, %v5154_v29 }
  0xd1   : > { %1968 = vmatmul.mubr.bf16.gmra.mxu0 %v5155_v30  ;;  %4783 = vmatmul.mubr.msk.bf16.vlgmr.msra.gmra.mxu1 %vm1607_vm2, %v5156_v31 }
  0xd2   : > { %1975 = vmatprep.mubr.bf16.mxu0 %v5157_v32  ;;  %4786 = vmatprep.mubr.msk.bf16.mxu1 %vm1607_vm2, %v5159_v33  ;;  %v5210_v32 = vld [vmem:[%s5483_s9 + $0x288] ss:$12 sps:$4 sm:$0xff]   ;;  %v5211_v33 = vld [vmem:[%s5483_s9 + $0x230] ss:$12 sps:$4 sm:$0xff]  }
  0xd9   : > { %1976 = vmatmul.mubr.bf16.gmra.mxu0 %v5160_v34  ;;  %4787 = vmatmul.mubr.msk.bf16.gmra.mxu1 %vm1607_vm2, %v5161_v35  ;;  %v5214_v34 = vld [vmem:[%s5483_s9 + $0x2a4] ss:$12 sps:$4 sm:$0xff]   ;;  %v5215_v35 = vld [vmem:[%s5483_s9 + $0x248] ss:$12 sps:$4 sm:$0xff]  }
  0xda   : > { %1983 = vmatprep.mubr.bf16.mxu0 %v5162_v36  ;;  %4790 = vmatprep.mubr.msk.bf16.mxu1 %vm1607_vm2, %v5164_v37 }
  0xe1   : > { %1984 = vmatmul.mubr.bf16.gmra.mxu0 %v5165_v38  ;;  %4791 = vmatmul.mubr.msk.bf16.gmra.mxu1 %vm1607_vm2, %v5166_v39 }
  0xe2   : > { %1991 = vmatprep.mubr.bf16.mxu0 %v5167_v40  ;;  %4794 = vmatprep.mubr.msk.bf16.mxu1 %vm1607_vm2, %v5169_v41 }
  0xe9   : > { %1992 = vmatmul.mubr.bf16.gmra.mxu0 %v5170_v42  ;;  %4795 = vmatmul.mubr.msk.bf16.gmra.mxu1 %vm1607_vm2, %v5171_v43 }
  0xea   : > { %1999 = vmatprep.mubr.bf16.mxu0 %v5172_v44  ;;  %4798 = vmatprep.mubr.msk.bf16.mxu1 %vm1607_vm2, %v5174_v45  ;;  %v5212_v44 = vld [vmem:[%s5483_s9 + $0x2a0] ss:$12 sps:$4 sm:$0xff]  }
  0xeb   : > { %v5216_v45 = vld [vmem:[%s5483_s9 + $0x260] ss:$12 sps:$4 sm:$0xff]  }
  0xf1   : > { %2000 = vmatmul.mubr.bf16.gmra.mxu0 %v5175_v46  ;;  %4799 = vmatmul.mubr.msk.bf16.gmra.mxu1 %vm1607_vm2, %v5176_v47  ;;  %v5219_v46 = vld [vmem:[%s5483_s9 + $0x2bc] ss:$12 sps:$4 sm:$0xff]   ;;  %v5220_v47 = vld [vmem:[%s5483_s9 + $0x278] ss:$12 sps:$4 sm:$0xff]  }
  0xf2   : > { %2007 = vmatprep.mubr.bf16.mxu0 %v5177_v48  ;;  %4802 = vmatprep.mubr.msk.bf16.mxu1 %vm1607_vm2, %v5179_v49 }
  0xf9   : > { %2008 = vmatmul.mubr.bf16.gmra.mxu0 %v5180_v50  ;;  %4803 = vmatmul.mubr.msk.bf16.gmra.mxu1 %vm1607_vm2, %v5181_v51 }
  0xfa   : > { %2015 = vmatprep.mubr.bf16.mxu0 %v5182_v52  ;;  %4806 = vmatprep.mubr.msk.bf16.mxu1 %vm1607_vm2, %v5184_v53 }
 0x101   : > { %2016 = vmatmul.mubr.bf16.gmra.mxu0 %v5185_v54  ;;  %4807 = vmatmul.mubr.msk.bf16.gmra.mxu1 %vm1607_vm2, %v5186_v55 }
 0x102   : > { %2023 = vmatprep.mubr.bf16.mxu0 %v5187_v56  ;;  %4810 = vmatprep.mubr.msk.bf16.mxu1 %vm1607_vm2, %v5189_v57  ;;  %v5217_v56 = vld [vmem:[%s5483_s9 + $0x2b8] ss:$12 sps:$4 sm:$0xff]   ;;  %v5221_v57 = vld [vmem:[%s5483_s9 + $0x290] ss:$12 sps:$4 sm:$0xff]  }
 0x109   : > { %2024 = vmatmul.mubr.bf16.gmra.mxu0 %v5190_v58  ;;  %4811 = vmatmul.mubr.msk.bf16.gmra.mxu1 %vm1607_vm2, %v5191_v59  ;;  %v5224_v58 = vld [vmem:[%s5483_s9 + $0x2d4] ss:$12 sps:$4 sm:$0xff]  }
 0x10a   : > { %2031 = vmatprep.mubr.bf16.mxu0 %v5192_v60  ;;  %4814 = vmatprep.mubr.msk.bf16.mxu1 %vm1607_vm2, %v5194_v61  ;;  %v5225_v59 = vld [vmem:[%s5483_s9 + $0x2a8] ss:$12 sps:$4 sm:$0xff]  }
 0x111   : > { %v5682_v2 = vpop.f32.mrf.mxu0  ;;  %2032 = vmatmul.mubr.bf16.gmra.mxu0 %v5195_v62  ;;  %v5684_v3 = vpop.f32.mrf.mxu1  ;;  %4815 = vmatmul.mubr.msk.bf16.gmra.mxu1 %vm1607_vm2, %v5196_v63 }
 0x112   : > { %2039 = vmatprep.mubr.bf16.mxu0 %v5197_v0  ;;  %4818 = vmatprep.mubr.msk.bf16.mxu1 %vm1607_vm2, %v5199_v1 }
 0x113   : > { %v1843_v4 = vpop.f32.mrf.mxu0  ;;  %v2227_v5 = vpop.f32.mrf.mxu1 }
 0x115   : > { %v5688_v6 = vpop.f32.mrf.mxu0  ;;  %v5690_v7 = vpop.f32.mrf.mxu1 }
 0x117   : > { %v1846_v12 = vpop.f32.mrf.mxu0  ;;  %v2230_v13 = vpop.f32.mrf.mxu1 }
 0x119   : > { %v5696_v14 = vpop.f32.mrf.mxu0  ;;  %2040 = vmatmul.mubr.bf16.gmra.mxu0 %v5200_v8  ;;  %v5698_v15 = vpop.f32.mrf.mxu1  ;;  %4819 = vmatmul.mubr.msk.bf16.gmra.mxu1 %vm1607_vm2, %v5201_v9  ;;  %v5222_v8 = vld [vmem:[%s5483_s9 + $0x2d0] ss:$12 sps:$4 sm:$0xff]   ;;  %v5226_v9 = vld [vmem:[%s5483_s9 + $0x2c0] ss:$12 sps:$4 sm:$0xff]  }
 0x11a   : > { %2047 = vmatprep.mubr.bf16.mxu0 %v5202_v10  ;;  %4822 = vmatprep.mubr.msk.bf16.mxu1 %vm1607_vm2, %v5204_v11  ;;  %v5229_v10 = vld [vmem:[%s5483_s9 + $0x2ec] ss:$12 sps:$4 sm:$0xff]  }
 0x11b   : > { %v1851_v16 = vpop.f32.mrf.mxu0  ;;  %v2235_v17 = vpop.f32.mrf.mxu1  ;;  %v5230_v11 = vld [vmem:[%s5483_s9 + $0x2d8] ss:$12 sps:$4 sm:$0xff]  }
 0x11d   : > { %v5702_v18 = vpop.f32.mrf.mxu0  ;;  %v5704_v19 = vpop.f32.mrf.mxu1 }
 0x11f   : > { %v1854_v24 = vpop.f32.mrf.mxu0  ;;  %v2238_v25 = vpop.f32.mrf.mxu1 }
 0x120   : > { %v5227_v24 = vld [vmem:[%s5483_s9 + $0x2e8] ss:$12 sps:$4 sm:$0xff]   ;;  %v5231_v25 = vld [vmem:[%s5483_s9 + $0x2f0] ss:$12 sps:$4 sm:$0xff]  }
 0x121   : > { %v5710_v26 = vpop.f32.mrf.mxu0  ;;  %2048 = vmatmul.mubr.bf16.gmra.mxu0 %v5205_v20  ;;  %v5712_v27 = vpop.f32.mrf.mxu1  ;;  %4823 = vmatmul.mubr.msk.bf16.gmra.mxu1 %vm1607_vm2, %v5206_v21 }
 0x122   : > { %2055 = vmatprep.mubr.bf16.mxu0 %v5207_v22  ;;  %4826 = vmatprep.mubr.msk.bf16.mxu1 %vm1607_vm2, %v5209_v23 }
 0x123   : > { %v1859_v28 = vpop.f32.mrf.mxu0  ;;  %v2243_v29 = vpop.f32.mrf.mxu1 }
 0x124   : > { %v5234_v28 = vld [vmem:[%s5483_s9 + $0x304] ss:$12 sps:$4 sm:$0xff]   ;;  %v5235_v29 = vld [vmem:[%s5483_s9 + $0x308] ss:$12 sps:$4 sm:$0xff]  }
 0x125   : > { %v5716_v30 = vpop.f32.mrf.mxu0  ;;  %v5718_v31 = vpop.f32.mrf.mxu1 }
 0x127   : > { %v1862_v36 = vpop.f32.mrf.mxu0  ;;  %v2246_v37 = vpop.f32.mrf.mxu1 }
 0x129   : > { %v5724_v38 = vpop.f32.mrf.mxu0  ;;  %2056 = vmatmul.mubr.bf16.gmra.mxu0 %v5210_v32  ;;  %v5726_v39 = vpop.f32.mrf.mxu1  ;;  %4827 = vmatmul.mubr.msk.bf16.gmra.mxu1 %vm1607_vm2, %v5211_v33 }
 0x12a   : > { %2063 = vmatprep.mubr.bf16.mxu0 %v5214_v34  ;;  %4830 = vmatprep.mubr.msk.bf16.mxu1 %vm1607_vm2, %v5215_v35 }
 0x12b   : > { %v1867_v40 = vpop.f32.mrf.mxu0  ;;  %v2251_v41 = vpop.f32.mrf.mxu1 }
 0x12d   : > { %v5730_v42 = vpop.f32.mrf.mxu0  ;;  %v5732_v43 = vpop.f32.mrf.mxu1 }
 0x12f   : > { %v1870_v48 = vpop.f32.mrf.mxu0  ;;  %v2254_v49 = vpop.f32.mrf.mxu1 }
 0x131   : > { %v5738_v50 = vpop.f32.mrf.mxu0  ;;  %2064 = vmatmul.mubr.bf16.gmra.mxu0 %v5212_v44  ;;  %v5740_v51 = vpop.f32.mrf.mxu1  ;;  %4831 = vmatmul.mubr.msk.bf16.gmra.mxu1 %vm1607_vm2, %v5216_v45  ;;  %v5232_v44 = vld [vmem:[%s5483_s9 + $0x300] ss:$12 sps:$4 sm:$0xff]  }
 0x132   : > { %2071 = vmatprep.mubr.bf16.mxu0 %v5219_v46  ;;  %4834 = vmatprep.mubr.msk.bf16.mxu1 %vm1607_vm2, %v5220_v47  ;;  %v5236_v45 = vld [vmem:[%s5483_s9 + $0x320] ss:$12 sps:$4 sm:$0xff]   ;;  %v5239_v46 = vld [vmem:[%s5483_s9 + $0x31c] ss:$12 sps:$4 sm:$0xff]   ;;  %v5240_v47 = vld [vmem:[%s5483_s9 + $0x338] ss:$12 sps:$4 sm:$0xff]  }
 0x133   : > { %v1875_v52 = vpop.f32.mrf.mxu0  ;;  %v2259_v53 = vpop.f32.mrf.mxu1 }
 0x135   : > { %v5744_v54 = vpop.f32.mrf.mxu0  ;;  %v5746_v55 = vpop.f32.mrf.mxu1 }
 0x137   : > { %v1878_v60 = vpop.f32.mrf.mxu0  ;;  %v2262_v61 = vpop.f32.mrf.mxu1 }
 0x138   : > { %v5237_v60 = vld [vmem:[%s5483_s9 + $0x318] ss:$12 sps:$4 sm:$0xff]   ;;  %v5241_v61 = vld [vmem:[%s5483_s9 + $0x350] ss:$12 sps:$4 sm:$0xff]  }
 0x139   : > { %v5752_v62 = vpop.f32.mrf.mxu0  ;;  %2072 = vmatmul.mubr.bf16.gmra.mxu0 %v5217_v56  ;;  %v5754_v63 = vpop.f32.mrf.mxu1  ;;  %4835 = vmatmul.mubr.msk.bf16.gmra.mxu1 %vm1607_vm2, %v5221_v57 }
 0x13a   : > { %2079 = vmatprep.mubr.bf16.mxu0 %v5224_v58  ;;  %4838 = vmatprep.mubr.msk.bf16.mxu1 %vm1607_vm2, %v5225_v59 }
 0x13b   : > { %v1883_v0 = vpop.f32.mrf.mxu0  ;;  %v2267_v1 = vpop.f32.mrf.mxu1 }
 0x13c   : > { %v5244_v0 = vld [vmem:[%s5483_s9 + $0x334] ss:$12 sps:$4 sm:$0xff]  }
 0x13d   : > { %v5758_v4 = vpop.f32.mrf.mxu0  ;;  %v5760_v5 = vpop.f32.mrf.mxu1  ;;  %v5245_v1 = vld [vmem:[%s5483_s9 + $0x368] ss:$12 sps:$4 sm:$0xff]  }
 0x13f   : > { %v1886_v12 = vpop.f32.mrf.mxu0  ;;  %v2270_v13 = vpop.f32.mrf.mxu1 }
 0x141   : > { %v5766_v16 = vpop.f32.mrf.mxu0  ;;  %2080 = vmatmul.mubr.bf16.gmra.mxu0 %v5222_v8  ;;  %v5768_v17 = vpop.f32.mrf.mxu1  ;;  %4839 = vmatmul.mubr.msk.bf16.gmra.mxu1 %vm1607_vm2, %v5226_v9 }
 0x142   : > { %2087 = vmatprep.mubr.bf16.mxu0 %v5229_v10  ;;  %4842 = vmatprep.mubr.msk.bf16.mxu1 %vm1607_vm2, %v5230_v11 }
 0x143   : > { %v1891_v20 = vpop.f32.mrf.mxu0  ;;  %v2275_v21 = vpop.f32.mrf.mxu1 }
 0x145   : > { %v5772_v22 = vpop.f32.mrf.mxu0  ;;  %v5774_v23 = vpop.f32.mrf.mxu1 }
 0x146   : > { %6732 = vst [vmem:[#allocation3_spill] sm:$0xff] %v5774_v23 }
 0x147   : > { %v1894_v32 = vpop.f32.mrf.mxu0  ;;  %v2278_v33 = vpop.f32.mrf.mxu1 }
 0x149   : > { %v5780_v34 = vpop.f32.mrf.mxu0  ;;  %2088 = vmatmul.mubr.bf16.gmra.mxu0 %v5227_v24  ;;  %v5782_v35 = vpop.f32.mrf.mxu1  ;;  %4843 = vmatmul.mubr.msk.bf16.gmra.mxu1 %vm1607_vm2, %v5231_v25  ;;  %v5242_v24 = vld [vmem:[%s5483_s9 + $0x330] ss:$12 sps:$4 sm:$0xff]   ;;  %v5246_v25 = vld [vmem:[%s5483_s9 + $0x380] ss:$12 sps:$4 sm:$0xff]  }
 0x14a   : > { %2095 = vmatprep.mubr.bf16.mxu0 %v5234_v28  ;;  %4846 = vmatprep.mubr.msk.bf16.mxu1 %vm1607_vm2, %v5235_v29  ;;  %v5249_v28 = vld [vmem:[%s5483_s9 + $0x34c] ss:$12 sps:$4 sm:$0xff]  }
 0x14b   : > { %v1899_v36 = vpop.f32.mrf.mxu0  ;;  %v2283_v37 = vpop.f32.mrf.mxu1  ;;  %v5250_v29 = vld [vmem:[%s5483_s9 + $0x398] ss:$12 sps:$4 sm:$0xff]  }
 0x14d   : > { %v5786_v40 = vpop.f32.mrf.mxu0  ;;  %v5788_v41 = vpop.f32.mrf.mxu1 }
 0x14e   : > { %6733 = vst [vmem:[#allocation4_spill] sm:$0xff] %v5788_v41 }
 0x14f   : > { %v1902_v48 = vpop.f32.mrf.mxu0  ;;  %v2286_v49 = vpop.f32.mrf.mxu1 }
 0x150   : > { %v5247_v48 = vld [vmem:[%s5483_s9 + $0x348] ss:$12 sps:$4 sm:$0xff]   ;;  %v5251_v49 = vld [vmem:[%s5483_s9 + $0x3b0] ss:$12 sps:$4 sm:$0xff]  }
 0x151   : > { %v5794_v52 = vpop.f32.mrf.mxu0  ;;  %2096 = vmatmul.mubr.bf16.gmra.mxu0 %v5232_v44  ;;  %v5796_v53 = vpop.f32.mrf.mxu1  ;;  %4847 = vmatmul.mubr.msk.bf16.gmra.mxu1 %vm1607_vm2, %v5236_v45 }
 0x152   : > { %6734 = vst [vmem:[#allocation5_spill] sm:$0xff] %v5796_v53  ;;  %2103 = vmatprep.mubr.bf16.mxu0 %v5239_v46  ;;  %4850 = vmatprep.mubr.msk.bf16.mxu1 %vm1607_vm2, %v5240_v47  ;;  %v5277_v53 = vld [vmem:[%s5483_s9 + $0x3d8] ss:$12 sps:$4 sm:$0xff]  }
 0x153   : > { %v1907_v56 = vpop.f32.mrf.mxu0  ;;  %v2291_v57 = vpop.f32.mrf.mxu1 }
 0x154   : > { %v5254_v56 = vld [vmem:[%s5483_s9 + $0x364] ss:$12 sps:$4 sm:$0xff]   ;;  %v5255_v57 = vld [vmem:[%s5483_s9 + $0x3c8] ss:$12 sps:$4 sm:$0xff]  }
 0x155   : > { %v5800_v58 = vpop.f32.mrf.mxu0  ;;  %v5802_v59 = vpop.f32.mrf.mxu1 }
 0x156   : > { %6735 = vst [vmem:[#allocation6_spill] sm:$0xff] %v5802_v59 }
 0x157   : > { %v1910_v8 = vpop.f32.mrf.mxu0  ;;  %v2294_v9 = vpop.f32.mrf.mxu1 }
 0x159   : > { %v5808_v10 = vpop.f32.mrf.mxu0  ;;  %2104 = vmatmul.mubr.bf16.gmra.mxu0 %v5237_v60  ;;  %v5810_v11 = vpop.f32.mrf.mxu1  ;;  %4851 = vmatmul.mubr.msk.bf16.gmra.mxu1 %vm1607_vm2, %v5241_v61 }
 0x15a   : > { %6736 = vst [vmem:[#allocation7_spill] sm:$0xff] %v5810_v11  ;;  %2111 = vmatprep.mubr.bf16.mxu0 %v5244_v0  ;;  %4854 = vmatprep.mubr.msk.bf16.mxu1 %vm1607_vm2, %v5245_v1  ;;  %v5284_v11 = vld [vmem:[%s5483_s9 + $0x3f4] ss:$12 sps:$4 sm:$0xff]  }
 0x15b   : > { %v1915_v12 = vpop.f32.mrf.mxu0  ;;  %v2299_v13 = vpop.f32.mrf.mxu1 }
 0x15d   : > { %v5814_v20 = vpop.f32.mrf.mxu0  ;;  %v5816_v21 = vpop.f32.mrf.mxu1 }
 0x15e   : > { %6737 = vst [vmem:[#allocation8_spill] sm:$0xff] %v5816_v21 }
 0x15f   : > { %v1918_v32 = vpop.f32.mrf.mxu0  ;;  %v2302_v33 = vpop.f32.mrf.mxu1 }
 0x161   : > { %v5822_v36 = vpop.f32.mrf.mxu0  ;;  %2112 = vmatmul.mubr.bf16.gmra.mxu0 %v5242_v24  ;;  %v5824_v37 = vpop.f32.mrf.mxu1  ;;  %4855 = vmatmul.mubr.msk.bf16.gmra.mxu1 %vm1607_vm2, %v5246_v25  ;;  %v5252_v24 = vld [vmem:[%s5483_s9 + $0x360] ss:$12 sps:$4 sm:$0xff]  }
 0x162   : > { %6738 = vst [vmem:[#allocation9_spill] sm:$0xff] %v5824_v37  ;;  %2119 = vmatprep.mubr.bf16.mxu0 %v5249_v28  ;;  %4858 = vmatprep.mubr.msk.bf16.mxu1 %vm1607_vm2, %v5250_v29  ;;  %v5256_v25 = vld [vmem:[%s5483_s9 + $0x3e0] ss:$12 sps:$4 sm:$0xff]   ;;  %v5259_v28 = vld [vmem:[%s5483_s9 + $0x37c] ss:$12 sps:$4 sm:$0xff]  }
 0x163   : > { %v1923_v44 = vpop.f32.mrf.mxu0  ;;  %v2307_v45 = vpop.f32.mrf.mxu1  ;;  %v5260_v29 = vld [vmem:[%s5483_s9 + $0x3f8] ss:$12 sps:$4 sm:$0xff]  }
 0x164   : > { %v5280_v37 = vld [vmem:[%s5483_s9 + $0x4b8] ss:$12 sps:$4 sm:$0xff]  }
 0x165   : > { %v5828_v46 = vpop.f32.mrf.mxu0  ;;  %v5830_v47 = vpop.f32.mrf.mxu1 }
 0x166   : > { %6739 = vst [vmem:[#allocation10_spill] sm:$0xff] %v5830_v47  ;;  %v5267_v47 = vld [vmem:[%s5483_s9 + $0x3a8] ss:$12 sps:$4 sm:$0xff]  }
 0x167   : > { %v1926_v60 = vpop.f32.mrf.mxu0  ;;  %v2310_v61 = vpop.f32.mrf.mxu1 }
 0x168   : > { %v5257_v60 = vld [vmem:[%s5483_s9 + $0x378] ss:$12 sps:$4 sm:$0xff]   ;;  %v5261_v61 = vld [vmem:[%s5483_s9 + $0x410] ss:$12 sps:$4 sm:$0xff]  }
 0x169   : > { %v5836_v0 = vpop.f32.mrf.mxu0  ;;  %2120 = vmatmul.mubr.bf16.gmra.mxu0 %v5247_v48  ;;  %v5838_v1 = vpop.f32.mrf.mxu1  ;;  %4859 = vmatmul.mubr.msk.bf16.gmra.mxu1 %vm1607_vm2, %v5251_v49 }
 0x16a   : > { %6740 = vst [vmem:[#allocation11_spill] sm:$0xff] %v5838_v1  ;;  %2127 = vmatprep.mubr.bf16.mxu0 %v5254_v56  ;;  %4862 = vmatprep.mubr.msk.bf16.mxu1 %vm1607_vm2, %v5255_v57  ;;  %v5272_v1 = vld [vmem:[%s5483_s9 + $0x3c0] ss:$12 sps:$4 sm:$0xff]  }
 0x16b   : > { %v1931_v8 = vpop.f32.mrf.mxu0  ;;  %v2315_v9 = vpop.f32.mrf.mxu1 }
 0x16c   : > { %v5264_v8 = vld [vmem:[%s5483_s9 + $0x394] ss:$12 sps:$4 sm:$0xff]  }
 0x16d   : > { %v5842_v12 = vpop.f32.mrf.mxu0  ;;  %v5844_v13 = vpop.f32.mrf.mxu1  ;;  %v5265_v9 = vld [vmem:[%s5483_s9 + $0x428] ss:$12 sps:$4 sm:$0xff]  }
 0x16e   : > { %6741 = vst [vmem:[#allocation12_spill] sm:$0xff] %v5844_v13 }
 0x16f   : > { %v1934_v32 = vpop.f32.mrf.mxu0  ;;  %v2318_v33 = vpop.f32.mrf.mxu1 }
 0x171   : > { %v5850_v44 = vpop.f32.mrf.mxu0  ;;  %2128 = vmatmul.mubr.bf16.gmra.mxu0 %v5252_v24  ;;  %v5852_v45 = vpop.f32.mrf.mxu1  ;;  %4863 = vmatmul.mubr.msk.bf16.gmra.mxu1 %vm1607_vm2, %v5256_v25 }
 0x172   : > { %6742 = vst [vmem:[#allocation13_spill] sm:$0xff] %v5852_v45  ;;  %2135 = vmatprep.mubr.bf16.mxu0 %v5259_v28  ;;  %4866 = vmatprep.mubr.msk.bf16.mxu1 %vm1607_vm2, %v5260_v29 }
 0x173   : > { %v1939_v48 = vpop.f32.mrf.mxu0  ;;  %v2323_v49 = vpop.f32.mrf.mxu1 }
 0x175   : > { %v5856_v56 = vpop.f32.mrf.mxu0  ;;  %v5858_v57 = vpop.f32.mrf.mxu1 }
 0x176   : > { %6743 = vst [vmem:[#allocation14_spill] sm:$0xff] %v5858_v57  ;;  %v5262_v57 = vld [vmem:[%s5483_s9 + $0x390] ss:$12 sps:$4 sm:$0xff]  }
 0x177   : > { %v1942_v24 = vpop.f32.mrf.mxu0  ;;  %v2326_v32 = vpop.f32.mrf.mxu1 }
 0x178   : > { %v5266_v24 = vld [vmem:[%s5483_s9 + $0x440] ss:$12 sps:$4 sm:$0xff]  }
 0x179   : > { %v5864_v25 = vpop.f32.mrf.mxu0  ;;  %2136 = vmatmul.mubr.bf16.gmra.mxu0 %v5257_v60  ;;  %v5866_v28 = vpop.f32.mrf.mxu1  ;;  %4867 = vmatmul.mubr.msk.bf16.gmra.mxu1 %vm1607_vm2, %v5261_v61  ;;  %v5269_v32 = vld [vmem:[%s5483_s9 + $0x3ac] ss:$12 sps:$4 sm:$0xff]  }
 0x17a   : > { %6744 = vst [vmem:[#allocation15_spill] sm:$0xff] %v5866_v28  ;;  %2143 = vmatprep.mubr.bf16.mxu0 %v5264_v8  ;;  %4870 = vmatprep.mubr.msk.bf16.mxu1 %vm1607_vm2, %v5265_v9  ;;  %v5270_v60 = vld [vmem:[%s5483_s9 + $0x458] ss:$12 sps:$4 sm:$0xff]  }
 0x17b   : > { %v1947_v29 = vpop.f32.mrf.mxu0  ;;  %v2331_v33 = vpop.f32.mrf.mxu1 }
 0x17d   : > { %v5870_v48 = vpop.f32.mrf.mxu0  ;;  %v5872_v49 = vpop.f32.mrf.mxu1 }
 0x17e   : > { %6745 = vst [vmem:[#allocation16_spill] sm:$0xff] %v5872_v49 }
 0x17f   : > { %v1950_v45 = vpop.f32.mrf.mxu0  ;;  %v2334_v28 = vpop.f32.mrf.mxu1 }
 0x180   : > { %v5271_v45 = vld [vmem:[%s5483_s9 + $0x470] ss:$12 sps:$4 sm:$0xff]  }
 0x181   : > { %v5878_v61 = vpop.f32.mrf.mxu0  ;;  %2144 = vmatmul.mubr.bf16.gmra.mxu0 %v5262_v57  ;;  %v5880_v8 = vpop.f32.mrf.mxu1  ;;  %4871 = vmatmul.mubr.msk.bf16.gmra.mxu1 %vm1607_vm2, %v5266_v24  ;;  %v5274_v28 = vld [vmem:[%s5483_s9 + $0x3c4] ss:$12 sps:$4 sm:$0xff]   ;;  %v5275_v57 = vld [vmem:[%s5483_s9 + $0x488] ss:$12 sps:$4 sm:$0xff]  }
 0x182   : > { %6746 = vst [vmem:[#allocation17_spill] sm:$0xff] %v5880_v8  ;;  %2151 = vmatprep.mubr.bf16.mxu0 %v5269_v32  ;;  %4874 = vmatprep.mubr.msk.bf16.mxu1 %vm1607_vm2, %v5270_v60 }
 0x183   : > { %v1955_v9 = vpop.f32.mrf.mxu0  ;;  %v2339_v29 = vpop.f32.mrf.mxu1 }
 0x185   : > { %v5884_v33 = vpop.f32.mrf.mxu0  ;;  %v5886_v49 = vpop.f32.mrf.mxu1 }
 0x186   : > { %6747 = vst [vmem:[#allocation18_spill] sm:$0xff] %v5886_v49 }
 0x187   : > { %v1958_v8 = vpop.f32.mrf.mxu0  ;;  %v2342_v13 = vpop.f32.mrf.mxu1 }
 0x188   : > { %v5276_v8 = vld [vmem:[%s5483_s9 + $0x4a0] ss:$12 sps:$4 sm:$0xff]   ;;  %v5279_v13 = vld [vmem:[%s5483_s9 + $0x3dc] ss:$12 sps:$4 sm:$0xff]  }
 0x189   : > { %v5892_v24 = vpop.f32.mrf.mxu0  ;;  %2152 = vmatmul.mubr.bf16.gmra.mxu0 %v5267_v47  ;;  %v5894_v32 = vpop.f32.mrf.mxu1  ;;  %4875 = vmatmul.mubr.msk.bf16.gmra.mxu1 %vm1607_vm2, %v5271_v45  ;;  %v5909_v47 = vld [vmem:[%s6729_s2] ss:$0 sm:$0xff] }
 0x18a   : > { %6748 = vst [vmem:[#allocation19_spill] sm:$0xff] %v5894_v32  ;;  %2159 = vmatprep.mubr.bf16.mxu0 %v5274_v28  ;;  %4878 = vmatprep.mubr.msk.bf16.mxu1 %vm1607_vm2, %v5275_v57  ;;  %v1850_v28 = vadd.f32 %v5909_v47, %v5696_v14 }
 0x18b   : > { %v1963_v60 = vpop.f32.mrf.mxu0  ;;  %v2347_v9 = vpop.f32.mrf.mxu1 }
 0x18c   : > { %v1842_v9 = vadd.f32 %v5909_v47, %v5682_v2  ;;  %v5281_v2 = vld [vmem:[%s5483_s9 + $0x4d0] ss:$12 sps:$4 sm:$0xff]  }
 0x18d   : > { %v5898_v29 = vpop.f32.mrf.mxu0  ;;  %v5900_v49 = vpop.f32.mrf.mxu1 }
 0x18e   : > { %6749 = vst [vmem:[#allocation20_spill] sm:$0xff] %v5900_v49 }
 0x18f   : > { %v1966_v32 = vpop.f32.mrf.mxu0  ;;  %v2350_v45 = vpop.f32.mrf.mxu1 }
 0x191   : > { %v5914_v57 = vpop.f32.mrf.mxu0  ;;  %2160 = vmatmul.mubr.bf16.gmra.mxu0 %v5272_v1  ;;  %v4784_v60 = vpop.f32.mrf.mxu1  ;;  %4879 = vmatmul.mubr.msk.bf16.gmra.mxu1 %vm1607_vm2, %v5276_v8  ;;  %v1853_v1 = vadd.f32 %v5909_v47, %v5702_v18  ;;  %v1866_v18 = vadd.f32 %v5909_v47, %v5724_v38 }
 0x192   : > { %v2395_v49 = vadd.f32 %v4784_v60, %v1850_v28  ;;  %2167 = vmatprep.mubr.bf16.mxu0 %v5279_v13  ;;  %4882 = vmatprep.mubr.msk.bf16.mxu1 %vm1607_vm2, %v5280_v37  ;;  %v1845_v13 = vadd.f32 %v5909_v47, %v5688_v6 }
 0x193   : > { %v1971_v32 = vpop.f32.mrf.mxu0  ;;  %v2386_v14 = vpop.f32.mrf.mxu1 }
 0x194   : > { %v2899_v45 = vmax.f32 %v2395_v49, 0.0  ;;  %v2387_v59 = vadd.f32 %v2386_v14, %v1842_v9  ;;  %v5285_v32 = vld [vmem:[%s5483_s9 + $0x4e8] ss:$12 sps:$4 sm:$0xff]  }
 0x195   : > { %v5922_v21 = vpop.f32.mrf.mxu0  ;;  %v4785_v8 = vpop.f32.mrf.mxu1 }
 0x196   : > { %v4568_v28 = vpack.c.bf16 %v2899_v45, %v2899_v45  ;;  %v2897_v60 = vmax.f32 %v2387_v59, 0.0  ;;  %v2398_v37 = vadd.f32 %v4785_v8, %v1853_v1  ;;  %v1869_v8 = vadd.f32 %v5909_v47, %v5730_v42 }
 0x197   : > { %v1974_v41 = vpop.f32.mrf.mxu0  ;;  %v2389_v23 = vpop.f32.mrf.mxu1 }
 0x198   : > { %3540 = vst.msk [vmem:[%s5932_s12 + $0x8] sm:$0xf] %vm3537_vm3, %v4568_v28  ;;  %v4566_v49 = vpack.c.bf16 %v2897_v60, %v2897_v60  ;;  %v2900_v9 = vmax.f32 %v2398_v37, 0.0  ;;  %v2390_v6 = vadd.f32 %v2389_v23, %v1845_v13  ;;  %v1858_v41 = vadd.f32 %v5909_v47, %v5710_v26  ;;  %v5282_v37 = vld [vmem:[%s5483_s9 + $0x3f0] ss:$12 sps:$4 sm:$0xff]  }
 0x199   : > { %v5936_v14 = vpop.f32.mrf.mxu0  ;;  %2168 = vmatmul.mubr.bf16.gmra.mxu0 %v5277_v53  ;;  %v4788_v59 = vpop.f32.mrf.mxu1  ;;  %4883 = vmatmul.mubr.msk.bf16.gmra.mxu1 %vm1607_vm2, %v5281_v2 }
 0x19a   : > { %3538 = vst.msk [vmem:[%s5932_s12] sm:$0xf] %vm3537_vm3, %v4566_v49  ;;  %v4569_v38 = vpack.c.bf16 %v2900_v9, %v2900_v9  ;;  %v2898_v1 = vmax.f32 %v2390_v6, 0.0  ;;  %v2411_v45 = vadd.f32 %v4788_v59, %v1866_v18  ;;  %2175 = vmatprep.mubr.bf16.mxu0 %v5284_v11  ;;  %4886 = vmatprep.mubr.msk.bf16.mxu1 %vm1607_vm2, %v5285_v32  ;;  %v5286_v11 = vld [vmem:[%s5483_s9 + $0x500] ss:$12 sps:$4 sm:$0xff]  }
 0x19b   : > { %v1979_v23 = vpop.f32.mrf.mxu0  ;;  %v2402_v53 = vpop.f32.mrf.mxu1  ;;  %v1861_v32 = vadd.f32 %v5909_v47, %v5716_v30  ;;  %v5289_v9 = vld [vmem:[%s5483_s9 + $0x40c] ss:$12 sps:$4 sm:$0xff]  }
 0x19c   : > { %3541 = vst.msk [vmem:[%s5932_s12 + $0xc] sm:$0xf] %vm3537_vm3, %v4569_v38  ;;  %v4567_v26 = vpack.c.bf16 %v2898_v1, %v2898_v1  ;;  %v2903_v2 = vmax.f32 %v2411_v45, 0.0  ;;  %v2403_v13 = vadd.f32 %v2402_v53, %v1858_v41  ;;  %v5290_v6 = vld [vmem:[%s5483_s9 + $0x518] ss:$12 sps:$4 sm:$0xff]   ;;  %v1882_v41 = vadd.f32 %v5909_v47, %v5752_v62 }
 0x19d   : > { %v5948_v28 = vpop.f32.mrf.mxu0  ;;  %v4789_v60 = vpop.f32.mrf.mxu1 }
 0x19e   : > { %3539 = vst.msk [vmem:[%s5932_s12 + $0x4] sm:$0xf] %vm3537_vm3, %v4567_v26  ;;  %v4572_v18 = vpack.c.bf16 %v2903_v2, %v2903_v2  ;;  %v2901_v49 = vmax.f32 %v2403_v13, 0.0  ;;  %v2414_v42 = vadd.f32 %v4789_v60, %v1869_v8  ;;  %v1874_v8 = vadd.f32 %v5909_v47, %v5738_v50 }
 0x19f   : > { %v1982_v59 = vpop.f32.mrf.mxu0  ;;  %v2405_v38 = vpop.f32.mrf.mxu1 }
 0x1a0   : > { %3544 = vst.msk [vmem:[%s5932_s12 + $0x18] sm:$0xf] %vm3537_vm3, %v4572_v18  ;;  %v4570_v1 = vpack.c.bf16 %v2901_v49, %v2901_v49  ;;  %v2904_v45 = vmax.f32 %v2414_v42, 0.0  ;;  %v2406_v23 = vadd.f32 %v2405_v38, %v1861_v32  ;;  %v5287_v42 = vld [vmem:[%s5483_s9 + $0x408] ss:$12 sps:$4 sm:$0xff]  }
 0x1a1   : > { %v5962_v30 = vpop.f32.mrf.mxu0  ;;  %2176 = vmatmul.mubr.bf16.gmra.mxu0 %v5282_v37  ;;  %v4792_v53 = vpop.f32.mrf.mxu1  ;;  %4887 = vmatmul.mubr.msk.bf16.gmra.mxu1 %vm1607_vm2, %v5286_v11  ;;  %v1885_v37 = vadd.f32 %v5909_v47, %v5758_v4 }
 0x1a2   : > { %3542 = vst.msk [vmem:[%s5932_s12 + $0x10] sm:$0xf] %vm3537_vm3, %v4570_v1  ;;  %v4573_v62 = vpack.c.bf16 %v2904_v45, %v2904_v45  ;;  %v2902_v26 = vmax.f32 %v2406_v23, 0.0  ;;  %v2427_v2 = vadd.f32 %v4792_v53, %v1882_v41  ;;  %2183 = vmatprep.mubr.bf16.mxu0 %v5289_v9  ;;  %4890 = vmatprep.mubr.msk.bf16.mxu1 %vm1607_vm2, %v5290_v6  ;;  %v5291_v9 = vld [vmem:[%s5483_s9 + $0x530] ss:$12 sps:$4 sm:$0xff]  }
 0x1a3   : > { %v1987_v13 = vpop.f32.mrf.mxu0  ;;  %v2418_v60 = vpop.f32.mrf.mxu1  ;;  %v1877_v6 = vadd.f32 %v5909_v47, %v5744_v54  ;;  %v5294_v41 = vld [vmem:[%s5483_s9 + $0x424] ss:$12 sps:$4 sm:$0xff]   ;;  %v5295_v1 = vld [vmem:[%s5483_s9 + $0x548] ss:$12 sps:$4 sm:$0xff]   ;;  %v1898_v53 = vadd.f32 %v5909_v47, %v5780_v34 }
 0x1a4   : > { %3545 = vst.msk [vmem:[%s5932_s12 + $0x1c] sm:$0xf] %vm3537_vm3, %v4573_v62  ;;  %v4571_v50 = vpack.c.bf16 %v2902_v26, %v2902_v26  ;;  %v2907_v11 = vmax.f32 %v2427_v2, 0.0  ;;  %v2419_v32 = vadd.f32 %v2418_v60, %v1874_v8  ;;  %v1890_v13 = vadd.f32 %v5909_v47, %v5766_v16 }
 0x1a5   : > { %v5974_v18 = vpop.f32.mrf.mxu0  ;;  %v4793_v49 = vpop.f32.mrf.mxu1 }
 0x1a6   : > { %3543 = vst.msk [vmem:[%s5932_s12 + $0x14] sm:$0xf] %vm3537_vm3, %v4571_v50  ;;  %v4576_v59 = vpack.c.bf16 %v2907_v11, %v2907_v11  ;;  %v2905_v38 = vmax.f32 %v2419_v32, 0.0  ;;  %v2430_v4 = vadd.f32 %v4793_v49, %v1885_v37  ;;  %v1901_v32 = vadd.f32 %v5909_v47, %v5786_v40 }
 0x1a7   : > { %v1990_v45 = vpop.f32.mrf.mxu0  ;;  %v2421_v23 = vpop.f32.mrf.mxu1 }
 0x1a8   : > { %3548 = vst.msk [vmem:[%s5932_s12 + $0x28] sm:$0xf] %vm3537_vm3, %v4576_v59  ;;  %v4574_v8 = vpack.c.bf16 %v2905_v38, %v2905_v38  ;;  %v2908_v62 = vmax.f32 %v2430_v4, 0.0  ;;  %v2422_v26 = vadd.f32 %v2421_v23, %v1877_v6  ;;  %v5292_v59 = vld [vmem:[%s5483_s9 + $0x420] ss:$12 sps:$4 sm:$0xff]   ;;  %v1893_v4 = vadd.f32 %v5909_v47, %v5772_v22 }
 0x1a9   : > { %v5988_v54 = vpop.f32.mrf.mxu0  ;;  %2184 = vmatmul.mubr.bf16.gmra.mxu0 %v5287_v42  ;;  %v4796_v2 = vpop.f32.mrf.mxu1  ;;  %4891 = vmatmul.mubr.msk.bf16.gmra.mxu1 %vm1607_vm2, %v5291_v9  ;;  %v5296_v38 = vld [vmem:[%s5483_s9 + $0x560] ss:$12 sps:$4 sm:$0xff]   ;;  %v5299_v45 = vld [vmem:[%s5483_s9 + $0x43c] ss:$12 sps:$4 sm:$0xff]   ;;  %v5300_v23 = vld [vmem:[%s5483_s9 + $0x578] ss:$12 sps:$4 sm:$0xff]  }
 0x1aa   : > { %3546 = vst.msk [vmem:[%s5932_s12 + $0x20] sm:$0xf] %vm3537_vm3, %v4574_v8  ;;  %v4577_v34 = vpack.c.bf16 %v2908_v62, %v2908_v62  ;;  %v2906_v60 = vmax.f32 %v2422_v26, 0.0  ;;  %v2443_v37 = vadd.f32 %v4796_v2, %v1898_v53  ;;  %2191 = vmatprep.mubr.bf16.mxu0 %v5294_v41  ;;  %4894 = vmatprep.mubr.msk.bf16.mxu1 %vm1607_vm2, %v5295_v1 }
 0x1ab   : > { %v1995_v50 = vpop.f32.mrf.mxu0  ;;  %v2434_v11 = vpop.f32.mrf.mxu1  ;;  %v1914_v62 = vadd.f32 %v5909_v47, %v5808_v10 }
 0x1ac   : > { %3549 = vst.msk [vmem:[%s5932_s12 + $0x2c] sm:$0xf] %vm3537_vm3, %v4577_v34  ;;  %v4575_v16 = vpack.c.bf16 %v2906_v60, %v2906_v60  ;;  %v2911_v49 = vmax.f32 %v2443_v37, 0.0  ;;  %v2435_v42 = vadd.f32 %v2434_v11, %v1890_v13  ;;  %v1906_v60 = vadd.f32 %v5909_v47, %v5794_v52 }
 0x1ad   : > { %v6000_v9 = vpop.f32.mrf.mxu0  ;;  %v4797_v6 = vpop.f32.mrf.mxu1 }
 0x1ae   : > { %3547 = vst.msk [vmem:[%s5932_s12 + $0x24] sm:$0xf] %vm3537_vm3, %v4575_v16  ;;  %v4580_v41 = vpack.c.bf16 %v2911_v49, %v2911_v49  ;;  %v2909_v1 = vmax.f32 %v2435_v42, 0.0  ;;  %v2446_v40 = vadd.f32 %v4797_v6, %v1901_v32  ;;  %v1917_v16 = vadd.f32 %v5909_v47, %v5814_v20 }
 0x1af   : > { %v1998_v53 = vpop.f32.mrf.mxu0  ;;  %v2437_v8 = vpop.f32.mrf.mxu1 }
 0x1b0   : > { %3552 = vst.msk [vmem:[%s5932_s12 + $0x38] sm:$0xf] %vm3537_vm3, %v4580_v41  ;;  %v4578_v26 = vpack.c.bf16 %v2909_v1, %v2909_v1  ;;  %v2912_v2 = vmax.f32 %v2446_v40, 0.0  ;;  %v2438_v13 = vadd.f32 %v2437_v8, %v1893_v4  ;;  %v5301_v4 = vld [vmem:[%s5483_s9 + $0x590] ss:$12 sps:$4 sm:$0xff]   ;;  %v1909_v41 = vadd.f32 %v5909_v47, %v5800_v58 }
 0x1b1   : > { %v6014_v22 = vpop.f32.mrf.mxu0  ;;  %2192 = vmatmul.mubr.bf16.gmra.mxu0 %v5292_v59  ;;  %v4800_v34 = vpop.f32.mrf.mxu1  ;;  %4895 = vmatmul.mubr.msk.bf16.gmra.mxu1 %vm1607_vm2, %v5296_v38  ;;  %v5297_v38 = vld [vmem:[%s5483_s9 + $0x438] ss:$12 sps:$4 sm:$0xff]  }
 0x1b2   : > { %3550 = vst.msk [vmem:[%s5932_s12 + $0x30] sm:$0xf] %vm3537_vm3, %v4578_v26  ;;  %v4581_v10 = vpack.c.bf16 %v2912_v2, %v2912_v2  ;;  %v2910_v37 = vmax.f32 %v2438_v13, 0.0  ;;  %v2459_v50 = vadd.f32 %v4800_v34, %v1914_v62  ;;  %2199 = vmatprep.mubr.bf16.mxu0 %v5299_v45  ;;  %4898 = vmatprep.mubr.msk.bf16.mxu1 %vm1607_vm2, %v5300_v23  ;;  %v5304_v45 = vld [vmem:[%s5483_s9 + $0x454] ss:$12 sps:$4 sm:$0xff]  }
 0x1b3   : > { %v2003_v11 = vpop.f32.mrf.mxu0  ;;  %v2450_v32 = vpop.f32.mrf.mxu1  ;;  %v5305_v23 = vld [vmem:[%s5483_s9 + $0x5a8] ss:$12 sps:$4 sm:$0xff]   ;;  %v1930_v62 = vadd.f32 %v5909_v47, %v5836_v0 }
 0x1b4   : > { %3553 = vst.msk [vmem:[%s5932_s12 + $0x3c] sm:$0xf] %vm3537_vm3, %v4581_v10  ;;  %v4579_v52 = vpack.c.bf16 %v2910_v37, %v2910_v37  ;;  %v2915_v49 = vmax.f32 %v2459_v50, 0.0  ;;  %v2451_v42 = vadd.f32 %v2450_v32, %v1906_v60  ;;  %v1922_v60 = vadd.f32 %v5909_v47, %v5822_v36 }
 0x1b5   : > { %v6026_v6 = vpop.f32.mrf.mxu0  ;;  %v4801_v59 = vpop.f32.mrf.mxu1  ;;  %v1933_v32 = vadd.f32 %v5909_v47, %v5842_v12 }
 0x1b6   : > { %3551 = vst.msk [vmem:[%s5932_s12 + $0x34] sm:$0xf] %vm3537_vm3, %v4579_v52  ;;  %v4584_v1 = vpack.c.bf16 %v2915_v49, %v2915_v49  ;;  %v2913_v40 = vmax.f32 %v2451_v42, 0.0  ;;  %v2462_v20 = vadd.f32 %v4801_v59, %v1917_v16  ;;  %v5302_v59 = vld [vmem:[%s5483_s9 + $0x450] ss:$12 sps:$4 sm:$0xff]  }
 0x1b7   : > { %v2006_v53 = vpop.f32.mrf.mxu0  ;;  %v2453_v8 = vpop.f32.mrf.mxu1 }
 0x1b8   : > { %3556 = vst.msk [vmem:[%s5932_s12 + $0x48] sm:$0xf] %vm3537_vm3, %v4584_v1  ;;  %v4582_v26 = vpack.c.bf16 %v2913_v40, %v2913_v40  ;;  %v2916_v2 = vmax.f32 %v2462_v20, 0.0  ;;  %v2454_v13 = vadd.f32 %v2453_v8, %v1909_v41  ;;  %v5309_v40 = vld [vmem:[%s5483_s9 + $0x46c] ss:$12 sps:$4 sm:$0xff]   ;;  %v1946_v53 = vadd.f32 %v5909_v47, %v5864_v25 }
 0x1b9   : > { %v6040_v58 = vpop.f32.mrf.mxu0  ;;  %2200 = vmatmul.mubr.bf16.gmra.mxu0 %v5297_v38  ;;  %v4804_v34 = vpop.f32.mrf.mxu1  ;;  %4899 = vmatmul.mubr.msk.bf16.gmra.mxu1 %vm1607_vm2, %v5301_v4  ;;  %v5306_v38 = vld [vmem:[%s5483_s9 + $0x5c0] ss:$12 sps:$4 sm:$0xff]   ;;  %v1925_v4 = vadd.f32 %v5909_v47, %v5828_v46  ;;  %v5310_v20 = vld [vmem:[%s5483_s9 + $0x5d8] ss:$12 sps:$4 sm:$0xff]  }
 0x1ba   : > { %3554 = vst.msk [vmem:[%s5932_s12 + $0x40] sm:$0xf] %vm3537_vm3, %v4582_v26  ;;  %v4585_v0 = vpack.c.bf16 %v2916_v2, %v2916_v2  ;;  %v2914_v10 = vmax.f32 %v2454_v13, 0.0  ;;  %v2475_v37 = vadd.f32 %v4804_v34, %v1930_v62  ;;  %2207 = vmatprep.mubr.bf16.mxu0 %v5304_v45  ;;  %4902 = vmatprep.mubr.msk.bf16.mxu1 %vm1607_vm2, %v5305_v23 }
 0x1bb   : > { %v2011_v50 = vpop.f32.mrf.mxu0  ;;  %v2466_v11 = vpop.f32.mrf.mxu1  ;;  %v1938_v13 = vadd.f32 %v5909_v47, %v5850_v44 }
 0x1bc   : > { %3557 = vst.msk [vmem:[%s5932_s12 + $0x4c] sm:$0xf] %vm3537_vm3, %v4585_v0  ;;  %v4583_v36 = vpack.c.bf16 %v2914_v10, %v2914_v10  ;;  %v2919_v16 = vmax.f32 %v2475_v37, 0.0  ;;  %v2467_v52 = vadd.f32 %v2466_v11, %v1922_v60  ;;  %v1949_v37 = vadd.f32 %v5909_v47, %v5870_v48 }
 0x1bd   : > { %v6052_v49 = vpop.f32.mrf.mxu0  ;;  %v4805_v42 = vpop.f32.mrf.mxu1 }
 0x1be   : > { %3555 = vst.msk [vmem:[%s5932_s12 + $0x44] sm:$0xf] %vm3537_vm3, %v4583_v36  ;;  %v4588_v41 = vpack.c.bf16 %v2919_v16, %v2919_v16  ;;  %v2917_v1 = vmax.f32 %v2467_v52, 0.0  ;;  %v2478_v12 = vadd.f32 %v4805_v42, %v1933_v32  ;;  %v5307_v16 = vld [vmem:[%s5483_s9 + $0x468] ss:$12 sps:$4 sm:$0xff]   ;;  %v1941_v42 = vadd.f32 %v5909_v47, %v5856_v56 }
 0x1bf   : > { %v2014_v45 = vpop.f32.mrf.mxu0  ;;  %v2469_v23 = vpop.f32.mrf.mxu1  ;;  %v5311_v52 = vld [vmem:[%s5483_s9 + $0x5f0] ss:$12 sps:$4 sm:$0xff]  }
 0x1c0   : > { %3560 = vst.msk [vmem:[%s5932_s12 + $0x58] sm:$0xf] %vm3537_vm3, %v4588_v41  ;;  %v4586_v8 = vpack.c.bf16 %v2917_v1, %v2917_v1  ;;  %v2920_v62 = vmax.f32 %v2478_v12, 0.0  ;;  %v2470_v26 = vadd.f32 %v2469_v23, %v1925_v4  ;;  %v1962_v1 = vadd.f32 %v5909_v47, %v5892_v24 }
 0x1c1   : > { %v6066_v46 = vpop.f32.mrf.mxu0  ;;  %2208 = vmatmul.mubr.bf16.gmra.mxu0 %v5302_v59  ;;  %v4808_v2 = vpop.f32.mrf.mxu1  ;;  %4903 = vmatmul.mubr.msk.bf16.gmra.mxu1 %vm1607_vm2, %v5306_v38  ;;  %v1954_v23 = vadd.f32 %v5909_v47, %v5878_v61  ;;  %v1957_v61 = vadd.f32 %v5909_v47, %v5884_v33  ;;  %v1970_v33 = vadd.f32 %v5909_v47, %v5914_v57 }
 0x1c2   : > { %3558 = vst.msk [vmem:[%s5932_s12 + $0x50] sm:$0xf] %vm3537_vm3, %v4586_v8  ;;  %v4589_v25 = vpack.c.bf16 %v2920_v62, %v2920_v62  ;;  %v2918_v34 = vmax.f32 %v2470_v26, 0.0  ;;  %v2491_v60 = vadd.f32 %v4808_v2, %v1946_v53  ;;  %2215 = vmatprep.mubr.bf16.mxu0 %v5309_v40  ;;  %4906 = vmatprep.mubr.msk.bf16.mxu1 %vm1607_vm2, %v5310_v20 }
 0x1c3   : > { %v2019_v0 = vpop.f32.mrf.mxu0  ;;  %v2482_v10 = vpop.f32.mrf.mxu1  ;;  %v1965_v2 = vadd.f32 %v5909_v47, %v5898_v29  ;;  %v1978_v29 = vadd.f32 %v5909_v47, %v5936_v14  ;;  %v1981_v14 = vadd.f32 %v5909_v47, %v5948_v28  ;;  %v1973_v57 = vadd.f32 %v5909_v47, %v5922_v21 }
 0x1c4   : > { %3561 = vst.msk [vmem:[%s5932_s12 + $0x5c] sm:$0xf] %vm3537_vm3, %v4589_v25  ;;  %v4587_v44 = vpack.c.bf16 %v2918_v34, %v2918_v34  ;;  %v2923_v50 = vmax.f32 %v2491_v60, 0.0  ;;  %v2483_v11 = vadd.f32 %v2482_v10, %v1938_v13  ;;  %v1994_v28 = vadd.f32 %v5909_v47, %v5988_v54 }
 0x1c5   : > { %v6078_v32 = vpop.f32.mrf.mxu0  ;;  %v4809_v36 = vpop.f32.mrf.mxu1  ;;  %v1986_v21 = vadd.f32 %v5909_v47, %v5962_v30  ;;  %v1997_v54 = vadd.f32 %v5909_v47, %v6000_v9  ;;  %v1989_v30 = vadd.f32 %v5909_v47, %v5974_v18  ;;  %v2010_v9 = vadd.f32 %v5909_v47, %v6040_v58 }
 0x1c6   : > { %3559 = vst.msk [vmem:[%s5932_s12 + $0x54] sm:$0xf] %vm3537_vm3, %v4587_v44  ;;  %v4592_v59 = vpack.c.bf16 %v2923_v50, %v2923_v50  ;;  %v2921_v38 = vmax.f32 %v2483_v11, 0.0  ;;  %v2494_v48 = vadd.f32 %v4809_v36, %v1949_v37  ;;  %v2002_v18 = vadd.f32 %v5909_v47, %v6014_v22 }
 0x1c7   : > { %v2022_v4 = vpop.f32.mrf.mxu0  ;;  %v2485_v41 = vpop.f32.mrf.mxu1  ;;  %v2013_v58 = vadd.f32 %v5909_v47, %v6052_v49  ;;  %v2005_v22 = vadd.f32 %v5909_v47, %v6026_v6  ;;  %v2018_v6 = vadd.f32 %v5909_v47, %v6066_v46  ;;  %v2021_v46 = vadd.f32 %v5909_v47, %v6078_v32 }
 0x1c8   : > { %3564 = vst.msk [vmem:[%s5932_s12 + $0x68] sm:$0xf] %vm3537_vm3, %v4592_v59  ;;  %v4590_v12 = vpack.c.bf16 %v2921_v38, %v2921_v38  ;;  %v2924_v40 = vmax.f32 %v2494_v48, 0.0  ;;  %v2486_v20 = vadd.f32 %v2485_v41, %v1941_v42 }
 0x1c9   : > { %v6090_v45 = vpop.f32.mrf.mxu0  ;;  %2216 = vmatmul.mubr.bf16.gmra.mxu0 %v5307_v16  ;;  %v4812_v56 = vpop.f32.mrf.mxu1  ;;  %4907 = vmatmul.mubr.msk.bf16.gmra.mxu1 %vm1607_vm2, %v5311_v52 }
 0x1ca   : > { %3562 = vst.msk [vmem:[%s5932_s12 + $0x60] sm:$0xf] %vm3537_vm3, %v4590_v12  ;;  %v4593_v53 = vpack.c.bf16 %v2924_v40, %v2924_v40  ;;  %v2922_v24 = vmax.f32 %v2486_v20, 0.0  ;;  %v2507_v8 = vadd.f32 %v4812_v56, %v1962_v1  ;;  %v2026_v49 = vadd.f32 %v5909_v47, %v6090_v45 }
 0x1cb   : > { %v2027_v62 = vpop.f32.mrf.mxu0  ;;  %v2498_v26 = vpop.f32.mrf.mxu1 }
 0x1cc   : > { %3565 = vst.msk [vmem:[%s5932_s12 + $0x6c] sm:$0xf] %vm3537_vm3, %v4593_v53  ;;  %v4591_v13 = vpack.c.bf16 %v2922_v24, %v2922_v24  ;;  %v2927_v25 = vmax.f32 %v2507_v8, 0.0  ;;  %v2499_v34 = vadd.f32 %v2498_v26, %v1954_v23 }
 0x1cd   : > { %v6101_v60 = vpop.f32.mrf.mxu0  ;;  %v4813_v0 = vpop.f32.mrf.mxu1 }
 0x1ce   : > { %3563 = vst.msk [vmem:[%s5932_s12 + $0x64] sm:$0xf] %vm3537_vm3, %v4591_v13  ;;  %v4596_v10 = vpack.c.bf16 %v2927_v25, %v2927_v25  ;;  %v2925_v37 = vmax.f32 %v2499_v34, 0.0  ;;  %v2510_v44 = vadd.f32 %v4813_v0, %v1965_v2  ;;  %v2029_v45 = vadd.f32 %v5909_v47, %v6101_v60 }
 0x1cf   : > { %v2030_v50 = vpop.f32.mrf.mxu0  ;;  %v2501_v11 = vpop.f32.mrf.mxu1 }
 0x1d0   : > { %3568 = vst.msk [vmem:[%s5932_s12 + $0x78] sm:$0xf] %vm3537_vm3, %v4596_v10  ;;  %v4594_v36 = vpack.c.bf16 %v2925_v37, %v2925_v37  ;;  %v2928_v16 = vmax.f32 %v2510_v44, 0.0  ;;  %v2502_v52 = vadd.f32 %v2501_v11, %v1957_v61 }
 0x1d1   : > { %v6111_v42 = vpop.f32.mrf.mxu0  ;;  %v4816_v59 = vpop.f32.mrf.mxu1 }
 0x1d2   : > { %3566 = vst.msk [vmem:[%s5932_s12 + $0x70] sm:$0xf] %vm3537_vm3, %v4594_v36  ;;  %v4597_v38 = vpack.c.bf16 %v2928_v16, %v2928_v16  ;;  %v2926_v48 = vmax.f32 %v2502_v52, 0.0  ;;  %v2523_v4 = vadd.f32 %v4816_v59, %v1978_v29  ;;  %v2034_v32 = vadd.f32 %v5909_v47, %v6111_v42 }
 0x1d3   : > { %v2035_v41 = vpop.f32.mrf.mxu0  ;;  %v2514_v1 = vpop.f32.mrf.mxu1 }
 0x1d4   : > { %3569 = vst.msk [vmem:[%s5932_s12 + $0x7c] sm:$0xf] %vm3537_vm3, %v4597_v38  ;;  %v4595_v12 = vpack.c.bf16 %v2926_v48, %v2926_v48  ;;  %v2931_v40 = vmax.f32 %v2523_v4, 0.0  ;;  %v2515_v20 = vadd.f32 %v2514_v1, %v1970_v33 }
 0x1d5   : > { %v6121_v56 = vpop.f32.mrf.mxu0  ;;  %v4817_v23 = vpop.f32.mrf.mxu1 }
 0x1d6   : > { %3567 = vst.msk [vmem:[%s5932_s12 + $0x74] sm:$0xf] %vm3537_vm3, %v4595_v12  ;;  %v4600_v53 = vpack.c.bf16 %v2931_v40, %v2931_v40  ;;  %v2929_v24 = vmax.f32 %v2515_v20, 0.0  ;;  %v2526_v8 = vadd.f32 %v4817_v23, %v1981_v14  ;;  %v2037_v42 = vadd.f32 %v5909_v47, %v6121_v56 }
 0x1d7   : > { %v2038_v62 = vpop.f32.mrf.mxu0  ;;  %v2517_v26 = vpop.f32.mrf.mxu1 }
 0x1d8   : > { %3572 = vst.msk [vmem:[%s5932_s12 + $0x88] sm:$0xf] %vm3537_vm3, %v4600_v53  ;;  %v4598_v2 = vpack.c.bf16 %v2929_v24, %v2929_v24  ;;  %v2932_v13 = vmax.f32 %v2526_v8, 0.0  ;;  %v2518_v25 = vadd.f32 %v2517_v26, %v1973_v57 }
 0x1d9   : > { %v6131_v34 = vpop.f32.mrf.mxu0  ;;  %v4820_v0 = vpop.f32.mrf.mxu1 }
 0x1da   : > { %3570 = vst.msk [vmem:[%s5932_s12 + $0x80] sm:$0xf] %vm3537_vm3, %v4598_v2  ;;  %v4601_v61 = vpack.c.bf16 %v2932_v13, %v2932_v13  ;;  %v2930_v10 = vmax.f32 %v2518_v25, 0.0  ;;  %v2539_v37 = vadd.f32 %v4820_v0, %v1994_v28  ;;  %v2042_v60 = vadd.f32 %v5909_v47, %v6131_v34 }
 0x1db   : > { %v2043_v44 = vpop.f32.mrf.mxu0  ;;  %v2530_v50 = vpop.f32.mrf.mxu1 }
 0x1dc   : > { %3573 = vst.msk [vmem:[%s5932_s12 + $0x8c] sm:$0xf] %vm3537_vm3, %v4601_v61  ;;  %v4599_v11 = vpack.c.bf16 %v2930_v10, %v2930_v10  ;;  %v2935_v29 = vmax.f32 %v2539_v37, 0.0  ;;  %v2531_v36 = vadd.f32 %v2530_v50, %v1986_v21 }
 0x1dd   : > { %v6141_v16 = vpop.f32.mrf.mxu0  ;;  %v4821_v52 = vpop.f32.mrf.mxu1 }
 0x1de   : > { %3571 = vst.msk [vmem:[%s5932_s12 + $0x84] sm:$0xf] %vm3537_vm3, %v4599_v11  ;;  %v4604_v59 = vpack.c.bf16 %v2935_v29, %v2935_v29  ;;  %v2933_v33 = vmax.f32 %v2531_v36, 0.0  ;;  %v2542_v38 = vadd.f32 %v4821_v52, %v1997_v54  ;;  %v2045_v34 = vadd.f32 %v5909_v47, %v6141_v16 }
 0x1df   : > { %v2046_v48 = vpop.f32.mrf.mxu0  ;;  %v2533_v4 = vpop.f32.mrf.mxu1 }
 0x1e0   : > { %3576 = vst.msk [vmem:[%s5932_s12 + $0x98] sm:$0xf] %vm3537_vm3, %v4604_v59  ;;  %v4602_v41 = vpack.c.bf16 %v2933_v33, %v2933_v33  ;;  %v2936_v1 = vmax.f32 %v2542_v38, 0.0  ;;  %v2534_v14 = vadd.f32 %v2533_v4, %v1989_v30 }
 0x1e1   : > { %v6151_v12 = vpop.f32.mrf.mxu0  ;;  %v4824_v40 = vpop.f32.mrf.mxu1 }
 0x1e2   : > { %3574 = vst.msk [vmem:[%s5932_s12 + $0x90] sm:$0xf] %vm3537_vm3, %v4602_v41  ;;  %v4605_v20 = vpack.c.bf16 %v2936_v1, %v2936_v1  ;;  %v2934_v23 = vmax.f32 %v2534_v14, 0.0  ;;  %v2555_v57 = vadd.f32 %v4824_v40, %v2010_v9  ;;  %v2050_v56 = vadd.f32 %v5909_v47, %v6151_v12 }
 0x1e3   : > { %v2051_v53 = vpop.f32.mrf.mxu0  ;;  %v2546_v24 = vpop.f32.mrf.mxu1 }
 0x1e4   : > { %3577 = vst.msk [vmem:[%s5932_s12 + $0x9c] sm:$0xf] %vm3537_vm3, %v4605_v20  ;;  %v4603_v8 = vpack.c.bf16 %v2934_v23, %v2934_v23  ;;  %v2939_v62 = vmax.f32 %v2555_v57, 0.0  ;;  %v2547_v26 = vadd.f32 %v2546_v24, %v2002_v18 }
 0x1e5   : > { %v6161_v28 = vpop.f32.mrf.mxu0  ;;  %v4825_v2 = vpop.f32.mrf.mxu1 }
 0x1e6   : > { %3575 = vst.msk [vmem:[%s5932_s12 + $0x94] sm:$0xf] %vm3537_vm3, %v4603_v8  ;;  %v4608_v13 = vpack.c.bf16 %v2939_v62, %v2939_v62  ;;  %v2937_v25 = vmax.f32 %v2547_v26, 0.0  ;;  %v2558_v0 = vadd.f32 %v4825_v2, %v2013_v58  ;;  %v2053_v12 = vadd.f32 %v5909_v47, %v6161_v28 }
 0x1e7   : > { %v2054_v21 = vpop.f32.mrf.mxu0  ;;  %v2549_v61 = vpop.f32.mrf.mxu1 }
 0x1e8   : > { %3580 = vst.msk [vmem:[%s5932_s12 + $0xa8] sm:$0xf] %vm3537_vm3, %v4608_v13  ;;  %v4606_v10 = vpack.c.bf16 %v2937_v25, %v2937_v25  ;;  %v2940_v37 = vmax.f32 %v2558_v0, 0.0  ;;  %v2550_v44 = vadd.f32 %v2549_v61, %v2005_v22 }
 0x1e9   : > { %v2057_v50 = vpop.f32.mrf.mxu0  ;;  %v4828_v54 = vpop.f32.mrf.mxu1 }
 0x1ea   : > { %3578 = vst.msk [vmem:[%s5932_s12 + $0xa0] sm:$0xf] %vm3537_vm3, %v4606_v10  ;;  %v4609_v11 = vpack.c.bf16 %v2940_v37, %v2940_v37  ;;  %v2938_v29 = vmax.f32 %v2550_v44, 0.0  ;;  %v2571_v36 = vadd.f32 %v4828_v54, %v2026_v49  ;;  %v2058_v16 = vadd.f32 %v5909_v47, %v2057_v50 }
 0x1eb   : > { %v2059_v52 = vpop.f32.mrf.mxu0  ;;  %v2562_v30 = vpop.f32.mrf.mxu1 }
 0x1ec   : > { %3581 = vst.msk [vmem:[%s5932_s12 + $0xac] sm:$0xf] %vm3537_vm3, %v4609_v11  ;;  %v4607_v59 = vpack.c.bf16 %v2938_v29, %v2938_v29  ;;  %v2943_v33 = vmax.f32 %v2571_v36, 0.0  ;;  %v2563_v38 = vadd.f32 %v2562_v30, %v2018_v6 }
 0x1ed   : > { %v2060_v48 = vpop.f32.mrf.mxu0  ;;  %v4829_v4 = vpop.f32.mrf.mxu1 }
 0x1ee   : > { %3579 = vst.msk [vmem:[%s5932_s12 + $0xa4] sm:$0xf] %vm3537_vm3, %v4607_v59  ;;  %v4612_v9 = vpack.c.bf16 %v2943_v33, %v2943_v33  ;;  %v2941_v41 = vmax.f32 %v2563_v38, 0.0  ;;  %v2574_v1 = vadd.f32 %v4829_v4, %v2029_v45  ;;  %v2061_v50 = vadd.f32 %v5909_v47, %v2060_v48 }
 0x1ef   : > { %v2062_v14 = vpop.f32.mrf.mxu0  ;;  %v2565_v40 = vpop.f32.mrf.mxu1 }
 0x1f0   : > { %3584 = vst.msk [vmem:[%s5932_s12 + $0xb8] sm:$0xf] %vm3537_vm3, %v4612_v9  ;;  %v4610_v18 = vpack.c.bf16 %v2941_v41, %v2941_v41  ;;  %v2944_v20 = vmax.f32 %v2574_v1, 0.0  ;;  %v2566_v23 = vadd.f32 %v2565_v40, %v2021_v46 }
 0x1f1   : > { %v2065_v57 = vpop.f32.mrf.mxu0  ;;  %v4832_v53 = vpop.f32.mrf.mxu1 }
 0x1f2   : > { %3582 = vst.msk [vmem:[%s5932_s12 + $0xb0] sm:$0xf] %vm3537_vm3, %v4610_v18  ;;  %v4613_v24 = vpack.c.bf16 %v2944_v20, %v2944_v20  ;;  %v2942_v58 = vmax.f32 %v2566_v23, 0.0  ;;  %v2587_v8 = vadd.f32 %v4832_v53, %v2042_v60  ;;  %v2066_v28 = vadd.f32 %v5909_v47, %v2065_v57 }
 0x1f3   : > { %v2067_v62 = vpop.f32.mrf.mxu0  ;;  %v2578_v26 = vpop.f32.mrf.mxu1 }
 0x1f4   : > { %3585 = vst.msk [vmem:[%s5932_s12 + $0xbc] sm:$0xf] %vm3537_vm3, %v4613_v24  ;;  %v4611_v2 = vpack.c.bf16 %v2942_v58, %v2942_v58  ;;  %v2947_v22 = vmax.f32 %v2587_v8, 0.0  ;;  %v2579_v13 = vadd.f32 %v2578_v26, %v2034_v32 }
 0x1f5   : > { %v2068_v25 = vpop.f32.mrf.mxu0  ;;  %v4833_v0 = vpop.f32.mrf.mxu1 }
 0x1f6   : > { %3583 = vst.msk [vmem:[%s5932_s12 + $0xb4] sm:$0xf] %vm3537_vm3, %v4611_v2  ;;  %v4616_v21 = vpack.c.bf16 %v2947_v22, %v2947_v22  ;;  %v2945_v61 = vmax.f32 %v2579_v13, 0.0  ;;  %v2590_v49 = vadd.f32 %v4833_v0, %v2045_v34  ;;  %v2069_v57 = vadd.f32 %v5909_v47, %v2068_v25 }
 0x1f7   : > { %v2070_v10 = vpop.f32.mrf.mxu0  ;;  %v2581_v37 = vpop.f32.mrf.mxu1 }
 0x1f8   : > { %3588 = vst.msk [vmem:[%s5932_s12 + $0xc8] sm:$0xf] %vm3537_vm3, %v4616_v21  ;;  %v4614_v44 = vpack.c.bf16 %v2945_v61, %v2945_v61  ;;  %v2948_v54 = vmax.f32 %v2590_v49, 0.0  ;;  %v2582_v6 = vadd.f32 %v2581_v37, %v2037_v42 }
 0x1f9   : > { %v2073_v11 = vpop.f32.mrf.mxu0  ;;  %v4836_v29 = vpop.f32.mrf.mxu1 }
 0x1fa   : > { %3586 = vst.msk [vmem:[%s5932_s12 + $0xc0] sm:$0xf] %vm3537_vm3, %v4614_v44  ;;  %v4617_v36 = vpack.c.bf16 %v2948_v54, %v2948_v54  ;;  %v2946_v52 = vmax.f32 %v2582_v6, 0.0  ;;  %v2603_v30 = vadd.f32 %v4836_v29, %v2058_v16  ;;  %v2074_v48 = vadd.f32 %v5909_v47, %v2073_v11 }
 0x1fb   : > { %v2075_v45 = vpop.f32.mrf.mxu0  ;;  %v2594_v59 = vpop.f32.mrf.mxu1 }
 0x1fc   : > { %3589 = vst.msk [vmem:[%s5932_s12 + $0xcc] sm:$0xf] %vm3537_vm3, %v4617_v36  ;;  %v4615_v33 = vpack.c.bf16 %v2946_v52, %v2946_v52  ;;  %v2951_v38 = vmax.f32 %v2603_v30, 0.0  ;;  %v2595_v4 = vadd.f32 %v2594_v59, %v2050_v56 }
 0x1fd   : > { %v2076_v46 = vpop.f32.mrf.mxu0  ;;  %v4837_v9 = vpop.f32.mrf.mxu1 }
 0x1fe   : > { %3587 = vst.msk [vmem:[%s5932_s12 + $0xc4] sm:$0xf] %vm3537_vm3, %v4615_v33  ;;  %v4620_v41 = vpack.c.bf16 %v2951_v38, %v2951_v38  ;;  %v2949_v1 = vmax.f32 %v2595_v4, 0.0  ;;  %v2606_v14 = vadd.f32 %v4837_v9, %v2061_v50  ;;  %v2077_v34 = vadd.f32 %v5909_v47, %v2076_v46 }
 0x1ff   : > { %v2078_v40 = vpop.f32.mrf.mxu0  ;;  %v2597_v60 = vpop.f32.mrf.mxu1 }
 0x200   : > { %3592 = vst.msk [vmem:[%s5932_s12 + $0xd8] sm:$0xf] %vm3537_vm3, %v4620_v41  ;;  %v4618_v18 = vpack.c.bf16 %v2949_v1, %v2949_v1  ;;  %v2952_v20 = vmax.f32 %v2606_v14, 0.0  ;;  %v2598_v23 = vadd.f32 %v2597_v60, %v2053_v12 }
 0x201   : > { %v2081_v53 = vpop.f32.mrf.mxu0  ;;  %v4840_v32 = vpop.f32.mrf.mxu1 }
 0x202   : > { %3590 = vst.msk [vmem:[%s5932_s12 + $0xd0] sm:$0xf] %vm3537_vm3, %v4618_v18  ;;  %v4621_v24 = vpack.c.bf16 %v2952_v20, %v2952_v20  ;;  %v2950_v58 = vmax.f32 %v2598_v23, 0.0  ;;  %v2619_v8 = vadd.f32 %v4840_v32, %v2074_v48  ;;  %v2082_v29 = vadd.f32 %v5909_v47, %v2081_v53 }
 0x203   : > { %v2083_v62 = vpop.f32.mrf.mxu0  ;;  %v2610_v26 = vpop.f32.mrf.mxu1 }
 0x204   : > { %3593 = vst.msk [vmem:[%s5932_s12 + $0xdc] sm:$0xf] %vm3537_vm3, %v4621_v24  ;;  %v4619_v2 = vpack.c.bf16 %v2950_v58, %v2950_v58  ;;  %v2955_v22 = vmax.f32 %v2619_v8, 0.0  ;;  %v2611_v13 = vadd.f32 %v2610_v26, %v2066_v28 }
 0x205   : > { %v2084_v0 = vpop.f32.mrf.mxu0  ;;  %v4841_v42 = vpop.f32.mrf.mxu1 }
 0x206   : > { %3591 = vst.msk [vmem:[%s5932_s12 + $0xd4] sm:$0xf] %vm3537_vm3, %v4619_v2  ;;  %v4624_v21 = vpack.c.bf16 %v2955_v22, %v2955_v22  ;;  %v2953_v61 = vmax.f32 %v2611_v13, 0.0  ;;  %v2622_v49 = vadd.f32 %v4841_v42, %v2077_v34  ;;  %v2085_v4 = vadd.f32 %v5909_v47, %v2084_v0  ;;  %v6249_v22 = vld [vmem:[%s6729_s2] ss:$0 sm:$0xff] }
 0x207   : > { %v2086_v10 = vpop.f32.mrf.mxu0  ;;  %v2613_v37 = vpop.f32.mrf.mxu1 }
 0x208   : > { %3596 = vst.msk [vmem:[%s5932_s12 + $0xe8] sm:$0xf] %vm3537_vm3, %v4624_v21  ;;  %v4622_v16 = vpack.c.bf16 %v2953_v61, %v2953_v61  ;;  %v2956_v44 = vmax.f32 %v2622_v49, 0.0  ;;  %v2614_v54 = vadd.f32 %v2613_v37, %v2069_v57 }
 0x209   : > { %v2089_v6 = vpop.f32.mrf.mxu0  ;;  %v4844_v11 = vpop.f32.mrf.mxu1 }
 0x20a   : > { %3594 = vst.msk [vmem:[%s5932_s12 + $0xe0] sm:$0xf] %vm3537_vm3, %v4622_v16  ;;  %v4625_v25 = vpack.c.bf16 %v2956_v44, %v2956_v44  ;;  %v2954_v56 = vmax.f32 %v2614_v54, 0.0  ;;  %v2090_v36 = vadd.f32 %v5909_v47, %v2089_v6 }
 0x20b   : > { %v2091_v52 = vpop.f32.mrf.mxu0  ;;  %v2626_v30 = vpop.f32.mrf.mxu1 }
 0x20c   : > { %3597 = vst.msk [vmem:[%s5932_s12 + $0xec] sm:$0xf] %vm3537_vm3, %v4625_v25  ;;  %v4623_v45 = vpack.c.bf16 %v2954_v56, %v2954_v56  ;;  %v2635_v59 = vadd.f32 %v4844_v11, %v2090_v36  ;;  %v2627_v50 = vadd.f32 %v2626_v30, %v2082_v29 }
 0x20d   : > { %v2092_v33 = vpop.f32.mrf.mxu0  ;;  %v4845_v38 = vpop.f32.mrf.mxu1 }
 0x20e   : > { %3595 = vst.msk [vmem:[%s5932_s12 + $0xe4] sm:$0xf] %vm3537_vm3, %v4623_v45  ;;  %v2959_v46 = vmax.f32 %v2635_v59, 0.0  ;;  %v2957_v9 = vmax.f32 %v2627_v50, 0.0  ;;  %v2093_v12 = vadd.f32 %v5909_v47, %v2092_v33 }
 0x20f   : > { %v2094_v41 = vpop.f32.mrf.mxu0  ;;  %v2629_v1 = vpop.f32.mrf.mxu1 }
 0x210   : > { %v4628_v14 = vpack.c.bf16 %v2959_v46, %v2959_v46  ;;  %v4626_v40 = vpack.c.bf16 %v2957_v9, %v2957_v9  ;;  %v2638_v60 = vadd.f32 %v4845_v38, %v2093_v12  ;;  %v2630_v48 = vadd.f32 %v2629_v1, %v2085_v4 }
 0x211   : > { %v2097_v18 = vpop.f32.mrf.mxu0  ;;  %v4848_v20 = vpop.f32.mrf.mxu1 }
 0x212   : > { %3600 = vst.msk [vmem:[%s5932_s12 + $0xf8] sm:$0xf] %vm3537_vm3, %v4628_v14  ;;  %3598 = vst.msk [vmem:[%s5932_s12 + $0xf0] sm:$0xf] %vm3537_vm3, %v4626_v40  ;;  %v2960_v23 = vmax.f32 %v2638_v60, 0.0  ;;  %v2958_v53 = vmax.f32 %v2630_v48, 0.0  ;;  %v2098_v32 = vadd.f32 %v5909_v47, %v2097_v18 }
 0x213   : > { %v2099_v28 = vpop.f32.mrf.mxu0  ;;  %v2642_v24 = vpop.f32.mrf.mxu1 }
 0x214   : > { %v4629_v58 = vpack.c.bf16 %v2960_v23, %v2960_v23  ;;  %v4627_v8 = vpack.c.bf16 %v2958_v53, %v2958_v53  ;;  %v2643_v62 = vadd.f32 %v2642_v24, %v2098_v32 }
 0x215   : > { %v2100_v26 = vpop.f32.mrf.mxu0  ;;  %v4849_v34 = vpop.f32.mrf.mxu1 }
 0x216   : > { %3601 = vst.msk [vmem:[%s5932_s12 + $0xfc] sm:$0xf] %vm3537_vm3, %v4629_v58  ;;  %3599 = vst.msk [vmem:[%s5932_s12 + $0xf4] sm:$0xf] %vm3537_vm3, %v4627_v8  ;;  %v2961_v2 = vmax.f32 %v2643_v62, 0.0  ;;  %v2101_v47 = vadd.f32 %v6249_v22, %v2100_v26 }
 0x217   : > { %v2102_v13 = vpop.f32.mrf.mxu0  ;;  %v2645_v0 = vpop.f32.mrf.mxu1 }
 0x218   : > { %v4630_v42 = vpack.c.bf16 %v2961_v2, %v2961_v2  ;;  %v2646_v57 = vadd.f32 %v2645_v0, %v2101_v47 }
 0x219   : > { %v2105_v21 = vpop.f32.mrf.mxu0  ;;  %v4852_v61 = vpop.f32.mrf.mxu1 }
 0x21a   : > { %3602 = vst.msk [vmem:[%s5932_s12 + $0x100] sm:$0xf] %vm3537_vm3, %v4630_v42  ;;  %v2962_v49 = vmax.f32 %v2646_v57, 0.0  ;;  %v2106_v10 = vadd.f32 %v6249_v22, %v2105_v21 }
 0x21b   : > { %v2107_v37 = vpop.f32.mrf.mxu0  ;;  %v2658_v16 = vpop.f32.mrf.mxu1 }
 0x21c   : > { %v4631_v44 = vpack.c.bf16 %v2962_v49, %v2962_v49  ;;  %v2651_v54 = vadd.f32 %v4848_v20, %v2106_v10 }
 0x21d   : > { %v2108_v6 = vpop.f32.mrf.mxu0  ;;  %v4853_v11 = vpop.f32.mrf.mxu1 }
 0x21e   : > { %3603 = vst.msk [vmem:[%s5932_s12 + $0x104] sm:$0xf] %vm3537_vm3, %v4631_v44  ;;  %v2963_v29 = vmax.f32 %v2651_v54, 0.0  ;;  %v2109_v25 = vadd.f32 %v6249_v22, %v2108_v6 }
 0x21f   : > { %v2110_v56 = vpop.f32.mrf.mxu0  ;;  %v2661_v36 = vpop.f32.mrf.mxu1 }
 0x220   : > { %v4632_v52 = vpack.c.bf16 %v2963_v29, %v2963_v29  ;;  %v2654_v30 = vadd.f32 %v4849_v34, %v2109_v25 }
 0x221   : > { %v2113_v45 = vpop.f32.mrf.mxu0  ;;  %v4856_v59 = vpop.f32.mrf.mxu1 }
 0x222   : > { %3604 = vst.msk [vmem:[%s5932_s12 + $0x108] sm:$0xf] %vm3537_vm3, %v4632_v52  ;;  %v2964_v50 = vmax.f32 %v2654_v30, 0.0  ;;  %v2114_v33 = vadd.f32 %v6249_v22, %v2113_v45 }
 0x223   : > { %v2115_v38 = vpop.f32.mrf.mxu0  ;;  %v2674_v4 = vpop.f32.mrf.mxu1 }
 0x224   : > { %v4633_v46 = vpack.c.bf16 %v2964_v50, %v2964_v50  ;;  %v2659_v9 = vadd.f32 %v2658_v16, %v2114_v33 }
 0x225   : > { %v2116_v12 = vpop.f32.mrf.mxu0  ;;  %v4857_v41 = vpop.f32.mrf.mxu1 }
 0x226   : > { %3605 = vst.msk [vmem:[%s5932_s12 + $0x10c] sm:$0xf] %vm3537_vm3, %v4633_v46  ;;  %v2965_v1 = vmax.f32 %v2659_v9, 0.0  ;;  %v2117_v14 = vadd.f32 %v6249_v22, %v2116_v12 }
 0x227   : > { %v2118_v40 = vpop.f32.mrf.mxu0  ;;  %v2677_v60 = vpop.f32.mrf.mxu1 }
 0x228   : > { %v4634_v48 = vpack.c.bf16 %v2965_v1, %v2965_v1  ;;  %v2662_v18 = vadd.f32 %v2661_v36, %v2117_v14 }
 0x229   : > { %v2121_v20 = vpop.f32.mrf.mxu0  ;;  %v6264_v23 = vpop.f32.mrf.mxu1 }
 0x22a   : > { %3606 = vst.msk [vmem:[%s5932_s12 + $0x110] sm:$0xf] %vm3537_vm3, %v4634_v48  ;;  %v2966_v53 = vmax.f32 %v2662_v18, 0.0  ;;  %v2122_v32 = vadd.f32 %v6249_v22, %v2121_v20 }
 0x22b   : > { %v2123_v28 = vpop.f32.mrf.mxu0  ;;  %v2690_v24 = vpop.f32.mrf.mxu1 }
 0x22c   : > { %v4635_v58 = vpack.c.bf16 %v2966_v53, %v2966_v53  ;;  %v2667_v8 = vadd.f32 %v4852_v61, %v2122_v32 }
 0x22d   : > { %v2124_v62 = vpop.f32.mrf.mxu0  ;;  %v6269_v26 = vpop.f32.mrf.mxu1 }
 0x22e   : > { %3607 = vst.msk [vmem:[%s5932_s12 + $0x114] sm:$0xf] %vm3537_vm3, %v4635_v58  ;;  %v2967_v34 = vmax.f32 %v2667_v8, 0.0  ;;  %v2125_v2 = vadd.f32 %v6249_v22, %v2124_v62 }
 0x22f   : > { %v2126_v47 = vpop.f32.mrf.mxu0  ;;  %v2693_v13 = vpop.f32.mrf.mxu1 }
 0x230   : > { %v4636_v0 = vpack.c.bf16 %v2967_v34, %v2967_v34  ;;  %v2670_v42 = vadd.f32 %v4853_v11, %v2125_v2 }
 0x231   : > { %v2129_v57 = vpop.f32.mrf.mxu0  ;;  %v6274_v21 = vpop.f32.mrf.mxu1 }
 0x232   : > { %3608 = vst.msk [vmem:[%s5932_s12 + $0x118] sm:$0xf] %vm3537_vm3, %v4636_v0  ;;  %v2968_v49 = vmax.f32 %v2670_v42, 0.0  ;;  %v2130_v61 = vadd.f32 %v6249_v22, %v2129_v57 }
 0x233   : > { %v2131_v10 = vpop.f32.mrf.mxu0  ;;  %v6279_v37 = vpop.f32.mrf.mxu1 }
 0x234   : > { %v4637_v16 = vpack.c.bf16 %v2968_v49, %v2968_v49  ;;  %v2675_v44 = vadd.f32 %v2674_v4, %v2130_v61 }
 0x235   : > { %v2132_v54 = vpop.f32.mrf.mxu0  ;;  %v6281_v6 = vpop.f32.mrf.mxu1 }
 0x236   : > { %3609 = vst.msk [vmem:[%s5932_s12 + $0x11c] sm:$0xf] %vm3537_vm3, %v4637_v16  ;;  %v2969_v11 = vmax.f32 %v2675_v44, 0.0  ;;  %v2133_v29 = vadd.f32 %v6249_v22, %v2132_v54 }
 0x237   : > { %v2134_v25 = vpop.f32.mrf.mxu0  ;;  %v6286_v56 = vpop.f32.mrf.mxu1 }
 0x238   : > { %v4638_v36 = vpack.c.bf16 %v2969_v11, %v2969_v11  ;;  %v2678_v52 = vadd.f32 %v2677_v60, %v2133_v29 }
 0x239   : > { %v2137_v30 = vpop.f32.mrf.mxu0  ;;  %v6288_v45 = vpop.f32.mrf.mxu1 }
 0x23a   : > { %3610 = vst.msk [vmem:[%s5932_s12 + $0x120] sm:$0xf] %vm3537_vm3, %v4638_v36  ;;  %v2970_v50 = vmax.f32 %v2678_v52, 0.0  ;;  %v2138_v33 = vadd.f32 %v6249_v22, %v2137_v30 }
 0x23b   : > { %v2139_v38 = vpop.f32.mrf.mxu0  ;;  %v6293_v4 = vpop.f32.mrf.mxu1 }
 0x23c   : > { %v4639_v46 = vpack.c.bf16 %v2970_v50, %v2970_v50  ;;  %v2683_v9 = vadd.f32 %v4856_v59, %v2138_v33  ;;  %v2234_v38 = vadd.f32 %v6249_v22, %v5698_v15 }
 0x23d   : > { %v2140_v12 = vpop.f32.mrf.mxu0  ;;  %v6295_v1 = vpop.f32.mrf.mxu1 }
 0x23e   : > { %3611 = vst.msk [vmem:[%s5932_s12 + $0x124] sm:$0xf] %vm3537_vm3, %v4639_v46  ;;  %v2971_v14 = vmax.f32 %v2683_v9, 0.0  ;;  %v2141_v40 = vadd.f32 %v6249_v22, %v2140_v12 }
 0x23f   : > { %v2142_v60 = vpop.f32.mrf.mxu0  ;;  %v6300_v48 = vpop.f32.mrf.mxu1 }
 0x240   : > { %v4640_v18 = vpack.c.bf16 %v2971_v14, %v2971_v14  ;;  %v2686_v20 = vadd.f32 %v4857_v41, %v2141_v40 }
 0x241   : > { %v2145_v53 = vpop.f32.mrf.mxu0  ;;  %v6302_v32 = vpop.f32.mrf.mxu1 }
 0x242   : > { %3612 = vst.msk [vmem:[%s5932_s12 + $0x128] sm:$0xf] %vm3537_vm3, %v4640_v18  ;;  %v2972_v59 = vmax.f32 %v2686_v20, 0.0  ;;  %v2146_v28 = vadd.f32 %v6249_v22, %v2145_v53 }
 0x243   : > { %v2147_v58 = vpop.f32.mrf.mxu0  ;;  %v6307_v8 = vpop.f32.mrf.mxu1 }
 0x244   : > { %v4641_v62 = vpack.c.bf16 %v2972_v59, %v2972_v59  ;;  %v2691_v34 = vadd.f32 %v2690_v24, %v2146_v28  ;;  %v2229_v58 = vadd.f32 %v6249_v22, %v5690_v7 }
 0x245   : > { %v2148_v2 = vpop.f32.mrf.mxu0  ;;  %v6309_v47 = vpop.f32.mrf.mxu1 }
 0x246   : > { %3613 = vst.msk [vmem:[%s5932_s12 + $0x12c] sm:$0xf] %vm3537_vm3, %v4641_v62  ;;  %v2973_v41 = vmax.f32 %v2691_v34, 0.0  ;;  %v2149_v0 = vadd.f32 %v6249_v22, %v2148_v2 }
 0x247   : > { %v2150_v42 = vpop.f32.mrf.mxu0  ;;  %v6314_v57 = vpop.f32.mrf.mxu1 }
 0x248   : > { %v4642_v49 = vpack.c.bf16 %v2973_v41, %v2973_v41  ;;  %v2694_v61 = vadd.f32 %v2693_v13, %v2149_v0  ;;  %v2250_v42 = vadd.f32 %v6249_v22, %v5726_v39 }
 0x249   : > { %v2153_v10 = vpop.f32.mrf.mxu0  ;;  %v6316_v16 = vpop.f32.mrf.mxu1 }
 0x24a   : > { %3614 = vst.msk [vmem:[%s5932_s12 + $0x130] sm:$0xf] %vm3537_vm3, %v4642_v49  ;;  %v2974_v24 = vmax.f32 %v2694_v61, 0.0  ;;  %v2154_v44 = vadd.f32 %v6249_v22, %v2153_v10 }
 0x24b   : > { %v2155_v54 = vpop.f32.mrf.mxu0  ;;  %v6321_v11 = vpop.f32.mrf.mxu1 }
 0x24c   : > { %v4643_v29 = vpack.c.bf16 %v2974_v24, %v2974_v24  ;;  %v2699_v25 = vadd.f32 %v6264_v23, %v2154_v44  ;;  %v2226_v23 = vadd.f32 %v6249_v22, %v5684_v3  ;;  %v2237_v3 = vadd.f32 %v6249_v22, %v5704_v19 }
 0x24d   : > { %v2156_v36 = vpop.f32.mrf.mxu0  ;;  %v6324_v52 = vpop.f32.mrf.mxu1 }
 0x24e   : > { %3615 = vst.msk [vmem:[%s5932_s12 + $0x134] sm:$0xf] %vm3537_vm3, %v4643_v29  ;;  %v2975_v13 = vmax.f32 %v2699_v25, 0.0  ;;  %v2157_v30 = vadd.f32 %v6249_v22, %v2156_v36 }
 0x24f   : > { %v2158_v50 = vpop.f32.mrf.mxu0  ;;  %v6329_v33 = vpop.f32.mrf.mxu1 }
 0x250   : > { %v4644_v46 = vpack.c.bf16 %v2975_v13, %v2975_v13  ;;  %v2702_v9 = vadd.f32 %v6269_v26, %v2157_v30  ;;  %v2242_v50 = vadd.f32 %v6249_v22, %v5712_v27 }
 0x251   : > { %v2161_v12 = vpop.f32.mrf.mxu0  ;;  %v4880_v14 = vpop.f32.mrf.mxu1 }
 0x252   : > { %3616 = vst.msk [vmem:[%s5932_s12 + $0x138] sm:$0xf] %vm3537_vm3, %v4644_v46  ;;  %v2976_v40 = vmax.f32 %v2702_v9, 0.0  ;;  %v2162_v60 = vadd.f32 %v6249_v22, %v2161_v12  ;;  %v2779_v18 = vadd.f32 %v4880_v14, %v2234_v38 }
 0x253   : > { %v2163_v20 = vpop.f32.mrf.mxu0  ;;  %v2770_v53 = vpop.f32.mrf.mxu1 }
 0x254   : > { %v4645_v59 = vpack.c.bf16 %v2976_v40, %v2976_v40  ;;  %v2707_v15 = vadd.f32 %v6279_v37, %v2162_v60  ;;  %v2995_v28 = vmax.f32 %v2779_v18, 0.0  ;;  %v2771_v26 = vadd.f32 %v2770_v53, %v2226_v23 }
 0x255   : > { %v2164_v62 = vpop.f32.mrf.mxu0  ;;  %v4881_v34 = vpop.f32.mrf.mxu1  ;;  %v2245_v60 = vadd.f32 %v6249_v22, %v5718_v31 }
 0x256   : > { %3617 = vst.msk [vmem:[%s5932_s12 + $0x13c] sm:$0xf] %vm3537_vm3, %v4645_v59  ;;  %v2977_v2 = vmax.f32 %v2707_v15, 0.0  ;;  %v4664_v41 = vpack.c.bf16 %v2995_v28, %v2995_v28  ;;  %v2993_v0 = vmax.f32 %v2771_v26, 0.0  ;;  %v2165_v37 = vadd.f32 %v6249_v22, %v2164_v62 }
 0x257   : > { %v2782_v49 = vadd.f32 %v4881_v34, %v2237_v3  ;;  %v2166_v61 = vpop.f32.mrf.mxu0  ;;  %v2773_v7 = vpop.f32.mrf.mxu1  ;;  %v2258_v34 = vadd.f32 %v6249_v22, %v5740_v51 }
 0x258   : > { %v4646_v10 = vpack.c.bf16 %v2977_v2, %v2977_v2  ;;  %3636 = vst.msk [vmem:[%s5932_s12 + $0x188] sm:$0xf] %vm3537_vm3, %v4664_v41  ;;  %v4662_v19 = vpack.c.bf16 %v2993_v0, %v2993_v0  ;;  %v2710_v24 = vadd.f32 %v6286_v56, %v2165_v37  ;;  %v2774_v44 = vadd.f32 %v2773_v7, %v2229_v58 }
 0x259   : > { %v2996_v54 = vmax.f32 %v2782_v49, 0.0  ;;  %v2169_v29 = vpop.f32.mrf.mxu0  ;;  %v4884_v25 = vpop.f32.mrf.mxu1  ;;  %v2253_v56 = vadd.f32 %v6249_v22, %v5732_v43  ;;  %v2266_v2 = vadd.f32 %v6249_v22, %v5754_v63  ;;  %v2269_v7 = vadd.f32 %v6249_v22, %v5760_v5 }
 0x25a   : > { %3618 = vst.msk [vmem:[%s5932_s12 + $0x140] sm:$0xf] %vm3537_vm3, %v4646_v10  ;;  %3634 = vst.msk [vmem:[%s5932_s12 + $0x180] sm:$0xf] %vm3537_vm3, %v4662_v19  ;;  %v2978_v36 = vmax.f32 %v2710_v24, 0.0  ;;  %v2994_v39 = vmax.f32 %v2774_v44, 0.0  ;;  %v2170_v13 = vadd.f32 %v6249_v22, %v2169_v29  ;;  %v2795_v30 = vadd.f32 %v4884_v25, %v2250_v42 }
 0x25b   : > { %v4665_v38 = vpack.c.bf16 %v2996_v54, %v2996_v54  ;;  %v2171_v46 = vpop.f32.mrf.mxu0  ;;  %v2786_v9 = vpop.f32.mrf.mxu1 }
 0x25c   : > { %v4647_v12 = vpack.c.bf16 %v2978_v36, %v2978_v36  ;;  %v4663_v14 = vpack.c.bf16 %v2994_v39, %v2994_v39  ;;  %v2715_v23 = vadd.f32 %v6274_v21, %v2170_v13  ;;  %v2999_v40 = vmax.f32 %v2795_v30, 0.0 }
 0x25d   : > { %3637 = vst.msk [vmem:[%s5932_s12 + $0x18c] sm:$0xf] %vm3537_vm3, %v4665_v38  ;;  %v2787_v18 = vadd.f32 %v2786_v9, %v2242_v50  ;;  %v2172_v20 = vpop.f32.mrf.mxu0  ;;  %v4885_v27 = vpop.f32.mrf.mxu1  ;;  %v2261_v50 = vadd.f32 %v6249_v22, %v5746_v55 }
 0x25e   : > { %3619 = vst.msk [vmem:[%s5932_s12 + $0x144] sm:$0xf] %vm3537_vm3, %v4647_v12  ;;  %3635 = vst.msk [vmem:[%s5932_s12 + $0x184] sm:$0xf] %vm3537_vm3, %v4663_v14  ;;  %v2979_v43 = vmax.f32 %v2715_v23, 0.0  ;;  %v4668_v53 = vpack.c.bf16 %v2999_v40, %v2999_v40  ;;  %v2173_v59 = vadd.f32 %v6249_v22, %v2172_v20  ;;  %v2798_v21 = vadd.f32 %v4885_v27, %v2253_v56 }
 0x25f   : > { %v2997_v15 = vmax.f32 %v2787_v18, 0.0  ;;  %v2174_v28 = vpop.f32.mrf.mxu0  ;;  %v2789_v26 = vpop.f32.mrf.mxu1  ;;  %v2274_v40 = vadd.f32 %v6249_v22, %v5768_v17 }
 0x260   : > { %v4648_v58 = vpack.c.bf16 %v2979_v43, %v2979_v43  ;;  %3640 = vst.msk [vmem:[%s5932_s12 + $0x198] sm:$0xf] %vm3537_vm3, %v4668_v53  ;;  %v2718_v31 = vadd.f32 %v6281_v6, %v2173_v59  ;;  %v3000_v3 = vmax.f32 %v2798_v21, 0.0  ;;  %v2790_v62 = vadd.f32 %v2789_v26, %v2245_v60  ;;  %v6750_v26 = vld [vmem:[#allocation3_spill] sm:$0xff] }
 0x261   : > { %v4666_v41 = vpack.c.bf16 %v2997_v15, %v2997_v15  ;;  %v2177_v0 = vpop.f32.mrf.mxu0  ;;  %v4888_v37 = vpop.f32.mrf.mxu1 }
 0x262   : > { %3620 = vst.msk [vmem:[%s5932_s12 + $0x148] sm:$0xf] %vm3537_vm3, %v4648_v58  ;;  %v2980_v42 = vmax.f32 %v2718_v31, 0.0  ;;  %v4669_v49 = vpack.c.bf16 %v3000_v3, %v3000_v3  ;;  %v2998_v61 = vmax.f32 %v2790_v62, 0.0  ;;  %v2178_v6 = vadd.f32 %v6249_v22, %v2177_v0  ;;  %v6751_v31 = vld [vmem:[#allocation4_spill] sm:$0xff] }
 0x263   : > { %3638 = vst.msk [vmem:[%s5932_s12 + $0x190] sm:$0xf] %vm3537_vm3, %v4666_v41  ;;  %v2811_v51 = vadd.f32 %v4888_v37, %v2266_v2  ;;  %v2179_v10 = vpop.f32.mrf.mxu0  ;;  %v2802_v63 = vpop.f32.mrf.mxu1  ;;  %v2277_v58 = vadd.f32 %v6249_v22, %v6750_v26  ;;  %v2285_v3 = vadd.f32 %v6249_v22, %v6751_v31  ;;  %v6757_v26 = vld [vmem:[#allocation11_spill] sm:$0xff] }
 0x264   : > { %v4649_v19 = vpack.c.bf16 %v2980_v42, %v2980_v42  ;;  %3641 = vst.msk [vmem:[%s5932_s12 + $0x19c] sm:$0xf] %vm3537_vm3, %v4669_v49  ;;  %v4667_v24 = vpack.c.bf16 %v2998_v61, %v2998_v61  ;;  %v2723_v44 = vadd.f32 %v6293_v4, %v2178_v6  ;;  %v2803_v54 = vadd.f32 %v2802_v63, %v2258_v34  ;;  %v6752_v42 = vld [vmem:[#allocation7_spill] sm:$0xff] }
 0x265   : > { %v3003_v29 = vmax.f32 %v2811_v51, 0.0  ;;  %v2180_v25 = vpop.f32.mrf.mxu0  ;;  %v4889_v36 = vpop.f32.mrf.mxu1  ;;  %v2282_v4 = vadd.f32 %v6249_v22, %v5782_v35  ;;  %v2298_v49 = vadd.f32 %v6249_v22, %v6752_v42 }
 0x266   : > { %3621 = vst.msk [vmem:[%s5932_s12 + $0x14c] sm:$0xf] %vm3537_vm3, %v4649_v19  ;;  %3639 = vst.msk [vmem:[%s5932_s12 + $0x194] sm:$0xf] %vm3537_vm3, %v4667_v24  ;;  %v2981_v5 = vmax.f32 %v2723_v44, 0.0  ;;  %v3001_v39 = vmax.f32 %v2803_v54, 0.0  ;;  %v2181_v13 = vadd.f32 %v6249_v22, %v2180_v25  ;;  %v2814_v30 = vadd.f32 %v4889_v36, %v2269_v7 }
 0x267   : > { %v4672_v56 = vpack.c.bf16 %v3003_v29, %v3003_v29  ;;  %v2182_v38 = vpop.f32.mrf.mxu0  ;;  %v2805_v46 = vpop.f32.mrf.mxu1 }
 0x268   : > { %v4650_v9 = vpack.c.bf16 %v2981_v5, %v2981_v5  ;;  %v4670_v12 = vpack.c.bf16 %v3001_v39, %v3001_v39  ;;  %v2726_v14 = vadd.f32 %v6300_v48, %v2181_v13  ;;  %v3004_v23 = vmax.f32 %v2814_v30, 0.0  ;;  %v6753_v39 = vld [vmem:[#allocation5_spill] sm:$0xff] }
 0x269   : > { %3644 = vst.msk [vmem:[%s5932_s12 + $0x1a8] sm:$0xf] %vm3537_vm3, %v4672_v56  ;;  %v2806_v60 = vadd.f32 %v2805_v46, %v2261_v50  ;;  %v2185_v18 = vpop.f32.mrf.mxu0  ;;  %v4892_v55 = vpop.f32.mrf.mxu1  ;;  %v2290_v13 = vadd.f32 %v6249_v22, %v6753_v39 }
 0x26a   : > { %3622 = vst.msk [vmem:[%s5932_s12 + $0x150] sm:$0xf] %vm3537_vm3, %v4650_v9  ;;  %3642 = vst.msk [vmem:[%s5932_s12 + $0x1a0] sm:$0xf] %vm3537_vm3, %v4670_v12  ;;  %v2982_v35 = vmax.f32 %v2726_v14, 0.0  ;;  %v4673_v20 = vpack.c.bf16 %v3004_v23, %v3004_v23  ;;  %v2186_v27 = vadd.f32 %v6249_v22, %v2185_v18  ;;  %v2827_v48 = vadd.f32 %v4892_v55, %v2282_v4  ;;  %v6755_v14 = vld [vmem:[#allocation6_spill] sm:$0xff] }
 0x26b   : > { %v3002_v43 = vmax.f32 %v2806_v60, 0.0  ;;  %v2187_v53 = vpop.f32.mrf.mxu0  ;;  %v2818_v59 = vpop.f32.mrf.mxu1  ;;  %v2293_v23 = vadd.f32 %v6249_v22, %v6755_v14 }
 0x26c   : > { %v4651_v21 = vpack.c.bf16 %v2982_v35, %v2982_v35  ;;  %3645 = vst.msk [vmem:[%s5932_s12 + $0x1ac] sm:$0xf] %vm3537_vm3, %v4673_v20  ;;  %v2731_v17 = vadd.f32 %v6288_v45, %v2186_v27  ;;  %v3007_v15 = vmax.f32 %v2827_v48, 0.0  ;;  %v2819_v28 = vadd.f32 %v2818_v59, %v2274_v40 }
 0x26d   : > { %v4671_v62 = vpack.c.bf16 %v3002_v43, %v3002_v43  ;;  %v2188_v34 = vpop.f32.mrf.mxu0  ;;  %v4893_v2 = vpop.f32.mrf.mxu1 }
 0x26e   : > { %3623 = vst.msk [vmem:[%s5932_s12 + $0x154] sm:$0xf] %vm3537_vm3, %v4651_v21  ;;  %v2983_v41 = vmax.f32 %v2731_v17, 0.0  ;;  %v4676_v0 = vpack.c.bf16 %v3007_v15, %v3007_v15  ;;  %v3005_v37 = vmax.f32 %v2819_v28, 0.0  ;;  %v2189_v45 = vadd.f32 %v6249_v22, %v2188_v34  ;;  %v6756_v15 = vld [vmem:[#allocation9_spill] sm:$0xff] }
 0x26f   : > { %3643 = vst.msk [vmem:[%s5932_s12 + $0x1a4] sm:$0xf] %vm3537_vm3, %v4671_v62  ;;  %v2830_v61 = vadd.f32 %v4893_v2, %v2285_v3  ;;  %v2190_v6 = vpop.f32.mrf.mxu0  ;;  %v2821_v7 = vpop.f32.mrf.mxu1  ;;  %v2306_v28 = vadd.f32 %v6249_v22, %v6756_v15 }
 0x270   : > { %v4652_v51 = vpack.c.bf16 %v2983_v41, %v2983_v41  ;;  %3648 = vst.msk [vmem:[%s5932_s12 + $0x1b8] sm:$0xf] %vm3537_vm3, %v4676_v0  ;;  %v4674_v10 = vpack.c.bf16 %v3005_v37, %v3005_v37  ;;  %v2734_v63 = vadd.f32 %v6295_v1, %v2189_v45  ;;  %v2822_v19 = vadd.f32 %v2821_v7, %v2277_v58  ;;  %v6754_v1 = vld [vmem:[#allocation8_spill] sm:$0xff] }
 0x271   : > { %v3008_v24 = vmax.f32 %v2830_v61, 0.0  ;;  %v2193_v44 = vpop.f32.mrf.mxu0  ;;  %v4896_v54 = vpop.f32.mrf.mxu1  ;;  %v2301_v30 = vadd.f32 %v6249_v22, %v6754_v1  ;;  %v2314_v58 = vadd.f32 %v6249_v22, %v6757_v26  ;;  %v6758_v0 = vld [vmem:[#allocation12_spill] sm:$0xff] }
 0x272   : > { %3624 = vst.msk [vmem:[%s5932_s12 + $0x158] sm:$0xf] %vm3537_vm3, %v4652_v51  ;;  %3646 = vst.msk [vmem:[%s5932_s12 + $0x1b0] sm:$0xf] %vm3537_vm3, %v4674_v10  ;;  %v2984_v29 = vmax.f32 %v2734_v63, 0.0  ;;  %v3006_v25 = vmax.f32 %v2822_v19, 0.0  ;;  %v2194_v36 = vadd.f32 %v6249_v22, %v2193_v44  ;;  %v2843_v5 = vadd.f32 %v4896_v54, %v2298_v49 }
 0x273   : > { %v4677_v50 = vpack.c.bf16 %v3008_v24, %v3008_v24  ;;  %v2195_v4 = vpop.f32.mrf.mxu0  ;;  %v2834_v56 = vpop.f32.mrf.mxu1  ;;  %v2317_v37 = vadd.f32 %v6249_v22, %v6758_v0 }
 0x274   : > { %v4653_v38 = vpack.c.bf16 %v2984_v29, %v2984_v29  ;;  %v4675_v46 = vpack.c.bf16 %v3006_v25, %v3006_v25  ;;  %v2739_v9 = vadd.f32 %v6307_v8, %v2194_v36  ;;  %v3011_v12 = vmax.f32 %v2843_v5, 0.0  ;;  %v6759_v25 = vld [vmem:[#allocation10_spill] sm:$0xff] }
 0x275   : > { %3649 = vst.msk [vmem:[%s5932_s12 + $0x1bc] sm:$0xf] %vm3537_vm3, %v4677_v50  ;;  %v2835_v40 = vadd.f32 %v2834_v56, %v2290_v13  ;;  %v2196_v60 = vpop.f32.mrf.mxu0  ;;  %v4897_v18 = vpop.f32.mrf.mxu1  ;;  %v2309_v36 = vadd.f32 %v6249_v22, %v6759_v25 }
 0x276   : > { %3625 = vst.msk [vmem:[%s5932_s12 + $0x15c] sm:$0xf] %vm3537_vm3, %v4653_v38  ;;  %3647 = vst.msk [vmem:[%s5932_s12 + $0x1b4] sm:$0xf] %vm3537_vm3, %v4675_v46  ;;  %v2985_v55 = vmax.f32 %v2739_v9, 0.0  ;;  %v4680_v35 = vpack.c.bf16 %v3011_v12, %v3011_v12  ;;  %v2197_v20 = vadd.f32 %v6249_v22, %v2196_v60  ;;  %v2846_v8 = vadd.f32 %v4897_v18, %v2301_v30  ;;  %v6761_v38 = vld [vmem:[#allocation13_spill] sm:$0xff] }
 0x277   : > { %v3009_v27 = vmax.f32 %v2835_v40, 0.0  ;;  %v2198_v48 = vpop.f32.mrf.mxu0  ;;  %v2837_v43 = vpop.f32.mrf.mxu1  ;;  %v2322_v46 = vadd.f32 %v6249_v22, %v6761_v38 }
 0x278   : > { %v4654_v53 = vpack.c.bf16 %v2985_v55, %v2985_v55  ;;  %3652 = vst.msk [vmem:[%s5932_s12 + $0x1c8] sm:$0xf] %vm3537_vm3, %v4680_v35  ;;  %v2742_v59 = vadd.f32 %v6314_v57, %v2197_v20  ;;  %v3012_v21 = vmax.f32 %v2846_v8, 0.0  ;;  %v2838_v17 = vadd.f32 %v2837_v43, %v2293_v23  ;;  %v6762_v43 = vld [vmem:[#allocation14_spill] sm:$0xff] }
 0x279   : > { %v4678_v31 = vpack.c.bf16 %v3009_v27, %v3009_v27  ;;  %v2201_v3 = vpop.f32.mrf.mxu0  ;;  %v4900_v62 = vpop.f32.mrf.mxu1 }
 0x27a   : > { %3626 = vst.msk [vmem:[%s5932_s12 + $0x160] sm:$0xf] %vm3537_vm3, %v4654_v53  ;;  %v2986_v34 = vmax.f32 %v2742_v59, 0.0  ;;  %v4681_v2 = vpack.c.bf16 %v3012_v21, %v3012_v21  ;;  %v3010_v41 = vmax.f32 %v2838_v17, 0.0  ;;  %v2202_v57 = vadd.f32 %v6249_v22, %v2201_v3  ;;  %v6763_v59 = vld [vmem:[#allocation16_spill] sm:$0xff]  ;;  %v6764_v3 = vld [vmem:[#allocation19_spill] sm:$0xff] }
 0x27b   : > { %3650 = vst.msk [vmem:[%s5932_s12 + $0x1c0] sm:$0xf] %vm3537_vm3, %v4678_v31  ;;  %v2859_v45 = vadd.f32 %v4900_v62, %v2314_v58  ;;  %v2203_v42 = vpop.f32.mrf.mxu0  ;;  %v2850_v49 = vpop.f32.mrf.mxu1  ;;  %v2325_v53 = vadd.f32 %v6249_v22, %v6762_v43  ;;  %v2333_v21 = vadd.f32 %v6249_v22, %v6763_v59  ;;  %v2346_v62 = vadd.f32 %v6249_v22, %v6764_v3 }
 0x27c   : > { %v4655_v61 = vpack.c.bf16 %v2986_v34, %v2986_v34  ;;  %3653 = vst.msk [vmem:[%s5932_s12 + $0x1cc] sm:$0xf] %vm3537_vm3, %v4681_v2  ;;  %v4679_v6 = vpack.c.bf16 %v3010_v41, %v3010_v41  ;;  %v2747_v7 = vadd.f32 %v6302_v32, %v2202_v57  ;;  %v2851_v51 = vadd.f32 %v2850_v49, %v2306_v28  ;;  %v6760_v32 = vld [vmem:[#allocation15_spill] sm:$0xff] }
 0x27d   : > { %v3015_v10 = vmax.f32 %v2859_v45, 0.0  ;;  %v2204_v63 = vpop.f32.mrf.mxu0  ;;  %v4901_v19 = vpop.f32.mrf.mxu1  ;;  %v2330_v5 = vadd.f32 %v6249_v22, %v6760_v32 }
 0x27e   : > { %3627 = vst.msk [vmem:[%s5932_s12 + $0x164] sm:$0xf] %vm3537_vm3, %v4655_v61  ;;  %3651 = vst.msk [vmem:[%s5932_s12 + $0x1c4] sm:$0xf] %vm3537_vm3, %v4679_v6  ;;  %v2987_v24 = vmax.f32 %v2747_v7, 0.0  ;;  %v3013_v44 = vmax.f32 %v2851_v51, 0.0  ;;  %v2205_v54 = vadd.f32 %v6249_v22, %v2204_v63  ;;  %v2862_v29 = vadd.f32 %v4901_v19, %v2317_v37 }
 0x27f   : > { %v4684_v39 = vpack.c.bf16 %v3015_v10, %v3015_v10  ;;  %v2206_v13 = vpop.f32.mrf.mxu0  ;;  %v2853_v1 = vpop.f32.mrf.mxu1  ;;  %v6765_v63 = vld [vmem:[#allocation17_spill] sm:$0xff] }
 0x280   : > { %v4656_v30 = vpack.c.bf16 %v2987_v24, %v2987_v24  ;;  %v4682_v50 = vpack.c.bf16 %v3013_v44, %v3013_v44  ;;  %v2750_v4 = vadd.f32 %v6309_v47, %v2205_v54  ;;  %v3016_v56 = vmax.f32 %v2862_v29, 0.0 }
 0x281   : > { %3656 = vst.msk [vmem:[%s5932_s12 + $0x1d8] sm:$0xf] %vm3537_vm3, %v4684_v39  ;;  %v2854_v9 = vadd.f32 %v2853_v1, %v2309_v36  ;;  %v2209_v12 = vpop.f32.mrf.mxu0  ;;  %v4904_v14 = vpop.f32.mrf.mxu1  ;;  %v2338_v19 = vadd.f32 %v6249_v22, %v6765_v63  ;;  %v6767_v39 = vld [vmem:[#allocation18_spill] sm:$0xff] }
 0x282   : > { %3628 = vst.msk [vmem:[%s5932_s12 + $0x168] sm:$0xf] %vm3537_vm3, %v4656_v30  ;;  %3654 = vst.msk [vmem:[%s5932_s12 + $0x1d0] sm:$0xf] %vm3537_vm3, %v4682_v50  ;;  %v2988_v23 = vmax.f32 %v2750_v4, 0.0  ;;  %v4685_v40 = vpack.c.bf16 %v3016_v56, %v3016_v56  ;;  %v2210_v60 = vadd.f32 %v6249_v22, %v2209_v12  ;;  %v2875_v47 = vadd.f32 %v4904_v14, %v2330_v5 }
 0x283   : > { %v3014_v18 = vmax.f32 %v2854_v9, 0.0  ;;  %v2211_v55 = vpop.f32.mrf.mxu0  ;;  %v2866_v35 = vpop.f32.mrf.mxu1  ;;  %v2341_v13 = vadd.f32 %v6249_v22, %v6767_v39 }
 0x284   : > { %v4657_v20 = vpack.c.bf16 %v2988_v23, %v2988_v23  ;;  %3657 = vst.msk [vmem:[%s5932_s12 + $0x1dc] sm:$0xf] %vm3537_vm3, %v4685_v40  ;;  %v2755_v8 = vadd.f32 %v6321_v11, %v2210_v60  ;;  %v3019_v27 = vmax.f32 %v2875_v47, 0.0  ;;  %v2867_v48 = vadd.f32 %v2866_v35, %v2322_v46 }
 0x285   : > { %v4683_v17 = vpack.c.bf16 %v3014_v18, %v3014_v18  ;;  %v2212_v15 = vpop.f32.mrf.mxu0  ;;  %v4905_v28 = vpop.f32.mrf.mxu1 }
 0x286   : > { %3629 = vst.msk [vmem:[%s5932_s12 + $0x16c] sm:$0xf] %vm3537_vm3, %v4657_v20  ;;  %v2989_v26 = vmax.f32 %v2755_v8, 0.0  ;;  %v4688_v58 = vpack.c.bf16 %v3019_v27, %v3019_v27  ;;  %v3017_v31 = vmax.f32 %v2867_v48, 0.0  ;;  %v2213_v11 = vadd.f32 %v6249_v22, %v2212_v15 }
 0x287   : > { %3655 = vst.msk [vmem:[%s5932_s12 + $0x1d4] sm:$0xf] %vm3537_vm3, %v4683_v17  ;;  %v2878_v34 = vadd.f32 %v4905_v28, %v2333_v21  ;;  %v2214_v2 = vpop.f32.mrf.mxu0  ;;  %v2869_v41 = vpop.f32.mrf.mxu1 }
 0x288   : > { %v4658_v57 = vpack.c.bf16 %v2989_v26, %v2989_v26  ;;  %3660 = vst.msk [vmem:[%s5932_s12 + $0x1e8] sm:$0xf] %vm3537_vm3, %v4688_v58  ;;  %v4686_v0 = vpack.c.bf16 %v3017_v31, %v3017_v31  ;;  %v2758_v37 = vadd.f32 %v6329_v33, %v2213_v11  ;;  %v2870_v45 = vadd.f32 %v2869_v41, %v2325_v53  ;;  %v6766_v33 = vld [vmem:[#allocation20_spill] sm:$0xff] }
 0x289   : > { %v3020_v42 = vmax.f32 %v2878_v34, 0.0  ;;  %v2217_v49 = vpop.f32.mrf.mxu0  ;;  %v4908_v61 = vpop.f32.mrf.mxu1  ;;  %v2349_v24 = vadd.f32 %v6249_v22, %v6766_v33 }
 0x28a   : > { %3630 = vst.msk [vmem:[%s5932_s12 + $0x170] sm:$0xf] %vm3537_vm3, %v4658_v57  ;;  %3658 = vst.msk [vmem:[%s5932_s12 + $0x1e0] sm:$0xf] %vm3537_vm3, %v4686_v0  ;;  %v2990_v6 = vmax.f32 %v2758_v37, 0.0  ;;  %v3018_v7 = vmax.f32 %v2870_v45, 0.0  ;;  %v2218_v51 = vadd.f32 %v6249_v22, %v2217_v49  ;;  %v2891_v10 = vadd.f32 %v4908_v61, %v2346_v62 }
 0x28b   : > { %v4689_v44 = vpack.c.bf16 %v3020_v42, %v3020_v42  ;;  %v2219_v54 = vpop.f32.mrf.mxu0  ;;  %v2882_v29 = vpop.f32.mrf.mxu1 }
 0x28c   : > { %v4659_v25 = vpack.c.bf16 %v2990_v6, %v2990_v6  ;;  %v4687_v36 = vpack.c.bf16 %v3018_v7, %v3018_v7  ;;  %v2763_v32 = vadd.f32 %v6316_v16, %v2218_v51  ;;  %v3023_v5 = vmax.f32 %v2891_v10, 0.0 }
 0x28d   : > { %3661 = vst.msk [vmem:[%s5932_s12 + $0x1ec] sm:$0xf] %vm3537_vm3, %v4689_v44  ;;  %v2883_v1 = vadd.f32 %v2882_v29, %v2338_v19  ;;  %v2220_v30 = vpop.f32.mrf.mxu0  ;;  %v4909_v50 = vpop.f32.mrf.mxu1 }
 0x28e   : > { %3631 = vst.msk [vmem:[%s5932_s12 + $0x174] sm:$0xf] %vm3537_vm3, %v4659_v25  ;;  %3659 = vst.msk [vmem:[%s5932_s12 + $0x1e4] sm:$0xf] %vm3537_vm3, %v4687_v36  ;;  %v2991_v4 = vmax.f32 %v2763_v32, 0.0  ;;  %v4692_v56 = vpack.c.bf16 %v3023_v5, %v3023_v5  ;;  %v2221_v16 = vadd.f32 %v6249_v22, %v2220_v30  ;;  %v2894_v38 = vadd.f32 %v4909_v50, %v2349_v24 }
 0x28f   : > { %v3021_v46 = vmax.f32 %v2883_v1, 0.0  ;;  %v2222_v9 = vpop.f32.mrf.mxu0  ;;  %v2885_v12 = vpop.f32.mrf.mxu1 }
 0x290   : > { %v4660_v14 = vpack.c.bf16 %v2991_v4, %v2991_v4  ;;  %3664 = vst.msk [vmem:[%s5932_s12 + $0x1f8] sm:$0xf] %vm3537_vm3, %v4692_v56  ;;  %v2766_v23 = vadd.f32 %v6324_v52, %v2221_v16  ;;  %v3024_v40 = vmax.f32 %v2894_v38, 0.0  ;;  %v2886_v60 = vadd.f32 %v2885_v12, %v2341_v13 }
 0x291   : > { %v4690_v47 = vpack.c.bf16 %v3021_v46, %v3021_v46 }
 0x292   : > { %3632 = vst.msk [vmem:[%s5932_s12 + $0x178] sm:$0xf] %vm3537_vm3, %v4660_v14  ;;  %v2992_v18 = vmax.f32 %v2766_v23, 0.0  ;;  %v4693_v55 = vpack.c.bf16 %v3024_v40, %v3024_v40  ;;  %v3022_v22 = vmax.f32 %v2886_v60, 0.0  ;;  %3672 = sbr.rel (!%p5448_p4) target bundleno = 744 (0x2e8), region = 36 }
 0x293   : > { %3662 = vst.msk [vmem:[%s5932_s12 + $0x1f0] sm:$0xf] %vm3537_vm3, %v4690_v47 }
 0x294   : > { %v4661_v35 = vpack.c.bf16 %v2992_v18, %v2992_v18  ;;  %3665 = vst.msk [vmem:[%s5932_s12 + $0x1fc] sm:$0xf] %vm3537_vm3, %v4693_v55  ;;  %v4691_v20 = vpack.c.bf16 %v3022_v22, %v3022_v22 }
 0x296   : > { %3633 = vst.msk [vmem:[%s5932_s12 + $0x17c] sm:$0xf] %vm3537_vm3, %v4661_v35  ;;  %3663 = vst.msk [vmem:[%s5932_s12 + $0x1f4] sm:$0xf] %vm3537_vm3, %v4691_v20 }
 0x297   : > { %s6775_s17 = smov (!%p3675_p8, %s3674_s17), 128 }
 0x298   : > { %s4551_s25 = sshll.u32 %s6775_s17, 6 }
 0x299   : > { %p4554_p9 = scmp.eq.s32.totalorder %s4551_s25, 0 }
 0x29a   : > { %s6541_s26 = sshrl.u32 (!%p4554_p9), %s6775_s17, 6 }
 0x29b   : > { %3683 = sbr.rel (%p4554_p9) target bundleno = 744 (0x2e8), region = 40  ;;  %p4555_p10 = scmp.le.s32.totalorder (!%p4554_p9), %s6541_s26, 0 }
 0x2a0   : > { %4090 = sbr.rel (%p4555_p10) target bundleno = 727 (0x2d7), region = 112  ;;  %s6768_s15 = smov (!%p4555_p10), %s6535_s24 }
 0x2a1   : > { %s6769_s20 = smov (!%p4555_p10), %s5932_s12  ;;  %s6550_s23 = smov (!%p4555_p10), 0  }
 0x2a2   : > { %s6552_s27 = smov (!%p4555_p10), 0  }
 0x2a5 LB: >> { %v3700_v52 = vld [vmem:[%s5375_s20] sm:$0xf]  ;;  %v3702_v8 = vld [vmem:[%s5375_s20 + $0x4] sm:$0xf]  ;;  %v3704_v27 = vld [vmem:[%s5375_s20 + $0x8] sm:$0xf]  ;;  %s5383_s27 = sphi %s6552_s27, %s3694_s27   ;;  %s5379_s23 = sphi %s6550_s23, %s6770_s23   ;;  %s5375_s20 = sphi %s6769_s20, %s3833_s20   ;;  %s5371_s15 = sphi %s6768_s15, %s3834_s15  }
 0x2a6   : >> { %3701 = vst [vmem:[%s5371_s15] sm:$0xf] %v3700_v52  ;;  %3703 = vst [vmem:[%s5371_s15 + $0x4] sm:$0xf] %v3702_v8  ;;  %v3706_v48 = vld [vmem:[%s5375_s20 + $0xc] sm:$0xf]  ;;  %s3828_s28 = sadd.s32 1, %s5379_s23 }
 0x2a7   : >> { %3705 = vst [vmem:[%s5371_s15 + $0x8] sm:$0xf] %v3704_v27  ;;  %v3708_v43 = vld [vmem:[%s5375_s20 + $0x10] sm:$0xf]  ;;  %v3710_v53 = vld [vmem:[%s5375_s20 + $0x14] sm:$0xf]  ;;  %p3829_p11 = scmp.ge.s32.totalorder %s3828_s28, %s6541_s26 }
 0x2a8   : >> { %3707 = vst [vmem:[%s5371_s15 + $0xc] sm:$0xf] %v3706_v48  ;;  %3709 = vst [vmem:[%s5371_s15 + $0x10] sm:$0xf] %v3708_v43  ;;  %v3712_v59 = vld [vmem:[%s5375_s20 + $0x18] sm:$0xf] }
 0x2a9   : >> { %3711 = vst [vmem:[%s5371_s15 + $0x14] sm:$0xf] %v3710_v53  ;;  %v3714_v21 = vld [vmem:[%s5375_s20 + $0x1c] sm:$0xf]  ;;  %v3716_v17 = vld [vmem:[%s5375_s20 + $0x20] sm:$0xf] }
 0x2aa   : >> { %3713 = vst [vmem:[%s5371_s15 + $0x18] sm:$0xf] %v3712_v59  ;;  %3715 = vst [vmem:[%s5371_s15 + $0x1c] sm:$0xf] %v3714_v21  ;;  %v3718_v15 = vld [vmem:[%s5375_s20 + $0x24] sm:$0xf] }
 0x2ab   : >> { %3717 = vst [vmem:[%s5371_s15 + $0x20] sm:$0xf] %v3716_v17  ;;  %v3720_v28 = vld [vmem:[%s5375_s20 + $0x28] sm:$0xf]  ;;  %v3722_v26 = vld [vmem:[%s5375_s20 + $0x2c] sm:$0xf] }
 0x2ac   : >> { %3719 = vst [vmem:[%s5371_s15 + $0x24] sm:$0xf] %v3718_v15  ;;  %3721 = vst [vmem:[%s5371_s15 + $0x28] sm:$0xf] %v3720_v28  ;;  %v3724_v58 = vld [vmem:[%s5375_s20 + $0x30] sm:$0xf] }
 0x2ad   : >> { %3723 = vst [vmem:[%s5371_s15 + $0x2c] sm:$0xf] %v3722_v26  ;;  %v3726_v31 = vld [vmem:[%s5375_s20 + $0x34] sm:$0xf]  ;;  %v3728_v11 = vld [vmem:[%s5375_s20 + $0x38] sm:$0xf] }
 0x2ae   : >> { %3725 = vst [vmem:[%s5371_s15 + $0x30] sm:$0xf] %v3724_v58  ;;  %3727 = vst [vmem:[%s5371_s15 + $0x34] sm:$0xf] %v3726_v31  ;;  %v3730_v3 = vld [vmem:[%s5375_s20 + $0x3c] sm:$0xf] }
 0x2af   : >> { %3729 = vst [vmem:[%s5371_s15 + $0x38] sm:$0xf] %v3728_v11  ;;  %v3732_v62 = vld [vmem:[%s5375_s20 + $0x40] sm:$0xf]  ;;  %v3734_v34 = vld [vmem:[%s5375_s20 + $0x44] sm:$0xf] }
 0x2b0   : >> { %3731 = vst [vmem:[%s5371_s15 + $0x3c] sm:$0xf] %v3730_v3  ;;  %3733 = vst [vmem:[%s5371_s15 + $0x40] sm:$0xf] %v3732_v62  ;;  %v3736_v2 = vld [vmem:[%s5375_s20 + $0x48] sm:$0xf] }
 0x2b1   : >> { %3735 = vst [vmem:[%s5371_s15 + $0x44] sm:$0xf] %v3734_v34  ;;  %v3738_v41 = vld [vmem:[%s5375_s20 + $0x4c] sm:$0xf]  ;;  %v3740_v57 = vld [vmem:[%s5375_s20 + $0x50] sm:$0xf] }
 0x2b2   : >> { %3737 = vst [vmem:[%s5371_s15 + $0x48] sm:$0xf] %v3736_v2  ;;  %3739 = vst [vmem:[%s5371_s15 + $0x4c] sm:$0xf] %v3738_v41  ;;  %v3742_v0 = vld [vmem:[%s5375_s20 + $0x54] sm:$0xf] }
 0x2b3   : >> { %3741 = vst [vmem:[%s5371_s15 + $0x50] sm:$0xf] %v3740_v57  ;;  %v3744_v37 = vld [vmem:[%s5375_s20 + $0x58] sm:$0xf]  ;;  %v3746_v45 = vld [vmem:[%s5375_s20 + $0x5c] sm:$0xf] }
 0x2b4   : >> { %3743 = vst [vmem:[%s5371_s15 + $0x54] sm:$0xf] %v3742_v0  ;;  %3745 = vst [vmem:[%s5371_s15 + $0x58] sm:$0xf] %v3744_v37  ;;  %v3748_v42 = vld [vmem:[%s5375_s20 + $0x60] sm:$0xf] }
 0x2b5   : >> { %3747 = vst [vmem:[%s5371_s15 + $0x5c] sm:$0xf] %v3746_v45  ;;  %v3750_v49 = vld [vmem:[%s5375_s20 + $0x64] sm:$0xf]  ;;  %v3752_v61 = vld [vmem:[%s5375_s20 + $0x68] sm:$0xf] }
 0x2b6   : >> { %3749 = vst [vmem:[%s5371_s15 + $0x60] sm:$0xf] %v3748_v42  ;;  %3751 = vst [vmem:[%s5371_s15 + $0x64] sm:$0xf] %v3750_v49  ;;  %v3754_v6 = vld [vmem:[%s5375_s20 + $0x6c] sm:$0xf] }
 0x2b7   : >> { %3753 = vst [vmem:[%s5371_s15 + $0x68] sm:$0xf] %v3752_v61  ;;  %v3756_v7 = vld [vmem:[%s5375_s20 + $0x70] sm:$0xf]  ;;  %v3758_v51 = vld [vmem:[%s5375_s20 + $0x74] sm:$0xf] }
 0x2b8   : >> { %3755 = vst [vmem:[%s5371_s15 + $0x6c] sm:$0xf] %v3754_v6  ;;  %3757 = vst [vmem:[%s5371_s15 + $0x70] sm:$0xf] %v3756_v7  ;;  %v3760_v10 = vld [vmem:[%s5375_s20 + $0x78] sm:$0xf] }
 0x2b9   : >> { %3759 = vst [vmem:[%s5371_s15 + $0x74] sm:$0xf] %v3758_v51  ;;  %v3762_v63 = vld [vmem:[%s5375_s20 + $0x7c] sm:$0xf]  ;;  %v3764_v19 = vld [vmem:[%s5375_s20 + $0x80] sm:$0xf] }
 0x2ba   : >> { %3761 = vst [vmem:[%s5371_s15 + $0x78] sm:$0xf] %v3760_v10  ;;  %3763 = vst [vmem:[%s5371_s15 + $0x7c] sm:$0xf] %v3762_v63  ;;  %v3766_v33 = vld [vmem:[%s5375_s20 + $0x84] sm:$0xf] }
 0x2bb   : >> { %3765 = vst [vmem:[%s5371_s15 + $0x80] sm:$0xf] %v3764_v19  ;;  %v3768_v24 = vld [vmem:[%s5375_s20 + $0x88] sm:$0xf]  ;;  %v3770_v44 = vld [vmem:[%s5375_s20 + $0x8c] sm:$0xf] }
 0x2bc   : >> { %3767 = vst [vmem:[%s5371_s15 + $0x84] sm:$0xf] %v3766_v33  ;;  %3769 = vst [vmem:[%s5371_s15 + $0x88] sm:$0xf] %v3768_v24  ;;  %v3772_v54 = vld [vmem:[%s5375_s20 + $0x90] sm:$0xf] }
 0x2bd   : >> { %3771 = vst [vmem:[%s5371_s15 + $0x8c] sm:$0xf] %v3770_v44  ;;  %v3774_v29 = vld [vmem:[%s5375_s20 + $0x94] sm:$0xf]  ;;  %v3776_v25 = vld [vmem:[%s5375_s20 + $0x98] sm:$0xf] }
 0x2be   : >> { %3773 = vst [vmem:[%s5371_s15 + $0x90] sm:$0xf] %v3772_v54  ;;  %3775 = vst [vmem:[%s5371_s15 + $0x94] sm:$0xf] %v3774_v29  ;;  %v3778_v36 = vld [vmem:[%s5375_s20 + $0x9c] sm:$0xf] }
 0x2bf   : >> { %3777 = vst [vmem:[%s5371_s15 + $0x98] sm:$0xf] %v3776_v25  ;;  %v3780_v32 = vld [vmem:[%s5375_s20 + $0xa0] sm:$0xf]  ;;  %v3782_v5 = vld [vmem:[%s5375_s20 + $0xa4] sm:$0xf] }
 0x2c0   : >> { %3779 = vst [vmem:[%s5371_s15 + $0x9c] sm:$0xf] %v3778_v36  ;;  %3781 = vst [vmem:[%s5371_s15 + $0xa0] sm:$0xf] %v3780_v32  ;;  %v3784_v39 = vld [vmem:[%s5375_s20 + $0xa8] sm:$0xf] }
 0x2c1   : >> { %3783 = vst [vmem:[%s5371_s15 + $0xa4] sm:$0xf] %v3782_v5  ;;  %v3786_v13 = vld [vmem:[%s5375_s20 + $0xac] sm:$0xf]  ;;  %v3788_v1 = vld [vmem:[%s5375_s20 + $0xb0] sm:$0xf] }
 0x2c2   : >> { %3785 = vst [vmem:[%s5371_s15 + $0xa8] sm:$0xf] %v3784_v39  ;;  %3787 = vst [vmem:[%s5371_s15 + $0xac] sm:$0xf] %v3786_v13  ;;  %v3790_v30 = vld [vmem:[%s5375_s20 + $0xb4] sm:$0xf] }
 0x2c3   : >> { %3789 = vst [vmem:[%s5371_s15 + $0xb0] sm:$0xf] %v3788_v1  ;;  %v3792_v50 = vld [vmem:[%s5375_s20 + $0xb8] sm:$0xf]  ;;  %v3794_v4 = vld [vmem:[%s5375_s20 + $0xbc] sm:$0xf] }
 0x2c4   : >> { %3791 = vst [vmem:[%s5371_s15 + $0xb4] sm:$0xf] %v3790_v30  ;;  %3793 = vst [vmem:[%s5371_s15 + $0xb8] sm:$0xf] %v3792_v50  ;;  %v3796_v56 = vld [vmem:[%s5375_s20 + $0xc0] sm:$0xf] }
 0x2c5   : >> { %3795 = vst [vmem:[%s5371_s15 + $0xbc] sm:$0xf] %v3794_v4  ;;  %v3798_v16 = vld [vmem:[%s5375_s20 + $0xc4] sm:$0xf]  ;;  %v3800_v38 = vld [vmem:[%s5375_s20 + $0xc8] sm:$0xf] }
 0x2c6   : >> { %3797 = vst [vmem:[%s5371_s15 + $0xc0] sm:$0xf] %v3796_v56  ;;  %3799 = vst [vmem:[%s5371_s15 + $0xc4] sm:$0xf] %v3798_v16  ;;  %v3802_v46 = vld [vmem:[%s5375_s20 + $0xcc] sm:$0xf] }
 0x2c7   : >> { %3801 = vst [vmem:[%s5371_s15 + $0xc8] sm:$0xf] %v3800_v38  ;;  %v3804_v9 = vld [vmem:[%s5375_s20 + $0xd0] sm:$0xf]  ;;  %v3806_v12 = vld [vmem:[%s5375_s20 + $0xd4] sm:$0xf] }
 0x2c8   : >> { %3803 = vst [vmem:[%s5371_s15 + $0xcc] sm:$0xf] %v3802_v46  ;;  %3805 = vst [vmem:[%s5371_s15 + $0xd0] sm:$0xf] %v3804_v9  ;;  %v3808_v14 = vld [vmem:[%s5375_s20 + $0xd8] sm:$0xf] }
 0x2c9   : >> { %3807 = vst [vmem:[%s5371_s15 + $0xd4] sm:$0xf] %v3806_v12  ;;  %v3810_v23 = vld [vmem:[%s5375_s20 + $0xdc] sm:$0xf]  ;;  %v3812_v40 = vld [vmem:[%s5375_s20 + $0xe0] sm:$0xf] }
 0x2ca   : >> { %3809 = vst [vmem:[%s5371_s15 + $0xd8] sm:$0xf] %v3808_v14  ;;  %3811 = vst [vmem:[%s5371_s15 + $0xdc] sm:$0xf] %v3810_v23  ;;  %v3814_v60 = vld [vmem:[%s5375_s20 + $0xe4] sm:$0xf] }
 0x2cb   : >> { %3813 = vst [vmem:[%s5371_s15 + $0xe0] sm:$0xf] %v3812_v40  ;;  %v3816_v47 = vld [vmem:[%s5375_s20 + $0xe8] sm:$0xf]  ;;  %v3818_v18 = vld [vmem:[%s5375_s20 + $0xec] sm:$0xf] }
 0x2cc   : >> { %3815 = vst [vmem:[%s5371_s15 + $0xe4] sm:$0xf] %v3814_v60  ;;  %3817 = vst [vmem:[%s5371_s15 + $0xe8] sm:$0xf] %v3816_v47  ;;  %v3820_v55 = vld [vmem:[%s5375_s20 + $0xf0] sm:$0xf] }
 0x2cd   : >> { %3819 = vst [vmem:[%s5371_s15 + $0xec] sm:$0xf] %v3818_v18  ;;  %v3822_v22 = vld [vmem:[%s5375_s20 + $0xf4] sm:$0xf]  ;;  %v3824_v35 = vld [vmem:[%s5375_s20 + $0xf8] sm:$0xf] }
 0x2ce   : >> { %3821 = vst [vmem:[%s5371_s15 + $0xf0] sm:$0xf] %v3820_v55  ;;  %3823 = vst [vmem:[%s5371_s15 + $0xf4] sm:$0xf] %v3822_v22  ;;  %v3826_v20 = vld [vmem:[%s5375_s20 + $0xfc] sm:$0xf] }
 0x2cf   : >> { %3825 = vst [vmem:[%s5371_s15 + $0xf8] sm:$0xf] %v3824_v35  ;;  %3827 = vst [vmem:[%s5371_s15 + $0xfc] sm:$0xf] %v3826_v20  ;;  %s6777_s28 = smov (%p3829_p11, %s3828_s28), 0  ;;  %s3694_s27 = sadd.s32 1, %s5383_s27  }
 0x2d0   : >> { %s4556_s29 = sshll.u32 %s6777_s28, 8  ;;  %p3693_p12 = scmp.ge.s32.totalorder %s3694_s27, %s6541_s26 }
 0x2d1   : >> { %s3833_s20 = scalar_lea.vmem %s5932_s12, %s4556_s29 [#allocation2]   ;;  %s3834_s15 = scalar_lea.vmem %s6535_s24, %s4556_s29  }
 0x2d2   : >> { %s6770_s23 = smov %s6777_s28  ;;  %3696 = sbr.rel (!%p3693_p12) target bundleno = 677 (0x2a5), region = 118 }
 0x2d7 PF: > { %s6709_s30 = sand.u32 63, %s6775_s17   ;;  %s4695_s4 = sshll.u32 %s6541_s26, 8 }
 0x2d8   : > { %s3839_s5 = scalar_lea.vmem %s5932_s12, %s4695_s4 [#allocation2]   ;;  %s3841_s6 = scalar_lea.vmem %s6535_s24, %s4695_s4  }
 0x2d9   : > { %p4561_p13 = scmp.le.s32.totalorder %s6709_s30, 0 }
 0x2da   : > { %s5385_s7 = smov (!%p4561_p13), %s3841_s6   ;;  %s5389_s8 = smov (!%p4561_p13), %s3839_s5  }
 0x2db   : > { %4104 = sbr.rel (%p4561_p13) target bundleno = 744 (0x2e8), region = 123  ;;  %s5393_s10 = smov (!%p4561_p13), 0  }
 0x2dc   : > { %s5397_s11 = smov (!%p4561_p13), 0  }
 0x2e0 LB: >> { %v3851_v52 = vld [vmem:[%s5391_s8] sm:$0xf]  ;;  %s3853_s9 = sadd.s32 1, %s5395_s10  ;;  %s3845_s11 = sadd.s32 1, %s5399_s11   ;;  %s5399_s11 = sphi %s5397_s11, %s3845_s11   ;;  %s5395_s10 = sphi %s5393_s10, %s5394_s10   ;;  %s5391_s8 = sphi %s5389_s8, %s3858_s8   ;;  %s5387_s7 = sphi %s5385_s7, %s3859_s7  }
 0x2e1   : >> { %3852 = vst [vmem:[%s5387_s7] sm:$0xf] %v3851_v52  ;;  %p3854_p0 = scmp.ge.s32.totalorder %s3853_s9, %s6709_s30  ;;  %p3844_p1 = scmp.ge.s32.totalorder %s3845_s11, %s6709_s30 }
 0x2e3   : >> { %s6779_s9 = smov (%p3854_p0, %s3853_s9), 0  ;;  %3847 = sbr.rel (!%p3844_p1) target bundleno = 736 (0x2e0), region = 129 }
 0x2e4   : >> { %s4562_s12 = sshll.u32 %s6779_s9, 2  ;;  %s5394_s10 = smov %s6779_s9  }
 0x2e5   : >> { %s3858_s8 = scalar_lea.vmem %s3839_s5, %s4562_s12 [#allocation2]   ;;  %s3859_s7 = scalar_lea.vmem %s3841_s6, %s4562_s12  }
 0x2e8 PF: > { %p10_p2 = scmp.ge.s32.totalorder %s5438_s16, 8   ;;  %s6771_s12 = smov %s5363_s13 }
 0x2e9   : > { %s6772_s13 = smov %s5446_s19  ;;  %s6773_s14 = smov %s5438_s16 }
 0x2ea   :  { %12 = sbr.rel (!%p10_p2) target bundleno = 2 (0x2), region = 140 }

// kernel: forward.7
= control target key start
LH: loop header
LB: loop body
LE: loop exit
PB: predicated region body
PF: predicated region fallthrough
CT: control target
= control target key end

     0   :  { %s3117_s12 = smov 0   ;;  %s3119_s13 = smov 0   ;;  %s3839_s0 = inlined_call_operand.vmem [shape: bf16[1458,200], index: 0, kind: input, shape index: {}]   ;;  %s3840_s1 = inlined_call_operand.vmem [shape: bf16[200,16], index: 1, kind: input, shape index: {}]   ;;  %s3841_s2 = inlined_call_operand.vmem [shape: f32[1,16], index: 2, kind: input, shape index: {}]   ;;  %s3842_s3 = inlined_call_operand.vmem [shape: bf16[1458,16], index: 3, kind: output, shape index: {}]  }
   0x1   :  { %s3121_s14 = smov 0  }
   0x2 LB: > { %s3130_s15 = sadd.s32 4294967295, %s3062_s14   ;;  %s3132_s16 = sadd.s32 1, %s3062_s14   ;;  %s3062_s14 = sphi %s3121_s14, %s3849_s14   ;;  %s3058_s13 = sphi %s3119_s13, %s3848_s13   ;;  %s3054_s12 = sphi %s3117_s12, %s3847_s12  }
   0x3   : > { %s85_s17 = ssub.s32 %s3062_s14, %s3132_s16  ;;  %s88_s18 = sadd.s32 1, %s3058_s13 }
   0x4   : > { %p86_p0 = scmp.eq.s32.totalorder %s85_s17, 0  ;;  %p98_p1 = scmp.ne.s32.totalorder %s3058_s13, %s3054_s12 }
   0x5   : > { %p99_p2 = scmp.eq.s32.totalorder %s3130_s15, 1  ;;  %p2382_p3 = scmp.ge.s32.totalorder %s3062_s14, 1 }
   0x6   : > { %s3140_s19 = scalar_select %p86_p0, %s3058_s13, %s88_s18  }
   0x7   : > { %p3142_p4 = por %p99_p2, %p98_p1  ;;  %p149_p5 = scmp.lt.s32.totalorder %s3062_s14, 3 }
   0x9   : > { %p150_p6 = pnand %p2382_p3, %p149_p5 }
   0xa   : > { %s3155_s25 = smul.u32 (!%p150_p6), 92, %s3130_s15  ;;  %s175_s6 = sand.u32 (!%p150_p6), 1, %s3054_s12  }
   0xb   : > { %153 = sbr.rel (%p150_p6) target bundleno = 531 (0x213), region = 32 }
   0xc   : > { %p184_p7 = scmp.lt.s32.totalorder (!%p150_p6), %s3155_s25, 182  ;;  %s2766_s10 = smul.u32 (!%p150_p6), 368, %s175_s6 }
   0xe   : > { %s3369_s12 = scalar_lea.vmem (!%p150_p6), [#allocation2], %s2766_s10  }
  0x10   : > { %v2856_v0 = vld [vmem:[%s3840_s1 + $0x38] sm:$0xff]   ;;  %v3096_v1 = vmov 0   ;;  %v2857_v2 = vld [vmem:[%s3840_s1 + $0x30] sm:$0xff]   ;;  %v2858_v3 = vld [vmem:[%s3840_s1 + $0x28] sm:$0xff]   ;;  %s185_s28 = scalar_select %p184_p7, %s3155_s25, 182  ;;  %vm814_vm0 = vcmask 588800  }
  0x11   : > { %957 = vmatprep.subr.bf16.mxu0 %v3096_v1  ;;  %2740 = vmatprep.subr.bf16.mxu1 %v3096_v1  ;;  %v2859_v4 = vld [vmem:[%s3840_s1 + $0x20] sm:$0xff]   ;;  %v2860_v6 = vld [vmem:[%s3840_s1 + $0x18] sm:$0xff]   ;;  %v2861_v8 = vld [vmem:[%s3840_s1 + $0x10] sm:$0xff]   ;;  %vm953_vm1 = vcmask 1043456   ;;  %vm1818_vm2 = vcmask 125952   ;;  %s1919_s14 = ssub.s32 (%p3142_p4), 183, %s3155_s25 }
  0x12   : > { %958 = vmatpush1.bf16.msra.mxu0 %v2856_v0  ;;  %2753 = vmatpush1.bf16.msra.mxu1 %v2856_v0  ;;  %s2644_s29 = sshll.u32 %s185_s28, 3  ;;  %v2862_v9 = vld [vmem:[%s3840_s1 + $0x8] sm:$0xff]   ;;  %v2863_v10 = vld [vmem:[%s3840_s1] sm:$0xff]   ;;  %v2865_v13 = vld [vmem:[%s3840_s1 + $0x58] sm:$0xff]   ;;  %s2737_s17 = smul.u32 (%p3142_p4), 368, %s3130_s15 }
  0x13   : > { %959 = vmatprep.subr.bf16.mxu0 %v3096_v1  ;;  %2741 = vmatprep.subr.bf16.mxu1 %v3096_v1  ;;  %s3172_s7 = scalar_lea.vmem %s3839_s0, %s2644_s29  ;;  %v2864_v11 = vld [vmem:[%s3840_s1 + $0x60] ss:$0 sps:$4 sm:$0xff]   ;;  %v2866_v14 = vld [vmem:[%s3840_s1 + $0x50] sm:$0xff]   ;;  %v2867_v15 = vld [vmem:[%s3840_s1 + $0x48] sm:$0xff]   ;;  %p1920_p8 = scmp.lt.s32.totalorder (%p3142_p4), %s1919_s14, 92 }
  0x14   : > { %v2871_v5 = vld [vmem:[%s3172_s7 + $0x4] ss:$8 sps:$4 sm:$0xff]   ;;  %v2874_v7 = vld [vmem:[%s3172_s7 + $0x174] ss:$8 sps:$4 sm:$0xff]   ;;  %v955_v12 = vsel %vm953_vm1, %v2864_v11, 0  ;;  %s3647_s22 = scalar_lea.vmem (%p3142_p4), %s3842_s3, %s2737_s17  }
  0x15   : > { %2491 = vmatprep.mubr.msk.bf16.mxu0 %vm814_vm0, %v2871_v5  ;;  %2514 = vmatprep.mubr.msk.bf16.mxu1 %vm814_vm0, %v2874_v7  ;;  %v2868_v16 = vld [vmem:[%s3840_s1 + $0x40] sm:$0xff]   ;;  %v2872_v18 = vld [vmem:[%s3172_s7 + $0x170] ss:$8 sps:$4 sm:$0xff]   ;;  %v2875_v19 = vld [vmem:[%s3172_s7 + $0x14] ss:$8 sps:$4 sm:$0xff]  }
  0x16   : > { %960 = vmatpush1.bf16.msra.mxu0 %v2857_v2  ;;  %2754 = vmatpush1.bf16.msra.mxu1 %v2857_v2  ;;  %v2869_v17 = vld [vmem:[%s3172_s7] ss:$8 sps:$4 sm:$0xff]   ;;  %v2877_v20 = vld [vmem:[%s3172_s7 + $0x184] ss:$8 sps:$4 sm:$0xff]   ;;  %v2879_v21 = vld [vmem:[%s3172_s7 + $0x10] ss:$8 sps:$4 sm:$0xff]  }
  0x17   : > { %961 = vmatprep.subr.bf16.mxu0 %v3096_v1  ;;  %2742 = vmatprep.subr.bf16.mxu1 %v3096_v1  ;;  %v2880_v22 = vld [vmem:[%s3172_s7 + $0x180] ss:$8 sps:$4 sm:$0xff]   ;;  %v2881_v23 = vld [vmem:[%s3172_s7 + $0x24] ss:$8 sps:$4 sm:$0xff]   ;;  %v2883_v24 = vld [vmem:[%s3172_s7 + $0x194] ss:$8 sps:$4 sm:$0xff]  }
  0x18   : > { %v2885_v25 = vld [vmem:[%s3172_s7 + $0x20] ss:$8 sps:$4 sm:$0xff]   ;;  %v2886_v26 = vld [vmem:[%s3172_s7 + $0x190] ss:$8 sps:$4 sm:$0xff]   ;;  %v2887_v27 = vld [vmem:[%s3172_s7 + $0x34] ss:$8 sps:$4 sm:$0xff]  }
  0x19   : > { %v2889_v28 = vld [vmem:[%s3172_s7 + $0x1a4] ss:$8 sps:$4 sm:$0xff]   ;;  %v2891_v29 = vld [vmem:[%s3172_s7 + $0x30] ss:$8 sps:$4 sm:$0xff]   ;;  %v2892_v30 = vld [vmem:[%s3172_s7 + $0x1a0] ss:$8 sps:$4 sm:$0xff]  }
  0x1a   : > { %962 = vmatpush1.bf16.msra.mxu0 %v2858_v3  ;;  %2755 = vmatpush1.bf16.msra.mxu1 %v2858_v3  ;;  %v2893_v31 = vld [vmem:[%s3172_s7 + $0x44] ss:$8 sps:$4 sm:$0xff]   ;;  %v2895_v32 = vld [vmem:[%s3172_s7 + $0x1b4] ss:$8 sps:$4 sm:$0xff]   ;;  %v2897_v33 = vld [vmem:[%s3172_s7 + $0x40] ss:$8 sps:$4 sm:$0xff]  }
  0x1b   : > { %963 = vmatprep.subr.bf16.mxu0 %v3096_v1  ;;  %2743 = vmatprep.subr.bf16.mxu1 %v3096_v1  ;;  %v2898_v34 = vld [vmem:[%s3172_s7 + $0x1b0] ss:$8 sps:$4 sm:$0xff]   ;;  %v2899_v35 = vld [vmem:[%s3172_s7 + $0x54] ss:$8 sps:$4 sm:$0xff]   ;;  %v2901_v36 = vld [vmem:[%s3172_s7 + $0x1c4] ss:$8 sps:$4 sm:$0xff]  }
  0x1c   : > { %v2903_v37 = vld [vmem:[%s3172_s7 + $0x50] ss:$8 sps:$4 sm:$0xff]   ;;  %v2904_v38 = vld [vmem:[%s3172_s7 + $0x1c0] ss:$8 sps:$4 sm:$0xff]   ;;  %v2905_v39 = vld [vmem:[%s3172_s7 + $0x64] ss:$8 sps:$4 sm:$0xff]  }
  0x1d   : > { %v2907_v40 = vld [vmem:[%s3172_s7 + $0x1d4] ss:$8 sps:$4 sm:$0xff]   ;;  %v2909_v41 = vld [vmem:[%s3172_s7 + $0x60] ss:$8 sps:$4 sm:$0xff]   ;;  %v2910_v42 = vld [vmem:[%s3172_s7 + $0x1d0] ss:$8 sps:$4 sm:$0xff]  }
  0x1e   : > { %964 = vmatpush1.bf16.msra.mxu0 %v2859_v4  ;;  %2756 = vmatpush1.bf16.msra.mxu1 %v2859_v4  ;;  %v2911_v43 = vld [vmem:[%s3172_s7 + $0x74] ss:$8 sps:$4 sm:$0xff]   ;;  %v2913_v44 = vld [vmem:[%s3172_s7 + $0x1e4] ss:$8 sps:$4 sm:$0xff]   ;;  %v2915_v45 = vld [vmem:[%s3172_s7 + $0x70] ss:$8 sps:$4 sm:$0xff]  }
  0x1f   : > { %965 = vmatprep.subr.bf16.mxu0 %v3096_v1  ;;  %2744 = vmatprep.subr.bf16.mxu1 %v3096_v1  ;;  %v2916_v46 = vld [vmem:[%s3172_s7 + $0x1e0] ss:$8 sps:$4 sm:$0xff]   ;;  %v2917_v47 = vld [vmem:[%s3172_s7 + $0x84] ss:$8 sps:$4 sm:$0xff]   ;;  %v2919_v48 = vld [vmem:[%s3172_s7 + $0x1f4] ss:$8 sps:$4 sm:$0xff]  }
  0x20   : > { %v2921_v49 = vld [vmem:[%s3172_s7 + $0x80] ss:$8 sps:$4 sm:$0xff]   ;;  %v2922_v50 = vld [vmem:[%s3172_s7 + $0x1f0] ss:$8 sps:$4 sm:$0xff]   ;;  %v2923_v51 = vld [vmem:[%s3172_s7 + $0x94] ss:$8 sps:$4 sm:$0xff]  }
  0x21   : > { %v2925_v52 = vld [vmem:[%s3172_s7 + $0x204] ss:$8 sps:$4 sm:$0xff]   ;;  %v2927_v53 = vld [vmem:[%s3172_s7 + $0x90] ss:$8 sps:$4 sm:$0xff]   ;;  %v2928_v54 = vld [vmem:[%s3172_s7 + $0x200] ss:$8 sps:$4 sm:$0xff]  }
  0x22   : > { %966 = vmatpush1.bf16.msra.mxu0 %v2860_v6  ;;  %2757 = vmatpush1.bf16.msra.mxu1 %v2860_v6  ;;  %v2929_v55 = vld [vmem:[%s3172_s7 + $0xa4] ss:$8 sps:$4 sm:$0xff]   ;;  %v2931_v56 = vld [vmem:[%s3172_s7 + $0x214] ss:$8 sps:$4 sm:$0xff]   ;;  %v2933_v57 = vld [vmem:[%s3172_s7 + $0xa0] ss:$8 sps:$4 sm:$0xff]  }
  0x23   : > { %967 = vmatprep.subr.bf16.mxu0 %v3096_v1  ;;  %2745 = vmatprep.subr.bf16.mxu1 %v3096_v1  ;;  %v2934_v58 = vld [vmem:[%s3172_s7 + $0x210] ss:$8 sps:$4 sm:$0xff]   ;;  %v2935_v59 = vld [vmem:[%s3172_s7 + $0xb4] ss:$8 sps:$4 sm:$0xff]   ;;  %v2937_v60 = vld [vmem:[%s3172_s7 + $0x224] ss:$8 sps:$4 sm:$0xff]  }
  0x24   : > { %v2939_v61 = vld [vmem:[%s3172_s7 + $0xb0] ss:$8 sps:$4 sm:$0xff]   ;;  %v2940_v62 = vld [vmem:[%s3172_s7 + $0x220] ss:$8 sps:$4 sm:$0xff]   ;;  %v2941_v63 = vld [vmem:[%s3172_s7 + $0xc4] ss:$8 sps:$4 sm:$0xff]  }
  0x25   : > { %v2943_v0 = vld [vmem:[%s3172_s7 + $0x234] ss:$8 sps:$4 sm:$0xff]   ;;  %v2946_v2 = vld [vmem:[%s3172_s7 + $0x230] ss:$8 sps:$4 sm:$0xff]   ;;  %v2949_v4 = vld [vmem:[%s3172_s7 + $0x244] ss:$8 sps:$4 sm:$0xff]  }
  0x26   : > { %968 = vmatpush1.bf16.msra.mxu0 %v2861_v8  ;;  %2758 = vmatpush1.bf16.msra.mxu1 %v2861_v8  ;;  %v2947_v3 = vld [vmem:[%s3172_s7 + $0xd4] ss:$8 sps:$4 sm:$0xff]   ;;  %v2951_v5 = vld [vmem:[%s3172_s7 + $0xd0] ss:$8 sps:$4 sm:$0xff]   ;;  %v2952_v6 = vld [vmem:[%s3172_s7 + $0x240] ss:$8 sps:$4 sm:$0xff]  }
  0x27   : > { %969 = vmatprep.subr.bf16.mxu0 %v3096_v1  ;;  %2746 = vmatprep.subr.bf16.mxu1 %v3096_v1  ;;  %v2953_v7 = vld [vmem:[%s3172_s7 + $0xe4] ss:$8 sps:$4 sm:$0xff]   ;;  %v2955_v8 = vld [vmem:[%s3172_s7 + $0x254] ss:$8 sps:$4 sm:$0xff]  }
  0x28   : > { %v2959_v11 = vld [vmem:[%s3172_s7 + $0xf4] ss:$8 sps:$4 sm:$0xff]  }
  0x2a   : > { %970 = vmatpush1.bf16.msra.mxu0 %v2862_v9  ;;  %2759 = vmatpush1.bf16.msra.mxu1 %v2862_v9  ;;  %v2957_v9 = vld [vmem:[%s3172_s7 + $0xe0] ss:$8 sps:$4 sm:$0xff]  }
  0x2b   : > { %971 = vmatprep.subr.bf16.mxu0 %v3096_v1  ;;  %2747 = vmatprep.subr.bf16.mxu1 %v3096_v1 }
  0x2e   : > { %972 = vmatpush1.bf16.msra.mxu0 %v2863_v10  ;;  %2760 = vmatpush1.bf16.msra.mxu1 %v2863_v10  ;;  %v2958_v10 = vld [vmem:[%s3172_s7 + $0x250] ss:$8 sps:$4 sm:$0xff]  }
  0x2f   : > { %979 = vmatprep.subr.bf16.mxu0 %v3096_v1  ;;  %2748 = vmatprep.subr.bf16.mxu1 %v3096_v1 }
  0x32   : > { %980 = vmatpush2.bf16.msra.mxu0 %v955_v12  ;;  %2761 = vmatpush2.bf16.msra.mxu1 %v955_v12  ;;  %v2961_v12 = vld [vmem:[%s3172_s7 + $0x264] ss:$8 sps:$4 sm:$0xff]  }
  0x33   : > { %981 = vmatprep.subr.bf16.mxu0 %v3096_v1  ;;  %2749 = vmatprep.subr.bf16.mxu1 %v3096_v1 }
  0x36   : > { %982 = vmatpush2.bf16.msra.mxu0 %v2865_v13  ;;  %2762 = vmatpush2.bf16.msra.mxu1 %v2865_v13  ;;  %v2963_v13 = vld [vmem:[%s3172_s7 + $0xf0] ss:$8 sps:$4 sm:$0xff]  }
  0x37   : > { %983 = vmatprep.subr.bf16.mxu0 %v3096_v1  ;;  %2750 = vmatprep.subr.bf16.mxu1 %v3096_v1 }
  0x3a   : > { %984 = vmatpush2.bf16.msra.mxu0 %v2866_v14  ;;  %2763 = vmatpush2.bf16.msra.mxu1 %v2866_v14  ;;  %v2964_v14 = vld [vmem:[%s3172_s7 + $0x260] ss:$8 sps:$4 sm:$0xff]  }
  0x3b   : > { %985 = vmatprep.subr.bf16.mxu0 %v3096_v1  ;;  %2751 = vmatprep.subr.bf16.mxu1 %v3096_v1 }
  0x3e   : > { %986 = vmatpush2.bf16.msra.mxu0 %v2867_v15  ;;  %2764 = vmatpush2.bf16.msra.mxu1 %v2867_v15  ;;  %v2965_v15 = vld [vmem:[%s3172_s7 + $0x104] ss:$8 sps:$4 sm:$0xff]  }
  0x3f   : > { %987 = vmatprep.subr.bf16.mxu0 %v3096_v1  ;;  %2752 = vmatprep.subr.bf16.mxu1 %v3096_v1  ;;  %v2945_v1 = vld [vmem:[%s3172_s7 + $0xc0] ss:$8 sps:$4 sm:$0xff]  }
  0x42   : > { %988 = vmatpush2.bf16.msra.mxu0 %v2868_v16  ;;  %2765 = vmatpush2.bf16.msra.mxu1 %v2868_v16  ;;  %v2967_v16 = vld [vmem:[%s3172_s7 + $0x274] ss:$8 sps:$4 sm:$0xff]  }
  0x45   : > { %990 = vmatmul.mubr.bf16.vlgmr.msra.gmra.mxu0 %v2869_v17  ;;  %1174 = vmatmul.mubr.bf16.vlgmr.msra.gmra.mxu1 %v2872_v18  ;;  %v2969_v17 = vld [vmem:[%s3172_s7 + $0x100] ss:$8 sps:$4 sm:$0xff]   ;;  %v2970_v18 = vld [vmem:[%s3172_s7 + $0x270] ss:$8 sps:$4 sm:$0xff]  }
  0x46   : > { %2492 = vmatprep.mubr.msk.bf16.mxu0 %vm814_vm0, %v2875_v19  ;;  %2515 = vmatprep.mubr.msk.bf16.mxu1 %vm814_vm0, %v2877_v20  ;;  %v2971_v19 = vld [vmem:[%s3172_s7 + $0x114] ss:$8 sps:$4 sm:$0xff]   ;;  %v2973_v20 = vld [vmem:[%s3172_s7 + $0x284] ss:$8 sps:$4 sm:$0xff]  }
  0x4d   : > { %998 = vmatmul.mubr.bf16.gmra.mxu0 %v2879_v21  ;;  %1182 = vmatmul.mubr.bf16.gmra.mxu1 %v2880_v22  ;;  %v2975_v21 = vld [vmem:[%s3172_s7 + $0x110] ss:$8 sps:$4 sm:$0xff]   ;;  %v2976_v22 = vld [vmem:[%s3172_s7 + $0x280] ss:$8 sps:$4 sm:$0xff]  }
  0x4e   : > { %2493 = vmatprep.mubr.msk.bf16.mxu0 %vm814_vm0, %v2881_v23  ;;  %2516 = vmatprep.mubr.msk.bf16.mxu1 %vm814_vm0, %v2883_v24  ;;  %v2977_v23 = vld [vmem:[%s3172_s7 + $0x124] ss:$8 sps:$4 sm:$0xff]   ;;  %v2979_v24 = vld [vmem:[%s3172_s7 + $0x294] ss:$8 sps:$4 sm:$0xff]  }
  0x55   : > { %1006 = vmatmul.mubr.bf16.gmra.mxu0 %v2885_v25  ;;  %1190 = vmatmul.mubr.bf16.gmra.mxu1 %v2886_v26  ;;  %v2981_v25 = vld [vmem:[%s3172_s7 + $0x120] ss:$8 sps:$4 sm:$0xff]   ;;  %v2982_v26 = vld [vmem:[%s3172_s7 + $0x290] ss:$8 sps:$4 sm:$0xff]  }
  0x56   : > { %2494 = vmatprep.mubr.msk.bf16.mxu0 %vm814_vm0, %v2887_v27  ;;  %2517 = vmatprep.mubr.msk.bf16.mxu1 %vm814_vm0, %v2889_v28  ;;  %v2983_v27 = vld [vmem:[%s3172_s7 + $0x134] ss:$8 sps:$4 sm:$0xff]   ;;  %v2985_v28 = vld [vmem:[%s3172_s7 + $0x2a4] ss:$8 sps:$4 sm:$0xff]  }
  0x5d   : > { %1014 = vmatmul.mubr.bf16.gmra.mxu0 %v2891_v29  ;;  %1198 = vmatmul.mubr.bf16.gmra.mxu1 %v2892_v30  ;;  %v2987_v29 = vld [vmem:[%s3172_s7 + $0x130] ss:$8 sps:$4 sm:$0xff]   ;;  %v2988_v30 = vld [vmem:[%s3172_s7 + $0x2a0] ss:$8 sps:$4 sm:$0xff]  }
  0x5e   : > { %2495 = vmatprep.mubr.msk.bf16.mxu0 %vm814_vm0, %v2893_v31  ;;  %2518 = vmatprep.mubr.msk.bf16.mxu1 %vm814_vm0, %v2895_v32  ;;  %v2989_v31 = vld [vmem:[%s3172_s7 + $0x144] ss:$8 sps:$4 sm:$0xff]   ;;  %v2991_v32 = vld [vmem:[%s3172_s7 + $0x2b4] ss:$8 sps:$4 sm:$0xff]  }
  0x65   : > { %1022 = vmatmul.mubr.bf16.gmra.mxu0 %v2897_v33  ;;  %1206 = vmatmul.mubr.bf16.gmra.mxu1 %v2898_v34  ;;  %v2993_v33 = vld [vmem:[%s3172_s7 + $0x140] ss:$8 sps:$4 sm:$0xff]   ;;  %v2994_v34 = vld [vmem:[%s3172_s7 + $0x2b0] ss:$8 sps:$4 sm:$0xff]  }
  0x66   : > { %2496 = vmatprep.mubr.msk.bf16.mxu0 %vm814_vm0, %v2899_v35  ;;  %2519 = vmatprep.mubr.msk.bf16.mxu1 %vm814_vm0, %v2901_v36  ;;  %v2995_v35 = vld [vmem:[%s3172_s7 + $0x154] ss:$8 sps:$4 sm:$0xff]   ;;  %v2997_v36 = vld [vmem:[%s3172_s7 + $0x2c4] ss:$8 sps:$4 sm:$0xff]  }
  0x6d   : > { %1030 = vmatmul.mubr.bf16.gmra.mxu0 %v2903_v37  ;;  %1214 = vmatmul.mubr.bf16.gmra.mxu1 %v2904_v38  ;;  %v2999_v37 = vld [vmem:[%s3172_s7 + $0x150] ss:$8 sps:$4 sm:$0xff]   ;;  %v3000_v38 = vld [vmem:[%s3172_s7 + $0x2c0] ss:$8 sps:$4 sm:$0xff]  }
  0x6e   : > { %2497 = vmatprep.mubr.msk.bf16.mxu0 %vm814_vm0, %v2905_v39  ;;  %2520 = vmatprep.mubr.msk.bf16.mxu1 %vm814_vm0, %v2907_v40  ;;  %v3001_v39 = vld [vmem:[%s3172_s7 + $0x164] ss:$8 sps:$4 sm:$0xff]   ;;  %v3003_v40 = vld [vmem:[%s3172_s7 + $0x2d4] ss:$8 sps:$4 sm:$0xff]  }
  0x75   : > { %1038 = vmatmul.mubr.bf16.gmra.mxu0 %v2909_v41  ;;  %1222 = vmatmul.mubr.bf16.gmra.mxu1 %v2910_v42  ;;  %v3005_v41 = vld [vmem:[%s3172_s7 + $0x160] ss:$8 sps:$4 sm:$0xff]   ;;  %v3006_v42 = vld [vmem:[%s3172_s7 + $0x2d0] ss:$8 sps:$4 sm:$0xff]  }
  0x76   : > { %2498 = vmatprep.mubr.msk.bf16.mxu0 %vm814_vm0, %v2911_v43  ;;  %2521 = vmatprep.mubr.msk.bf16.mxu1 %vm814_vm0, %v2913_v44  ;;  %v3363_v43 = vld [vmem:[%s3841_s2] ss:$0 sm:$0xff] }
  0x7d   : > { %1046 = vmatmul.mubr.bf16.gmra.mxu0 %v2915_v45  ;;  %1230 = vmatmul.mubr.bf16.gmra.mxu1 %v2916_v46 }
  0x7e   : > { %2499 = vmatprep.mubr.msk.bf16.mxu0 %vm814_vm0, %v2917_v47  ;;  %2522 = vmatprep.mubr.msk.bf16.mxu1 %vm814_vm0, %v2919_v48 }
  0x85   : > { %1054 = vmatmul.mubr.bf16.gmra.mxu0 %v2921_v49  ;;  %1238 = vmatmul.mubr.bf16.gmra.mxu1 %v2922_v50 }
  0x86   : > { %2500 = vmatprep.mubr.msk.bf16.mxu0 %vm814_vm0, %v2923_v51  ;;  %2523 = vmatprep.mubr.msk.bf16.mxu1 %vm814_vm0, %v2925_v52 }
  0x8d   : > { %1062 = vmatmul.mubr.bf16.gmra.mxu0 %v2927_v53  ;;  %1246 = vmatmul.mubr.bf16.gmra.mxu1 %v2928_v54 }
  0x8e   : > { %2501 = vmatprep.mubr.msk.bf16.mxu0 %vm814_vm0, %v2929_v55  ;;  %2524 = vmatprep.mubr.msk.bf16.mxu1 %vm814_vm0, %v2931_v56 }
  0x95   : > { %1070 = vmatmul.mubr.bf16.gmra.mxu0 %v2933_v57  ;;  %1254 = vmatmul.mubr.bf16.gmra.mxu1 %v2934_v58 }
  0x96   : > { %2502 = vmatprep.mubr.msk.bf16.mxu0 %vm814_vm0, %v2935_v59  ;;  %2525 = vmatprep.mubr.msk.bf16.mxu1 %vm814_vm0, %v2937_v60 }
  0x9d   : > { %1078 = vmatmul.mubr.bf16.gmra.mxu0 %v2939_v61  ;;  %1262 = vmatmul.mubr.bf16.gmra.mxu1 %v2940_v62 }
  0x9e   : > { %2503 = vmatprep.mubr.msk.bf16.mxu0 %vm814_vm0, %v2941_v63  ;;  %2526 = vmatprep.mubr.msk.bf16.mxu1 %vm814_vm0, %v2943_v0 }
  0xa5   : > { %1086 = vmatmul.mubr.bf16.gmra.mxu0 %v2945_v1  ;;  %1270 = vmatmul.mubr.bf16.gmra.mxu1 %v2946_v2 }
  0xa6   : > { %2504 = vmatprep.mubr.msk.bf16.mxu0 %vm814_vm0, %v2947_v3  ;;  %2527 = vmatprep.mubr.msk.bf16.mxu1 %vm814_vm0, %v2949_v4 }
  0xad   : > { %1094 = vmatmul.mubr.bf16.gmra.mxu0 %v2951_v5  ;;  %1278 = vmatmul.mubr.bf16.gmra.mxu1 %v2952_v6 }
  0xae   : > { %2505 = vmatprep.mubr.msk.bf16.mxu0 %vm814_vm0, %v2953_v7  ;;  %2528 = vmatprep.mubr.msk.bf16.mxu1 %vm814_vm0, %v2955_v8 }
  0xb5   : > { %1102 = vmatmul.mubr.bf16.gmra.mxu0 %v2957_v9  ;;  %1286 = vmatmul.mubr.bf16.gmra.mxu1 %v2958_v10 }
  0xb6   : > { %2506 = vmatprep.mubr.msk.bf16.mxu0 %vm814_vm0, %v2959_v11  ;;  %2529 = vmatprep.mubr.msk.bf16.mxu1 %vm814_vm0, %v2961_v12 }
  0xbd   : > { %1110 = vmatmul.mubr.bf16.gmra.mxu0 %v2963_v13  ;;  %1294 = vmatmul.mubr.bf16.gmra.mxu1 %v2964_v14 }
  0xbe   : > { %2507 = vmatprep.mubr.msk.bf16.mxu0 %vm814_vm0, %v2965_v15  ;;  %2530 = vmatprep.mubr.msk.bf16.mxu1 %vm814_vm0, %v2967_v16 }
  0xc5   : > { %1118 = vmatmul.mubr.bf16.gmra.mxu0 %v2969_v17  ;;  %1302 = vmatmul.mubr.bf16.gmra.mxu1 %v2970_v18 }
  0xc6   : > { %2508 = vmatprep.mubr.msk.bf16.mxu0 %vm814_vm0, %v2971_v19  ;;  %2531 = vmatprep.mubr.msk.bf16.mxu1 %vm814_vm0, %v2973_v20 }
  0xcd   : > { %1126 = vmatmul.mubr.bf16.gmra.mxu0 %v2975_v21  ;;  %1310 = vmatmul.mubr.bf16.gmra.mxu1 %v2976_v22 }
  0xce   : > { %2509 = vmatprep.mubr.msk.bf16.mxu0 %vm814_vm0, %v2977_v23  ;;  %2532 = vmatprep.mubr.msk.bf16.mxu1 %vm814_vm0, %v2979_v24 }
  0xd5   : > { %1134 = vmatmul.mubr.bf16.gmra.mxu0 %v2981_v25  ;;  %1318 = vmatmul.mubr.bf16.gmra.mxu1 %v2982_v26 }
  0xd6   : > { %2510 = vmatprep.mubr.msk.bf16.mxu0 %vm814_vm0, %v2983_v27  ;;  %2533 = vmatprep.mubr.msk.bf16.mxu1 %vm814_vm0, %v2985_v28 }
  0xdd   : > { %1142 = vmatmul.mubr.bf16.gmra.mxu0 %v2987_v29  ;;  %1326 = vmatmul.mubr.bf16.gmra.mxu1 %v2988_v30 }
  0xde   : > { %2511 = vmatprep.mubr.msk.bf16.mxu0 %vm814_vm0, %v2989_v31  ;;  %2534 = vmatprep.mubr.msk.bf16.mxu1 %vm814_vm0, %v2991_v32 }
  0xe5   : > { %1150 = vmatmul.mubr.bf16.gmra.mxu0 %v2993_v33  ;;  %1334 = vmatmul.mubr.bf16.gmra.mxu1 %v2994_v34 }
  0xe6   : > { %2512 = vmatprep.mubr.msk.bf16.mxu0 %vm814_vm0, %v2995_v35  ;;  %2535 = vmatprep.mubr.msk.bf16.mxu1 %vm814_vm0, %v2997_v36 }
  0xed   : > { %1158 = vmatmul.mubr.bf16.gmra.mxu0 %v2999_v37  ;;  %1342 = vmatmul.mubr.bf16.gmra.mxu1 %v3000_v38 }
  0xee   : > { %2513 = vmatprep.mubr.msk.bf16.mxu0 %vm814_vm0, %v3001_v39  ;;  %2536 = vmatprep.mubr.msk.bf16.mxu1 %vm814_vm0, %v3003_v40 }
  0xf5   : > { %1166 = vmatmul.mubr.bf16.gmra.mxu0 %v3005_v41  ;;  %1350 = vmatmul.mubr.bf16.gmra.mxu1 %v3006_v42 }
 0x105   : > { %v991_v44 = vpop.f32.mrf.mxu0  ;;  %v1175_v45 = vpop.f32.mrf.mxu1 }
 0x106   : > { %v992_v46 = vadd.f32 %v3363_v43, %v991_v44  ;;  %v1176_v47 = vadd.f32 %v3363_v43, %v1175_v45 }
 0x107   : > { %v993_v48 = vpop.f32.mrf.mxu0  ;;  %v1177_v49 = vpop.f32.mrf.mxu1 }
 0x108   : > { %v1358_v50 = vmax.f32 %v992_v46, 0.0  ;;  %v1404_v51 = vmax.f32 %v1176_v47, 0.0 }
 0x109   : > { %v994_v52 = vpop.f32.mrf.mxu0  ;;  %v1178_v53 = vpop.f32.mrf.mxu1 }
 0x10a   : > { %v2645_v54 = vpack.c.bf16 %v1358_v50, %v1358_v50  ;;  %v2691_v55 = vpack.c.bf16 %v1404_v51, %v1404_v51  ;;  %v995_v56 = vadd.f32 %v3363_v43, %v994_v52  ;;  %v1179_v57 = vadd.f32 %v3363_v43, %v1178_v53 }
 0x10b   : > { %v996_v58 = vpop.f32.mrf.mxu0  ;;  %v1180_v59 = vpop.f32.mrf.mxu1 }
 0x10c   : > { %1819 = vst.msk [vmem:[%s3369_s12] sm:$0xf] %vm1818_vm2, %v2645_v54  ;;  %1865 = vst.msk [vmem:[%s3369_s12 + $0xb8] sm:$0xf] %vm1818_vm2, %v2691_v55  ;;  %v1359_v60 = vmax.f32 %v995_v56, 0.0  ;;  %v1405_v61 = vmax.f32 %v1179_v57, 0.0 }
 0x10d   : > { %v999_v62 = vpop.f32.mrf.mxu0  ;;  %v1183_v63 = vpop.f32.mrf.mxu1 }
 0x10e   : > { %v2646_v0 = vpack.c.bf16 %v1359_v60, %v1359_v60  ;;  %v2692_v1 = vpack.c.bf16 %v1405_v61, %v1405_v61  ;;  %v1000_v2 = vadd.f32 %v3363_v43, %v999_v62  ;;  %v1184_v3 = vadd.f32 %v3363_v43, %v1183_v63 }
 0x10f   : > { %v1001_v4 = vpop.f32.mrf.mxu0  ;;  %v1185_v5 = vpop.f32.mrf.mxu1 }
 0x110   : > { %1820 = vst.msk [vmem:[%s3369_s12 + $0x4] sm:$0xf] %vm1818_vm2, %v2646_v0  ;;  %1866 = vst.msk [vmem:[%s3369_s12 + $0xbc] sm:$0xf] %vm1818_vm2, %v2692_v1  ;;  %v1360_v6 = vmax.f32 %v1000_v2, 0.0  ;;  %v1406_v7 = vmax.f32 %v1184_v3, 0.0 }
 0x111   : > { %v1002_v8 = vpop.f32.mrf.mxu0  ;;  %v1186_v9 = vpop.f32.mrf.mxu1 }
 0x112   : > { %v2647_v10 = vpack.c.bf16 %v1360_v6, %v1360_v6  ;;  %v2693_v11 = vpack.c.bf16 %v1406_v7, %v1406_v7  ;;  %v1003_v12 = vadd.f32 %v3363_v43, %v1002_v8  ;;  %v1187_v13 = vadd.f32 %v3363_v43, %v1186_v9 }
 0x113   : > { %v1004_v14 = vpop.f32.mrf.mxu0  ;;  %v1188_v15 = vpop.f32.mrf.mxu1 }
 0x114   : > { %1821 = vst.msk [vmem:[%s3369_s12 + $0x8] sm:$0xf] %vm1818_vm2, %v2647_v10  ;;  %1867 = vst.msk [vmem:[%s3369_s12 + $0xc0] sm:$0xf] %vm1818_vm2, %v2693_v11  ;;  %v1361_v16 = vmax.f32 %v1003_v12, 0.0  ;;  %v1407_v17 = vmax.f32 %v1187_v13, 0.0 }
 0x115   : > { %v1007_v18 = vpop.f32.mrf.mxu0  ;;  %v1191_v19 = vpop.f32.mrf.mxu1 }
 0x116   : > { %v2648_v20 = vpack.c.bf16 %v1361_v16, %v1361_v16  ;;  %v2694_v21 = vpack.c.bf16 %v1407_v17, %v1407_v17  ;;  %v1008_v22 = vadd.f32 %v3363_v43, %v1007_v18  ;;  %v1192_v23 = vadd.f32 %v3363_v43, %v1191_v19 }
 0x117   : > { %v1009_v24 = vpop.f32.mrf.mxu0  ;;  %v1193_v25 = vpop.f32.mrf.mxu1 }
 0x118   : > { %1822 = vst.msk [vmem:[%s3369_s12 + $0xc] sm:$0xf] %vm1818_vm2, %v2648_v20  ;;  %1868 = vst.msk [vmem:[%s3369_s12 + $0xc4] sm:$0xf] %vm1818_vm2, %v2694_v21  ;;  %v1362_v26 = vmax.f32 %v1008_v22, 0.0  ;;  %v1408_v27 = vmax.f32 %v1192_v23, 0.0 }
 0x119   : > { %v1010_v28 = vpop.f32.mrf.mxu0  ;;  %v1194_v29 = vpop.f32.mrf.mxu1 }
 0x11a   : > { %v2649_v30 = vpack.c.bf16 %v1362_v26, %v1362_v26  ;;  %v2695_v31 = vpack.c.bf16 %v1408_v27, %v1408_v27  ;;  %v1011_v32 = vadd.f32 %v3363_v43, %v1010_v28  ;;  %v1195_v33 = vadd.f32 %v3363_v43, %v1194_v29 }
 0x11b   : > { %v1012_v34 = vpop.f32.mrf.mxu0  ;;  %v1196_v35 = vpop.f32.mrf.mxu1 }
 0x11c   : > { %1823 = vst.msk [vmem:[%s3369_s12 + $0x10] sm:$0xf] %vm1818_vm2, %v2649_v30  ;;  %1869 = vst.msk [vmem:[%s3369_s12 + $0xc8] sm:$0xf] %vm1818_vm2, %v2695_v31  ;;  %v1363_v36 = vmax.f32 %v1011_v32, 0.0  ;;  %v1409_v37 = vmax.f32 %v1195_v33, 0.0 }
 0x11d   : > { %v1015_v38 = vpop.f32.mrf.mxu0  ;;  %v1199_v39 = vpop.f32.mrf.mxu1 }
 0x11e   : > { %v2650_v40 = vpack.c.bf16 %v1363_v36, %v1363_v36  ;;  %v2696_v41 = vpack.c.bf16 %v1409_v37, %v1409_v37  ;;  %v1016_v42 = vadd.f32 %v3363_v43, %v1015_v38  ;;  %v1200_v44 = vadd.f32 %v3363_v43, %v1199_v39 }
 0x11f   : > { %v1017_v45 = vpop.f32.mrf.mxu0  ;;  %v1201_v46 = vpop.f32.mrf.mxu1 }
 0x120   : > { %1824 = vst.msk [vmem:[%s3369_s12 + $0x14] sm:$0xf] %vm1818_vm2, %v2650_v40  ;;  %1870 = vst.msk [vmem:[%s3369_s12 + $0xcc] sm:$0xf] %vm1818_vm2, %v2696_v41  ;;  %v1364_v47 = vmax.f32 %v1016_v42, 0.0  ;;  %v1410_v48 = vmax.f32 %v1200_v44, 0.0 }
 0x121   : > { %v1018_v49 = vpop.f32.mrf.mxu0  ;;  %v1202_v50 = vpop.f32.mrf.mxu1 }
 0x122   : > { %v2651_v51 = vpack.c.bf16 %v1364_v47, %v1364_v47  ;;  %v2697_v52 = vpack.c.bf16 %v1410_v48, %v1410_v48  ;;  %v1019_v53 = vadd.f32 %v3363_v43, %v1018_v49  ;;  %v1203_v54 = vadd.f32 %v3363_v43, %v1202_v50 }
 0x123   : > { %v1020_v55 = vpop.f32.mrf.mxu0  ;;  %v1204_v56 = vpop.f32.mrf.mxu1 }
 0x124   : > { %1825 = vst.msk [vmem:[%s3369_s12 + $0x18] sm:$0xf] %vm1818_vm2, %v2651_v51  ;;  %1871 = vst.msk [vmem:[%s3369_s12 + $0xd0] sm:$0xf] %vm1818_vm2, %v2697_v52  ;;  %v1365_v57 = vmax.f32 %v1019_v53, 0.0  ;;  %v1411_v58 = vmax.f32 %v1203_v54, 0.0 }
 0x125   : > { %v1023_v59 = vpop.f32.mrf.mxu0  ;;  %v1207_v60 = vpop.f32.mrf.mxu1 }
 0x126   : > { %v2652_v61 = vpack.c.bf16 %v1365_v57, %v1365_v57  ;;  %v2698_v62 = vpack.c.bf16 %v1411_v58, %v1411_v58  ;;  %v1024_v63 = vadd.f32 %v3363_v43, %v1023_v59  ;;  %v1208_v0 = vadd.f32 %v3363_v43, %v1207_v60 }
 0x127   : > { %v1025_v1 = vpop.f32.mrf.mxu0  ;;  %v1209_v2 = vpop.f32.mrf.mxu1 }
 0x128   : > { %1826 = vst.msk [vmem:[%s3369_s12 + $0x1c] sm:$0xf] %vm1818_vm2, %v2652_v61  ;;  %1872 = vst.msk [vmem:[%s3369_s12 + $0xd4] sm:$0xf] %vm1818_vm2, %v2698_v62  ;;  %v1366_v3 = vmax.f32 %v1024_v63, 0.0  ;;  %v1412_v4 = vmax.f32 %v1208_v0, 0.0 }
 0x129   : > { %v1026_v5 = vpop.f32.mrf.mxu0  ;;  %v1210_v6 = vpop.f32.mrf.mxu1 }
 0x12a   : > { %v2653_v7 = vpack.c.bf16 %v1366_v3, %v1366_v3  ;;  %v2699_v8 = vpack.c.bf16 %v1412_v4, %v1412_v4  ;;  %v1027_v9 = vadd.f32 %v3363_v43, %v1026_v5  ;;  %v1211_v10 = vadd.f32 %v3363_v43, %v1210_v6 }
 0x12b   : > { %v1028_v11 = vpop.f32.mrf.mxu0  ;;  %v1212_v12 = vpop.f32.mrf.mxu1 }
 0x12c   : > { %1827 = vst.msk [vmem:[%s3369_s12 + $0x20] sm:$0xf] %vm1818_vm2, %v2653_v7  ;;  %1873 = vst.msk [vmem:[%s3369_s12 + $0xd8] sm:$0xf] %vm1818_vm2, %v2699_v8  ;;  %v1367_v13 = vmax.f32 %v1027_v9, 0.0  ;;  %v1413_v14 = vmax.f32 %v1211_v10, 0.0 }
 0x12d   : > { %v1031_v15 = vpop.f32.mrf.mxu0  ;;  %v1215_v16 = vpop.f32.mrf.mxu1 }
 0x12e   : > { %v2654_v17 = vpack.c.bf16 %v1367_v13, %v1367_v13  ;;  %v2700_v18 = vpack.c.bf16 %v1413_v14, %v1413_v14  ;;  %v1032_v19 = vadd.f32 %v3363_v43, %v1031_v15  ;;  %v1216_v20 = vadd.f32 %v3363_v43, %v1215_v16 }
 0x12f   : > { %v1033_v21 = vpop.f32.mrf.mxu0  ;;  %v1217_v22 = vpop.f32.mrf.mxu1 }
 0x130   : > { %1828 = vst.msk [vmem:[%s3369_s12 + $0x24] sm:$0xf] %vm1818_vm2, %v2654_v17  ;;  %1874 = vst.msk [vmem:[%s3369_s12 + $0xdc] sm:$0xf] %vm1818_vm2, %v2700_v18  ;;  %v1368_v23 = vmax.f32 %v1032_v19, 0.0  ;;  %v1414_v24 = vmax.f32 %v1216_v20, 0.0 }
 0x131   : > { %v1034_v25 = vpop.f32.mrf.mxu0  ;;  %v1218_v26 = vpop.f32.mrf.mxu1 }
 0x132   : > { %v2655_v27 = vpack.c.bf16 %v1368_v23, %v1368_v23  ;;  %v2701_v28 = vpack.c.bf16 %v1414_v24, %v1414_v24  ;;  %v1035_v29 = vadd.f32 %v3363_v43, %v1034_v25  ;;  %v1219_v30 = vadd.f32 %v3363_v43, %v1218_v26 }
 0x133   : > { %v1036_v31 = vpop.f32.mrf.mxu0  ;;  %v1220_v32 = vpop.f32.mrf.mxu1 }
 0x134   : > { %1829 = vst.msk [vmem:[%s3369_s12 + $0x28] sm:$0xf] %vm1818_vm2, %v2655_v27  ;;  %1875 = vst.msk [vmem:[%s3369_s12 + $0xe0] sm:$0xf] %vm1818_vm2, %v2701_v28  ;;  %v1369_v33 = vmax.f32 %v1035_v29, 0.0  ;;  %v1415_v34 = vmax.f32 %v1219_v30, 0.0 }
 0x135   : > { %v1039_v35 = vpop.f32.mrf.mxu0  ;;  %v1223_v36 = vpop.f32.mrf.mxu1 }
 0x136   : > { %v2656_v37 = vpack.c.bf16 %v1369_v33, %v1369_v33  ;;  %v2702_v38 = vpack.c.bf16 %v1415_v34, %v1415_v34  ;;  %v1040_v39 = vadd.f32 %v3363_v43, %v1039_v35  ;;  %v1224_v40 = vadd.f32 %v3363_v43, %v1223_v36 }
 0x137   : > { %v1041_v41 = vpop.f32.mrf.mxu0  ;;  %v1225_v42 = vpop.f32.mrf.mxu1 }
 0x138   : > { %1830 = vst.msk [vmem:[%s3369_s12 + $0x2c] sm:$0xf] %vm1818_vm2, %v2656_v37  ;;  %1876 = vst.msk [vmem:[%s3369_s12 + $0xe4] sm:$0xf] %vm1818_vm2, %v2702_v38  ;;  %v1370_v44 = vmax.f32 %v1040_v39, 0.0  ;;  %v1416_v45 = vmax.f32 %v1224_v40, 0.0 }
 0x139   : > { %v1042_v46 = vpop.f32.mrf.mxu0  ;;  %v1226_v47 = vpop.f32.mrf.mxu1 }
 0x13a   : > { %v2657_v48 = vpack.c.bf16 %v1370_v44, %v1370_v44  ;;  %v2703_v49 = vpack.c.bf16 %v1416_v45, %v1416_v45  ;;  %v1043_v50 = vadd.f32 %v3363_v43, %v1042_v46  ;;  %v1227_v51 = vadd.f32 %v3363_v43, %v1226_v47 }
 0x13b   : > { %v1044_v52 = vpop.f32.mrf.mxu0  ;;  %v1228_v53 = vpop.f32.mrf.mxu1 }
 0x13c   : > { %1831 = vst.msk [vmem:[%s3369_s12 + $0x30] sm:$0xf] %vm1818_vm2, %v2657_v48  ;;  %1877 = vst.msk [vmem:[%s3369_s12 + $0xe8] sm:$0xf] %vm1818_vm2, %v2703_v49  ;;  %v1371_v54 = vmax.f32 %v1043_v50, 0.0  ;;  %v1417_v55 = vmax.f32 %v1227_v51, 0.0 }
 0x13d   : > { %v1047_v56 = vpop.f32.mrf.mxu0  ;;  %v1231_v57 = vpop.f32.mrf.mxu1 }
 0x13e   : > { %v2658_v58 = vpack.c.bf16 %v1371_v54, %v1371_v54  ;;  %v2704_v59 = vpack.c.bf16 %v1417_v55, %v1417_v55  ;;  %v1048_v60 = vadd.f32 %v3363_v43, %v1047_v56  ;;  %v1232_v61 = vadd.f32 %v3363_v43, %v1231_v57 }
 0x13f   : > { %v1049_v62 = vpop.f32.mrf.mxu0  ;;  %v1233_v63 = vpop.f32.mrf.mxu1 }
 0x140   : > { %1832 = vst.msk [vmem:[%s3369_s12 + $0x34] sm:$0xf] %vm1818_vm2, %v2658_v58  ;;  %1878 = vst.msk [vmem:[%s3369_s12 + $0xec] sm:$0xf] %vm1818_vm2, %v2704_v59  ;;  %v1372_v0 = vmax.f32 %v1048_v60, 0.0  ;;  %v1418_v1 = vmax.f32 %v1232_v61, 0.0 }
 0x141   : > { %v1050_v2 = vpop.f32.mrf.mxu0  ;;  %v1234_v3 = vpop.f32.mrf.mxu1 }
 0x142   : > { %v2659_v4 = vpack.c.bf16 %v1372_v0, %v1372_v0  ;;  %v2705_v5 = vpack.c.bf16 %v1418_v1, %v1418_v1  ;;  %v1051_v6 = vadd.f32 %v3363_v43, %v1050_v2  ;;  %v1235_v7 = vadd.f32 %v3363_v43, %v1234_v3 }
 0x143   : > { %v1052_v8 = vpop.f32.mrf.mxu0  ;;  %v1236_v9 = vpop.f32.mrf.mxu1 }
 0x144   : > { %1833 = vst.msk [vmem:[%s3369_s12 + $0x38] sm:$0xf] %vm1818_vm2, %v2659_v4  ;;  %1879 = vst.msk [vmem:[%s3369_s12 + $0xf0] sm:$0xf] %vm1818_vm2, %v2705_v5  ;;  %v1373_v10 = vmax.f32 %v1051_v6, 0.0  ;;  %v1419_v11 = vmax.f32 %v1235_v7, 0.0 }
 0x145   : > { %v1055_v12 = vpop.f32.mrf.mxu0  ;;  %v1239_v13 = vpop.f32.mrf.mxu1 }
 0x146   : > { %v2660_v14 = vpack.c.bf16 %v1373_v10, %v1373_v10  ;;  %v2706_v15 = vpack.c.bf16 %v1419_v11, %v1419_v11  ;;  %v1056_v16 = vadd.f32 %v3363_v43, %v1055_v12  ;;  %v1240_v17 = vadd.f32 %v3363_v43, %v1239_v13 }
 0x147   : > { %v1057_v18 = vpop.f32.mrf.mxu0  ;;  %v1241_v19 = vpop.f32.mrf.mxu1 }
 0x148   : > { %1834 = vst.msk [vmem:[%s3369_s12 + $0x3c] sm:$0xf] %vm1818_vm2, %v2660_v14  ;;  %1880 = vst.msk [vmem:[%s3369_s12 + $0xf4] sm:$0xf] %vm1818_vm2, %v2706_v15  ;;  %v1374_v20 = vmax.f32 %v1056_v16, 0.0  ;;  %v1420_v21 = vmax.f32 %v1240_v17, 0.0 }
 0x149   : > { %v1058_v22 = vpop.f32.mrf.mxu0  ;;  %v1242_v23 = vpop.f32.mrf.mxu1 }
 0x14a   : > { %v2661_v24 = vpack.c.bf16 %v1374_v20, %v1374_v20  ;;  %v2707_v25 = vpack.c.bf16 %v1420_v21, %v1420_v21  ;;  %v1059_v26 = vadd.f32 %v3363_v43, %v1058_v22  ;;  %v1243_v27 = vadd.f32 %v3363_v43, %v1242_v23 }
 0x14b   : > { %v1060_v28 = vpop.f32.mrf.mxu0  ;;  %v1244_v29 = vpop.f32.mrf.mxu1 }
 0x14c   : > { %1835 = vst.msk [vmem:[%s3369_s12 + $0x40] sm:$0xf] %vm1818_vm2, %v2661_v24  ;;  %1881 = vst.msk [vmem:[%s3369_s12 + $0xf8] sm:$0xf] %vm1818_vm2, %v2707_v25  ;;  %v1375_v30 = vmax.f32 %v1059_v26, 0.0  ;;  %v1421_v31 = vmax.f32 %v1243_v27, 0.0 }
 0x14d   : > { %v1063_v32 = vpop.f32.mrf.mxu0  ;;  %v1247_v33 = vpop.f32.mrf.mxu1 }
 0x14e   : > { %v2662_v34 = vpack.c.bf16 %v1375_v30, %v1375_v30  ;;  %v2708_v35 = vpack.c.bf16 %v1421_v31, %v1421_v31  ;;  %v1064_v36 = vadd.f32 %v3363_v43, %v1063_v32  ;;  %v1248_v37 = vadd.f32 %v3363_v43, %v1247_v33 }
 0x14f   : > { %v1065_v38 = vpop.f32.mrf.mxu0  ;;  %v1249_v39 = vpop.f32.mrf.mxu1 }
 0x150   : > { %1836 = vst.msk [vmem:[%s3369_s12 + $0x44] sm:$0xf] %vm1818_vm2, %v2662_v34  ;;  %1882 = vst.msk [vmem:[%s3369_s12 + $0xfc] sm:$0xf] %vm1818_vm2, %v2708_v35  ;;  %v1376_v40 = vmax.f32 %v1064_v36, 0.0  ;;  %v1422_v41 = vmax.f32 %v1248_v37, 0.0 }
 0x151   : > { %v1066_v42 = vpop.f32.mrf.mxu0  ;;  %v1250_v44 = vpop.f32.mrf.mxu1 }
 0x152   : > { %v2663_v45 = vpack.c.bf16 %v1376_v40, %v1376_v40  ;;  %v2709_v46 = vpack.c.bf16 %v1422_v41, %v1422_v41  ;;  %v1067_v47 = vadd.f32 %v3363_v43, %v1066_v42  ;;  %v1251_v48 = vadd.f32 %v3363_v43, %v1250_v44 }
 0x153   : > { %v1068_v49 = vpop.f32.mrf.mxu0  ;;  %v1252_v50 = vpop.f32.mrf.mxu1 }
 0x154   : > { %1837 = vst.msk [vmem:[%s3369_s12 + $0x48] sm:$0xf] %vm1818_vm2, %v2663_v45  ;;  %1883 = vst.msk [vmem:[%s3369_s12 + $0x100] sm:$0xf] %vm1818_vm2, %v2709_v46  ;;  %v1377_v51 = vmax.f32 %v1067_v47, 0.0  ;;  %v1423_v52 = vmax.f32 %v1251_v48, 0.0 }
 0x155   : > { %v1071_v53 = vpop.f32.mrf.mxu0  ;;  %v1255_v54 = vpop.f32.mrf.mxu1 }
 0x156   : > { %v2664_v55 = vpack.c.bf16 %v1377_v51, %v1377_v51  ;;  %v2710_v56 = vpack.c.bf16 %v1423_v52, %v1423_v52  ;;  %v1072_v57 = vadd.f32 %v3363_v43, %v1071_v53  ;;  %v1256_v58 = vadd.f32 %v3363_v43, %v1255_v54 }
 0x157   : > { %v1073_v59 = vpop.f32.mrf.mxu0  ;;  %v1257_v60 = vpop.f32.mrf.mxu1 }
 0x158   : > { %1838 = vst.msk [vmem:[%s3369_s12 + $0x4c] sm:$0xf] %vm1818_vm2, %v2664_v55  ;;  %1884 = vst.msk [vmem:[%s3369_s12 + $0x104] sm:$0xf] %vm1818_vm2, %v2710_v56  ;;  %v1378_v61 = vmax.f32 %v1072_v57, 0.0  ;;  %v1424_v62 = vmax.f32 %v1256_v58, 0.0 }
 0x159   : > { %v1074_v63 = vpop.f32.mrf.mxu0  ;;  %v1258_v0 = vpop.f32.mrf.mxu1 }
 0x15a   : > { %v2665_v1 = vpack.c.bf16 %v1378_v61, %v1378_v61  ;;  %v2711_v2 = vpack.c.bf16 %v1424_v62, %v1424_v62  ;;  %v1075_v3 = vadd.f32 %v3363_v43, %v1074_v63  ;;  %v1259_v4 = vadd.f32 %v3363_v43, %v1258_v0 }
 0x15b   : > { %v1076_v5 = vpop.f32.mrf.mxu0  ;;  %v1260_v6 = vpop.f32.mrf.mxu1 }
 0x15c   : > { %1839 = vst.msk [vmem:[%s3369_s12 + $0x50] sm:$0xf] %vm1818_vm2, %v2665_v1  ;;  %1885 = vst.msk [vmem:[%s3369_s12 + $0x108] sm:$0xf] %vm1818_vm2, %v2711_v2  ;;  %v1379_v7 = vmax.f32 %v1075_v3, 0.0  ;;  %v1425_v8 = vmax.f32 %v1259_v4, 0.0 }
 0x15d   : > { %v1079_v9 = vpop.f32.mrf.mxu0  ;;  %v1263_v10 = vpop.f32.mrf.mxu1 }
 0x15e   : > { %v2666_v11 = vpack.c.bf16 %v1379_v7, %v1379_v7  ;;  %v2712_v12 = vpack.c.bf16 %v1425_v8, %v1425_v8  ;;  %v1080_v13 = vadd.f32 %v3363_v43, %v1079_v9  ;;  %v1264_v14 = vadd.f32 %v3363_v43, %v1263_v10 }
 0x15f   : > { %v1081_v15 = vpop.f32.mrf.mxu0  ;;  %v1265_v16 = vpop.f32.mrf.mxu1 }
 0x160   : > { %1840 = vst.msk [vmem:[%s3369_s12 + $0x54] sm:$0xf] %vm1818_vm2, %v2666_v11  ;;  %1886 = vst.msk [vmem:[%s3369_s12 + $0x10c] sm:$0xf] %vm1818_vm2, %v2712_v12  ;;  %v1380_v17 = vmax.f32 %v1080_v13, 0.0  ;;  %v1426_v18 = vmax.f32 %v1264_v14, 0.0 }
 0x161   : > { %v1082_v19 = vpop.f32.mrf.mxu0  ;;  %v1266_v20 = vpop.f32.mrf.mxu1 }
 0x162   : > { %v2667_v21 = vpack.c.bf16 %v1380_v17, %v1380_v17  ;;  %v2713_v22 = vpack.c.bf16 %v1426_v18, %v1426_v18  ;;  %v1083_v23 = vadd.f32 %v3363_v43, %v1082_v19  ;;  %v1267_v24 = vadd.f32 %v3363_v43, %v1266_v20 }
 0x163   : > { %v1084_v25 = vpop.f32.mrf.mxu0  ;;  %v1268_v26 = vpop.f32.mrf.mxu1 }
 0x164   : > { %1841 = vst.msk [vmem:[%s3369_s12 + $0x58] sm:$0xf] %vm1818_vm2, %v2667_v21  ;;  %1887 = vst.msk [vmem:[%s3369_s12 + $0x110] sm:$0xf] %vm1818_vm2, %v2713_v22  ;;  %v1381_v27 = vmax.f32 %v1083_v23, 0.0  ;;  %v1427_v28 = vmax.f32 %v1267_v24, 0.0 }
 0x165   : > { %v1087_v29 = vpop.f32.mrf.mxu0  ;;  %v1271_v30 = vpop.f32.mrf.mxu1 }
 0x166   : > { %v2668_v31 = vpack.c.bf16 %v1381_v27, %v1381_v27  ;;  %v2714_v32 = vpack.c.bf16 %v1427_v28, %v1427_v28  ;;  %v1088_v33 = vadd.f32 %v3363_v43, %v1087_v29  ;;  %v1272_v34 = vadd.f32 %v3363_v43, %v1271_v30 }
 0x167   : > { %v1089_v35 = vpop.f32.mrf.mxu0  ;;  %v1273_v36 = vpop.f32.mrf.mxu1 }
 0x168   : > { %1842 = vst.msk [vmem:[%s3369_s12 + $0x5c] sm:$0xf] %vm1818_vm2, %v2668_v31  ;;  %1888 = vst.msk [vmem:[%s3369_s12 + $0x114] sm:$0xf] %vm1818_vm2, %v2714_v32  ;;  %v1382_v37 = vmax.f32 %v1088_v33, 0.0  ;;  %v1428_v38 = vmax.f32 %v1272_v34, 0.0 }
 0x169   : > { %v1090_v39 = vpop.f32.mrf.mxu0  ;;  %v1274_v40 = vpop.f32.mrf.mxu1 }
 0x16a   : > { %v2669_v41 = vpack.c.bf16 %v1382_v37, %v1382_v37  ;;  %v2715_v42 = vpack.c.bf16 %v1428_v38, %v1428_v38  ;;  %v1091_v44 = vadd.f32 %v3363_v43, %v1090_v39  ;;  %v1275_v45 = vadd.f32 %v3363_v43, %v1274_v40 }
 0x16b   : > { %v1092_v46 = vpop.f32.mrf.mxu0  ;;  %v1276_v47 = vpop.f32.mrf.mxu1 }
 0x16c   : > { %1843 = vst.msk [vmem:[%s3369_s12 + $0x60] sm:$0xf] %vm1818_vm2, %v2669_v41  ;;  %1889 = vst.msk [vmem:[%s3369_s12 + $0x118] sm:$0xf] %vm1818_vm2, %v2715_v42  ;;  %v1383_v48 = vmax.f32 %v1091_v44, 0.0  ;;  %v1429_v49 = vmax.f32 %v1275_v45, 0.0 }
 0x16d   : > { %v1095_v50 = vpop.f32.mrf.mxu0  ;;  %v1279_v51 = vpop.f32.mrf.mxu1 }
 0x16e   : > { %v2670_v52 = vpack.c.bf16 %v1383_v48, %v1383_v48  ;;  %v2716_v53 = vpack.c.bf16 %v1429_v49, %v1429_v49  ;;  %v1096_v54 = vadd.f32 %v3363_v43, %v1095_v50  ;;  %v1280_v55 = vadd.f32 %v3363_v43, %v1279_v51 }
 0x16f   : > { %v1097_v56 = vpop.f32.mrf.mxu0  ;;  %v1281_v57 = vpop.f32.mrf.mxu1 }
 0x170   : > { %1844 = vst.msk [vmem:[%s3369_s12 + $0x64] sm:$0xf] %vm1818_vm2, %v2670_v52  ;;  %1890 = vst.msk [vmem:[%s3369_s12 + $0x11c] sm:$0xf] %vm1818_vm2, %v2716_v53  ;;  %v1384_v58 = vmax.f32 %v1096_v54, 0.0  ;;  %v1430_v59 = vmax.f32 %v1280_v55, 0.0 }
 0x171   : > { %v1098_v60 = vpop.f32.mrf.mxu0  ;;  %v1282_v61 = vpop.f32.mrf.mxu1 }
 0x172   : > { %v2671_v62 = vpack.c.bf16 %v1384_v58, %v1384_v58  ;;  %v2717_v63 = vpack.c.bf16 %v1430_v59, %v1430_v59  ;;  %v1099_v0 = vadd.f32 %v3363_v43, %v1098_v60  ;;  %v1283_v1 = vadd.f32 %v3363_v43, %v1282_v61 }
 0x173   : > { %v1100_v2 = vpop.f32.mrf.mxu0  ;;  %v1284_v3 = vpop.f32.mrf.mxu1 }
 0x174   : > { %1845 = vst.msk [vmem:[%s3369_s12 + $0x68] sm:$0xf] %vm1818_vm2, %v2671_v62  ;;  %1891 = vst.msk [vmem:[%s3369_s12 + $0x120] sm:$0xf] %vm1818_vm2, %v2717_v63  ;;  %v1385_v4 = vmax.f32 %v1099_v0, 0.0  ;;  %v1431_v5 = vmax.f32 %v1283_v1, 0.0 }
 0x175   : > { %v1103_v6 = vpop.f32.mrf.mxu0  ;;  %v1287_v7 = vpop.f32.mrf.mxu1 }
 0x176   : > { %v2672_v8 = vpack.c.bf16 %v1385_v4, %v1385_v4  ;;  %v2718_v9 = vpack.c.bf16 %v1431_v5, %v1431_v5  ;;  %v1104_v10 = vadd.f32 %v3363_v43, %v1103_v6  ;;  %v1288_v11 = vadd.f32 %v3363_v43, %v1287_v7 }
 0x177   : > { %v1105_v12 = vpop.f32.mrf.mxu0  ;;  %v1289_v13 = vpop.f32.mrf.mxu1 }
 0x178   : > { %1846 = vst.msk [vmem:[%s3369_s12 + $0x6c] sm:$0xf] %vm1818_vm2, %v2672_v8  ;;  %1892 = vst.msk [vmem:[%s3369_s12 + $0x124] sm:$0xf] %vm1818_vm2, %v2718_v9  ;;  %v1386_v14 = vmax.f32 %v1104_v10, 0.0  ;;  %v1432_v15 = vmax.f32 %v1288_v11, 0.0 }
 0x179   : > { %v1106_v16 = vpop.f32.mrf.mxu0  ;;  %v1290_v17 = vpop.f32.mrf.mxu1 }
 0x17a   : > { %v2673_v18 = vpack.c.bf16 %v1386_v14, %v1386_v14  ;;  %v2719_v19 = vpack.c.bf16 %v1432_v15, %v1432_v15  ;;  %v1107_v20 = vadd.f32 %v3363_v43, %v1106_v16  ;;  %v1291_v21 = vadd.f32 %v3363_v43, %v1290_v17 }
 0x17b   : > { %v1108_v22 = vpop.f32.mrf.mxu0  ;;  %v1292_v23 = vpop.f32.mrf.mxu1 }
 0x17c   : > { %1847 = vst.msk [vmem:[%s3369_s12 + $0x70] sm:$0xf] %vm1818_vm2, %v2673_v18  ;;  %1893 = vst.msk [vmem:[%s3369_s12 + $0x128] sm:$0xf] %vm1818_vm2, %v2719_v19  ;;  %v1387_v24 = vmax.f32 %v1107_v20, 0.0  ;;  %v1433_v25 = vmax.f32 %v1291_v21, 0.0 }
 0x17d   : > { %v1111_v26 = vpop.f32.mrf.mxu0  ;;  %v1295_v27 = vpop.f32.mrf.mxu1 }
 0x17e   : > { %v2674_v28 = vpack.c.bf16 %v1387_v24, %v1387_v24  ;;  %v2720_v29 = vpack.c.bf16 %v1433_v25, %v1433_v25  ;;  %v1112_v30 = vadd.f32 %v3363_v43, %v1111_v26  ;;  %v1296_v31 = vadd.f32 %v3363_v43, %v1295_v27 }
 0x17f   : > { %v1113_v32 = vpop.f32.mrf.mxu0  ;;  %v1297_v33 = vpop.f32.mrf.mxu1 }
 0x180   : > { %1848 = vst.msk [vmem:[%s3369_s12 + $0x74] sm:$0xf] %vm1818_vm2, %v2674_v28  ;;  %1894 = vst.msk [vmem:[%s3369_s12 + $0x12c] sm:$0xf] %vm1818_vm2, %v2720_v29  ;;  %v1388_v34 = vmax.f32 %v1112_v30, 0.0  ;;  %v1434_v35 = vmax.f32 %v1296_v31, 0.0 }
 0x181   : > { %v1114_v36 = vpop.f32.mrf.mxu0  ;;  %v1298_v37 = vpop.f32.mrf.mxu1 }
 0x182   : > { %v2675_v38 = vpack.c.bf16 %v1388_v34, %v1388_v34  ;;  %v2721_v39 = vpack.c.bf16 %v1434_v35, %v1434_v35  ;;  %v1115_v40 = vadd.f32 %v3363_v43, %v1114_v36  ;;  %v1299_v41 = vadd.f32 %v3363_v43, %v1298_v37 }
 0x183   : > { %v1116_v42 = vpop.f32.mrf.mxu0  ;;  %v1300_v44 = vpop.f32.mrf.mxu1 }
 0x184   : > { %1849 = vst.msk [vmem:[%s3369_s12 + $0x78] sm:$0xf] %vm1818_vm2, %v2675_v38  ;;  %1895 = vst.msk [vmem:[%s3369_s12 + $0x130] sm:$0xf] %vm1818_vm2, %v2721_v39  ;;  %v1389_v45 = vmax.f32 %v1115_v40, 0.0  ;;  %v1435_v46 = vmax.f32 %v1299_v41, 0.0 }
 0x185   : > { %v1119_v47 = vpop.f32.mrf.mxu0  ;;  %v1303_v48 = vpop.f32.mrf.mxu1 }
 0x186   : > { %v2676_v49 = vpack.c.bf16 %v1389_v45, %v1389_v45  ;;  %v2722_v50 = vpack.c.bf16 %v1435_v46, %v1435_v46  ;;  %v1120_v51 = vadd.f32 %v3363_v43, %v1119_v47  ;;  %v1304_v52 = vadd.f32 %v3363_v43, %v1303_v48 }
 0x187   : > { %v1121_v53 = vpop.f32.mrf.mxu0  ;;  %v1305_v54 = vpop.f32.mrf.mxu1 }
 0x188   : > { %1850 = vst.msk [vmem:[%s3369_s12 + $0x7c] sm:$0xf] %vm1818_vm2, %v2676_v49  ;;  %1896 = vst.msk [vmem:[%s3369_s12 + $0x134] sm:$0xf] %vm1818_vm2, %v2722_v50  ;;  %v1390_v55 = vmax.f32 %v1120_v51, 0.0  ;;  %v1436_v56 = vmax.f32 %v1304_v52, 0.0 }
 0x189   : > { %v1122_v57 = vpop.f32.mrf.mxu0  ;;  %v1306_v58 = vpop.f32.mrf.mxu1 }
 0x18a   : > { %v2677_v59 = vpack.c.bf16 %v1390_v55, %v1390_v55  ;;  %v2723_v60 = vpack.c.bf16 %v1436_v56, %v1436_v56  ;;  %v1123_v61 = vadd.f32 %v3363_v43, %v1122_v57  ;;  %v1307_v62 = vadd.f32 %v3363_v43, %v1306_v58 }
 0x18b   : > { %v1124_v63 = vpop.f32.mrf.mxu0  ;;  %v1308_v0 = vpop.f32.mrf.mxu1 }
 0x18c   : > { %1851 = vst.msk [vmem:[%s3369_s12 + $0x80] sm:$0xf] %vm1818_vm2, %v2677_v59  ;;  %1897 = vst.msk [vmem:[%s3369_s12 + $0x138] sm:$0xf] %vm1818_vm2, %v2723_v60  ;;  %v1391_v1 = vmax.f32 %v1123_v61, 0.0  ;;  %v1437_v2 = vmax.f32 %v1307_v62, 0.0 }
 0x18d   : > { %v1127_v3 = vpop.f32.mrf.mxu0  ;;  %v1311_v4 = vpop.f32.mrf.mxu1 }
 0x18e   : > { %v2678_v5 = vpack.c.bf16 %v1391_v1, %v1391_v1  ;;  %v2724_v6 = vpack.c.bf16 %v1437_v2, %v1437_v2  ;;  %v1128_v7 = vadd.f32 %v3363_v43, %v1127_v3  ;;  %v1312_v8 = vadd.f32 %v3363_v43, %v1311_v4 }
 0x18f   : > { %v1129_v9 = vpop.f32.mrf.mxu0  ;;  %v1313_v10 = vpop.f32.mrf.mxu1 }
 0x190   : > { %1852 = vst.msk [vmem:[%s3369_s12 + $0x84] sm:$0xf] %vm1818_vm2, %v2678_v5  ;;  %1898 = vst.msk [vmem:[%s3369_s12 + $0x13c] sm:$0xf] %vm1818_vm2, %v2724_v6  ;;  %v1392_v11 = vmax.f32 %v1128_v7, 0.0  ;;  %v1438_v12 = vmax.f32 %v1312_v8, 0.0 }
 0x191   : > { %v1130_v13 = vpop.f32.mrf.mxu0  ;;  %v1314_v14 = vpop.f32.mrf.mxu1 }
 0x192   : > { %v2679_v15 = vpack.c.bf16 %v1392_v11, %v1392_v11  ;;  %v2725_v16 = vpack.c.bf16 %v1438_v12, %v1438_v12  ;;  %v1131_v17 = vadd.f32 %v3363_v43, %v1130_v13  ;;  %v1315_v18 = vadd.f32 %v3363_v43, %v1314_v14 }
 0x193   : > { %v1132_v19 = vpop.f32.mrf.mxu0  ;;  %v1316_v20 = vpop.f32.mrf.mxu1 }
 0x194   : > { %1853 = vst.msk [vmem:[%s3369_s12 + $0x88] sm:$0xf] %vm1818_vm2, %v2679_v15  ;;  %1899 = vst.msk [vmem:[%s3369_s12 + $0x140] sm:$0xf] %vm1818_vm2, %v2725_v16  ;;  %v1393_v21 = vmax.f32 %v1131_v17, 0.0  ;;  %v1439_v22 = vmax.f32 %v1315_v18, 0.0 }
 0x195   : > { %v1135_v23 = vpop.f32.mrf.mxu0  ;;  %v1319_v24 = vpop.f32.mrf.mxu1 }
 0x196   : > { %v2680_v25 = vpack.c.bf16 %v1393_v21, %v1393_v21  ;;  %v2726_v26 = vpack.c.bf16 %v1439_v22, %v1439_v22  ;;  %v1136_v27 = vadd.f32 %v3363_v43, %v1135_v23  ;;  %v1320_v28 = vadd.f32 %v3363_v43, %v1319_v24 }
 0x197   : > { %v1137_v29 = vpop.f32.mrf.mxu0  ;;  %v1321_v30 = vpop.f32.mrf.mxu1 }
 0x198   : > { %1854 = vst.msk [vmem:[%s3369_s12 + $0x8c] sm:$0xf] %vm1818_vm2, %v2680_v25  ;;  %1900 = vst.msk [vmem:[%s3369_s12 + $0x144] sm:$0xf] %vm1818_vm2, %v2726_v26  ;;  %v1394_v31 = vmax.f32 %v1136_v27, 0.0  ;;  %v1440_v32 = vmax.f32 %v1320_v28, 0.0 }
 0x199   : > { %v1138_v33 = vpop.f32.mrf.mxu0  ;;  %v1322_v34 = vpop.f32.mrf.mxu1 }
 0x19a   : > { %v2681_v35 = vpack.c.bf16 %v1394_v31, %v1394_v31  ;;  %v2727_v36 = vpack.c.bf16 %v1440_v32, %v1440_v32  ;;  %v1139_v37 = vadd.f32 %v3363_v43, %v1138_v33  ;;  %v1323_v38 = vadd.f32 %v3363_v43, %v1322_v34  ;;  %v3007_v34 = vld [vmem:[%s3841_s2] ss:$0 sm:$0xff] }
 0x19b   : > { %v1140_v39 = vpop.f32.mrf.mxu0  ;;  %v1324_v40 = vpop.f32.mrf.mxu1 }
 0x19c   : > { %1855 = vst.msk [vmem:[%s3369_s12 + $0x90] sm:$0xf] %vm1818_vm2, %v2681_v35  ;;  %1901 = vst.msk [vmem:[%s3369_s12 + $0x148] sm:$0xf] %vm1818_vm2, %v2727_v36  ;;  %v1395_v41 = vmax.f32 %v1139_v37, 0.0  ;;  %v1441_v42 = vmax.f32 %v1323_v38, 0.0 }
 0x19d   : > { %v1143_v44 = vpop.f32.mrf.mxu0  ;;  %v1327_v45 = vpop.f32.mrf.mxu1 }
 0x19e   : > { %v2682_v46 = vpack.c.bf16 %v1395_v41, %v1395_v41  ;;  %v2728_v47 = vpack.c.bf16 %v1441_v42, %v1441_v42  ;;  %v1144_v48 = vadd.f32 %v3363_v43, %v1143_v44  ;;  %v1328_v49 = vadd.f32 %v3363_v43, %v1327_v45 }
 0x19f   : > { %v1145_v50 = vpop.f32.mrf.mxu0  ;;  %v1329_v51 = vpop.f32.mrf.mxu1 }
 0x1a0   : > { %1856 = vst.msk [vmem:[%s3369_s12 + $0x94] sm:$0xf] %vm1818_vm2, %v2682_v46  ;;  %1902 = vst.msk [vmem:[%s3369_s12 + $0x14c] sm:$0xf] %vm1818_vm2, %v2728_v47  ;;  %v1396_v52 = vmax.f32 %v1144_v48, 0.0  ;;  %v1442_v53 = vmax.f32 %v1328_v49, 0.0 }
 0x1a1   : > { %v1146_v54 = vpop.f32.mrf.mxu0  ;;  %v1330_v55 = vpop.f32.mrf.mxu1 }
 0x1a2   : > { %v2683_v56 = vpack.c.bf16 %v1396_v52, %v1396_v52  ;;  %v2729_v57 = vpack.c.bf16 %v1442_v53, %v1442_v53  ;;  %v1147_v58 = vadd.f32 %v3363_v43, %v1146_v54  ;;  %v1331_v59 = vadd.f32 %v3363_v43, %v1330_v55 }
 0x1a3   : > { %v1148_v60 = vpop.f32.mrf.mxu0  ;;  %v1332_v61 = vpop.f32.mrf.mxu1 }
 0x1a4   : > { %1857 = vst.msk [vmem:[%s3369_s12 + $0x98] sm:$0xf] %vm1818_vm2, %v2683_v56  ;;  %1903 = vst.msk [vmem:[%s3369_s12 + $0x150] sm:$0xf] %vm1818_vm2, %v2729_v57  ;;  %v1397_v62 = vmax.f32 %v1147_v58, 0.0  ;;  %v1443_v63 = vmax.f32 %v1331_v59, 0.0 }
 0x1a5   : > { %v1151_v0 = vpop.f32.mrf.mxu0  ;;  %v1335_v1 = vpop.f32.mrf.mxu1 }
 0x1a6   : > { %v2684_v2 = vpack.c.bf16 %v1397_v62, %v1397_v62  ;;  %v2730_v3 = vpack.c.bf16 %v1443_v63, %v1443_v63  ;;  %v1152_v4 = vadd.f32 %v3363_v43, %v1151_v0  ;;  %v1336_v5 = vadd.f32 %v3363_v43, %v1335_v1 }
 0x1a7   : > { %v1153_v6 = vpop.f32.mrf.mxu0  ;;  %v1337_v7 = vpop.f32.mrf.mxu1 }
 0x1a8   : > { %1858 = vst.msk [vmem:[%s3369_s12 + $0x9c] sm:$0xf] %vm1818_vm2, %v2684_v2  ;;  %1904 = vst.msk [vmem:[%s3369_s12 + $0x154] sm:$0xf] %vm1818_vm2, %v2730_v3  ;;  %v1398_v8 = vmax.f32 %v1152_v4, 0.0  ;;  %v1444_v9 = vmax.f32 %v1336_v5, 0.0 }
 0x1a9   : > { %v1154_v10 = vpop.f32.mrf.mxu0  ;;  %v1338_v11 = vpop.f32.mrf.mxu1 }
 0x1aa   : > { %v2685_v12 = vpack.c.bf16 %v1398_v8, %v1398_v8  ;;  %v2731_v13 = vpack.c.bf16 %v1444_v9, %v1444_v9  ;;  %v1155_v14 = vadd.f32 %v3363_v43, %v1154_v10  ;;  %v1339_v15 = vadd.f32 %v3363_v43, %v1338_v11 }
 0x1ab   : > { %v1156_v16 = vpop.f32.mrf.mxu0  ;;  %v1340_v17 = vpop.f32.mrf.mxu1 }
 0x1ac   : > { %1859 = vst.msk [vmem:[%s3369_s12 + $0xa0] sm:$0xf] %vm1818_vm2, %v2685_v12  ;;  %1905 = vst.msk [vmem:[%s3369_s12 + $0x158] sm:$0xf] %vm1818_vm2, %v2731_v13  ;;  %v1399_v18 = vmax.f32 %v1155_v14, 0.0  ;;  %v1445_v19 = vmax.f32 %v1339_v15, 0.0 }
 0x1ad   : > { %v1159_v20 = vpop.f32.mrf.mxu0  ;;  %v1343_v21 = vpop.f32.mrf.mxu1 }
 0x1ae   : > { %v2686_v22 = vpack.c.bf16 %v1399_v18, %v1399_v18  ;;  %v2732_v23 = vpack.c.bf16 %v1445_v19, %v1445_v19  ;;  %v1160_v24 = vadd.f32 %v3363_v43, %v1159_v20  ;;  %v1344_v25 = vadd.f32 %v3363_v43, %v1343_v21 }
 0x1af   : > { %v1161_v26 = vpop.f32.mrf.mxu0  ;;  %v1345_v27 = vpop.f32.mrf.mxu1 }
 0x1b0   : > { %1860 = vst.msk [vmem:[%s3369_s12 + $0xa4] sm:$0xf] %vm1818_vm2, %v2686_v22  ;;  %1906 = vst.msk [vmem:[%s3369_s12 + $0x15c] sm:$0xf] %vm1818_vm2, %v2732_v23  ;;  %v1400_v28 = vmax.f32 %v1160_v24, 0.0  ;;  %v1446_v29 = vmax.f32 %v1344_v25, 0.0 }
 0x1b1   : > { %v1162_v30 = vpop.f32.mrf.mxu0  ;;  %v1346_v31 = vpop.f32.mrf.mxu1 }
 0x1b2   : > { %v2687_v32 = vpack.c.bf16 %v1400_v28, %v1400_v28  ;;  %v2733_v33 = vpack.c.bf16 %v1446_v29, %v1446_v29  ;;  %v1163_v35 = vadd.f32 %v3007_v34, %v1162_v30  ;;  %v1347_v43 = vadd.f32 %v3007_v34, %v1346_v31 }
 0x1b3   : > { %v1164_v36 = vpop.f32.mrf.mxu0  ;;  %v1348_v37 = vpop.f32.mrf.mxu1 }
 0x1b4   : > { %1861 = vst.msk [vmem:[%s3369_s12 + $0xa8] sm:$0xf] %vm1818_vm2, %v2687_v32  ;;  %1907 = vst.msk [vmem:[%s3369_s12 + $0x160] sm:$0xf] %vm1818_vm2, %v2733_v33  ;;  %v1401_v38 = vmax.f32 %v1163_v35, 0.0  ;;  %v1447_v39 = vmax.f32 %v1347_v43, 0.0 }
 0x1b5   : > { %v1167_v40 = vpop.f32.mrf.mxu0  ;;  %v1351_v41 = vpop.f32.mrf.mxu1 }
 0x1b6   : > { %v2688_v42 = vpack.c.bf16 %v1401_v38, %v1401_v38  ;;  %v2734_v44 = vpack.c.bf16 %v1447_v39, %v1447_v39  ;;  %v1168_v45 = vadd.f32 %v3007_v34, %v1167_v40  ;;  %v1352_v46 = vadd.f32 %v3007_v34, %v1351_v41 }
 0x1b7   : > { %v1169_v47 = vpop.f32.mrf.mxu0  ;;  %v1353_v48 = vpop.f32.mrf.mxu1 }
 0x1b8   : > { %1862 = vst.msk [vmem:[%s3369_s12 + $0xac] sm:$0xf] %vm1818_vm2, %v2688_v42  ;;  %1908 = vst.msk [vmem:[%s3369_s12 + $0x164] sm:$0xf] %vm1818_vm2, %v2734_v44  ;;  %v1402_v49 = vmax.f32 %v1168_v45, 0.0  ;;  %v1448_v50 = vmax.f32 %v1352_v46, 0.0 }
 0x1b9   : > { %v1170_v51 = vpop.f32.mrf.mxu0  ;;  %v1354_v52 = vpop.f32.mrf.mxu1 }
 0x1ba   : > { %v2689_v53 = vpack.c.bf16 %v1402_v49, %v1402_v49  ;;  %v2735_v54 = vpack.c.bf16 %v1448_v50, %v1448_v50  ;;  %v1171_v55 = vadd.f32 %v3007_v34, %v1170_v51  ;;  %v1355_v56 = vadd.f32 %v3007_v34, %v1354_v52 }
 0x1bb   : > { %v1172_v57 = vpop.f32.mrf.mxu0  ;;  %v1356_v58 = vpop.f32.mrf.mxu1 }
 0x1bc   : > { %1863 = vst.msk [vmem:[%s3369_s12 + $0xb0] sm:$0xf] %vm1818_vm2, %v2689_v53  ;;  %1909 = vst.msk [vmem:[%s3369_s12 + $0x168] sm:$0xf] %vm1818_vm2, %v2735_v54  ;;  %v1403_v59 = vmax.f32 %v1171_v55, 0.0  ;;  %v1449_v60 = vmax.f32 %v1355_v56, 0.0 }
 0x1bd   : > { %1917 = sbr.rel (!%p3142_p4) target bundleno = 531 (0x213), region = 36 }
 0x1be   : > { %v2690_v61 = vpack.c.bf16 %v1403_v59, %v1403_v59  ;;  %v2736_v62 = vpack.c.bf16 %v1449_v60, %v1449_v60 }
 0x1c0   : > { %1864 = vst.msk [vmem:[%s3369_s12 + $0xb4] sm:$0xf] %vm1818_vm2, %v2690_v61  ;;  %1910 = vst.msk [vmem:[%s3369_s12 + $0x16c] sm:$0xf] %vm1818_vm2, %v2736_v62 }
 0x1c2   : > { %s3851_s14 = smov (!%p1920_p8, %s1919_s14), 92 }
 0x1c3   : > { %s2629_s23 = sshll.u32 %s3851_s14, 6 }
 0x1c4   : > { %p2632_p9 = scmp.eq.s32.totalorder %s2629_s23, 0 }
 0x1c5   : > { %s3653_s24 = sshrl.u32 (!%p2632_p9), %s3851_s14, 6 }
 0x1c6   : > { %1928 = sbr.rel (%p2632_p9) target bundleno = 531 (0x213), region = 40  ;;  %p2633_p10 = scmp.le.s32.totalorder (!%p2632_p9), %s3653_s24, 0 }
 0x1cb   : > { %2335 = sbr.rel (%p2633_p10) target bundleno = 514 (0x202), region = 112  ;;  %s3844_s15 = smov (!%p2633_p10), %s3647_s22 }
 0x1cc   : > { %s3845_s20 = smov (!%p2633_p10), %s3369_s12  ;;  %s3662_s25 = smov (!%p2633_p10), 0  }
 0x1cd   : > { %s3664_s26 = smov (!%p2633_p10), 0  }
 0x1d0 LB: >> { %v1945_v63 = vld [vmem:[%s3070_s20] sm:$0xf]  ;;  %v1947_v0 = vld [vmem:[%s3070_s20 + $0x4] sm:$0xf]  ;;  %v1949_v1 = vld [vmem:[%s3070_s20 + $0x8] sm:$0xf]  ;;  %s3078_s26 = sphi %s3664_s26, %s1939_s26   ;;  %s3074_s25 = sphi %s3662_s25, %s3846_s25   ;;  %s3070_s20 = sphi %s3845_s20, %s2078_s20   ;;  %s3066_s15 = sphi %s3844_s15, %s2079_s15  }
 0x1d1   : >> { %1946 = vst [vmem:[%s3066_s15] sm:$0xf] %v1945_v63  ;;  %1948 = vst [vmem:[%s3066_s15 + $0x4] sm:$0xf] %v1947_v0  ;;  %v1951_v2 = vld [vmem:[%s3070_s20 + $0xc] sm:$0xf]  ;;  %s2073_s27 = sadd.s32 1, %s3074_s25 }
 0x1d2   : >> { %1950 = vst [vmem:[%s3066_s15 + $0x8] sm:$0xf] %v1949_v1  ;;  %v1953_v3 = vld [vmem:[%s3070_s20 + $0x10] sm:$0xf]  ;;  %v1955_v4 = vld [vmem:[%s3070_s20 + $0x14] sm:$0xf]  ;;  %p2074_p11 = scmp.ge.s32.totalorder %s2073_s27, %s3653_s24 }
 0x1d3   : >> { %1952 = vst [vmem:[%s3066_s15 + $0xc] sm:$0xf] %v1951_v2  ;;  %1954 = vst [vmem:[%s3066_s15 + $0x10] sm:$0xf] %v1953_v3  ;;  %v1957_v5 = vld [vmem:[%s3070_s20 + $0x18] sm:$0xf] }
 0x1d4   : >> { %1956 = vst [vmem:[%s3066_s15 + $0x14] sm:$0xf] %v1955_v4  ;;  %v1959_v6 = vld [vmem:[%s3070_s20 + $0x1c] sm:$0xf]  ;;  %v1961_v7 = vld [vmem:[%s3070_s20 + $0x20] sm:$0xf] }
 0x1d5   : >> { %1958 = vst [vmem:[%s3066_s15 + $0x18] sm:$0xf] %v1957_v5  ;;  %1960 = vst [vmem:[%s3066_s15 + $0x1c] sm:$0xf] %v1959_v6  ;;  %v1963_v8 = vld [vmem:[%s3070_s20 + $0x24] sm:$0xf] }
 0x1d6   : >> { %1962 = vst [vmem:[%s3066_s15 + $0x20] sm:$0xf] %v1961_v7  ;;  %v1965_v9 = vld [vmem:[%s3070_s20 + $0x28] sm:$0xf]  ;;  %v1967_v10 = vld [vmem:[%s3070_s20 + $0x2c] sm:$0xf] }
 0x1d7   : >> { %1964 = vst [vmem:[%s3066_s15 + $0x24] sm:$0xf] %v1963_v8  ;;  %1966 = vst [vmem:[%s3066_s15 + $0x28] sm:$0xf] %v1965_v9  ;;  %v1969_v11 = vld [vmem:[%s3070_s20 + $0x30] sm:$0xf] }
 0x1d8   : >> { %1968 = vst [vmem:[%s3066_s15 + $0x2c] sm:$0xf] %v1967_v10  ;;  %v1971_v12 = vld [vmem:[%s3070_s20 + $0x34] sm:$0xf]  ;;  %v1973_v13 = vld [vmem:[%s3070_s20 + $0x38] sm:$0xf] }
 0x1d9   : >> { %1970 = vst [vmem:[%s3066_s15 + $0x30] sm:$0xf] %v1969_v11  ;;  %1972 = vst [vmem:[%s3066_s15 + $0x34] sm:$0xf] %v1971_v12  ;;  %v1975_v14 = vld [vmem:[%s3070_s20 + $0x3c] sm:$0xf] }
 0x1da   : >> { %1974 = vst [vmem:[%s3066_s15 + $0x38] sm:$0xf] %v1973_v13  ;;  %v1977_v15 = vld [vmem:[%s3070_s20 + $0x40] sm:$0xf]  ;;  %v1979_v16 = vld [vmem:[%s3070_s20 + $0x44] sm:$0xf] }
 0x1db   : >> { %1976 = vst [vmem:[%s3066_s15 + $0x3c] sm:$0xf] %v1975_v14  ;;  %1978 = vst [vmem:[%s3066_s15 + $0x40] sm:$0xf] %v1977_v15  ;;  %v1981_v17 = vld [vmem:[%s3070_s20 + $0x48] sm:$0xf] }
 0x1dc   : >> { %1980 = vst [vmem:[%s3066_s15 + $0x44] sm:$0xf] %v1979_v16  ;;  %v1983_v18 = vld [vmem:[%s3070_s20 + $0x4c] sm:$0xf]  ;;  %v1985_v19 = vld [vmem:[%s3070_s20 + $0x50] sm:$0xf] }
 0x1dd   : >> { %1982 = vst [vmem:[%s3066_s15 + $0x48] sm:$0xf] %v1981_v17  ;;  %1984 = vst [vmem:[%s3066_s15 + $0x4c] sm:$0xf] %v1983_v18  ;;  %v1987_v20 = vld [vmem:[%s3070_s20 + $0x54] sm:$0xf] }
 0x1de   : >> { %1986 = vst [vmem:[%s3066_s15 + $0x50] sm:$0xf] %v1985_v19  ;;  %v1989_v21 = vld [vmem:[%s3070_s20 + $0x58] sm:$0xf]  ;;  %v1991_v22 = vld [vmem:[%s3070_s20 + $0x5c] sm:$0xf] }
 0x1df   : >> { %1988 = vst [vmem:[%s3066_s15 + $0x54] sm:$0xf] %v1987_v20  ;;  %1990 = vst [vmem:[%s3066_s15 + $0x58] sm:$0xf] %v1989_v21  ;;  %v1993_v23 = vld [vmem:[%s3070_s20 + $0x60] sm:$0xf] }
 0x1e0   : >> { %1992 = vst [vmem:[%s3066_s15 + $0x5c] sm:$0xf] %v1991_v22  ;;  %v1995_v24 = vld [vmem:[%s3070_s20 + $0x64] sm:$0xf]  ;;  %v1997_v25 = vld [vmem:[%s3070_s20 + $0x68] sm:$0xf] }
 0x1e1   : >> { %1994 = vst [vmem:[%s3066_s15 + $0x60] sm:$0xf] %v1993_v23  ;;  %1996 = vst [vmem:[%s3066_s15 + $0x64] sm:$0xf] %v1995_v24  ;;  %v1999_v26 = vld [vmem:[%s3070_s20 + $0x6c] sm:$0xf] }
 0x1e2   : >> { %1998 = vst [vmem:[%s3066_s15 + $0x68] sm:$0xf] %v1997_v25  ;;  %v2001_v27 = vld [vmem:[%s3070_s20 + $0x70] sm:$0xf]  ;;  %v2003_v28 = vld [vmem:[%s3070_s20 + $0x74] sm:$0xf] }
 0x1e3   : >> { %2000 = vst [vmem:[%s3066_s15 + $0x6c] sm:$0xf] %v1999_v26  ;;  %2002 = vst [vmem:[%s3066_s15 + $0x70] sm:$0xf] %v2001_v27  ;;  %v2005_v29 = vld [vmem:[%s3070_s20 + $0x78] sm:$0xf] }
 0x1e4   : >> { %2004 = vst [vmem:[%s3066_s15 + $0x74] sm:$0xf] %v2003_v28  ;;  %v2007_v30 = vld [vmem:[%s3070_s20 + $0x7c] sm:$0xf]  ;;  %v2009_v31 = vld [vmem:[%s3070_s20 + $0x80] sm:$0xf] }
 0x1e5   : >> { %2006 = vst [vmem:[%s3066_s15 + $0x78] sm:$0xf] %v2005_v29  ;;  %2008 = vst [vmem:[%s3066_s15 + $0x7c] sm:$0xf] %v2007_v30  ;;  %v2011_v32 = vld [vmem:[%s3070_s20 + $0x84] sm:$0xf] }
 0x1e6   : >> { %2010 = vst [vmem:[%s3066_s15 + $0x80] sm:$0xf] %v2009_v31  ;;  %v2013_v33 = vld [vmem:[%s3070_s20 + $0x88] sm:$0xf]  ;;  %v2015_v34 = vld [vmem:[%s3070_s20 + $0x8c] sm:$0xf] }
 0x1e7   : >> { %2012 = vst [vmem:[%s3066_s15 + $0x84] sm:$0xf] %v2011_v32  ;;  %2014 = vst [vmem:[%s3066_s15 + $0x88] sm:$0xf] %v2013_v33  ;;  %v2017_v35 = vld [vmem:[%s3070_s20 + $0x90] sm:$0xf] }
 0x1e8   : >> { %2016 = vst [vmem:[%s3066_s15 + $0x8c] sm:$0xf] %v2015_v34  ;;  %v2019_v43 = vld [vmem:[%s3070_s20 + $0x94] sm:$0xf]  ;;  %v2021_v36 = vld [vmem:[%s3070_s20 + $0x98] sm:$0xf] }
 0x1e9   : >> { %2018 = vst [vmem:[%s3066_s15 + $0x90] sm:$0xf] %v2017_v35  ;;  %2020 = vst [vmem:[%s3066_s15 + $0x94] sm:$0xf] %v2019_v43  ;;  %v2023_v37 = vld [vmem:[%s3070_s20 + $0x9c] sm:$0xf] }
 0x1ea   : >> { %2022 = vst [vmem:[%s3066_s15 + $0x98] sm:$0xf] %v2021_v36  ;;  %v2025_v38 = vld [vmem:[%s3070_s20 + $0xa0] sm:$0xf]  ;;  %v2027_v39 = vld [vmem:[%s3070_s20 + $0xa4] sm:$0xf] }
 0x1eb   : >> { %2024 = vst [vmem:[%s3066_s15 + $0x9c] sm:$0xf] %v2023_v37  ;;  %2026 = vst [vmem:[%s3066_s15 + $0xa0] sm:$0xf] %v2025_v38  ;;  %v2029_v40 = vld [vmem:[%s3070_s20 + $0xa8] sm:$0xf] }
 0x1ec   : >> { %2028 = vst [vmem:[%s3066_s15 + $0xa4] sm:$0xf] %v2027_v39  ;;  %v2031_v41 = vld [vmem:[%s3070_s20 + $0xac] sm:$0xf]  ;;  %v2033_v42 = vld [vmem:[%s3070_s20 + $0xb0] sm:$0xf] }
 0x1ed   : >> { %2030 = vst [vmem:[%s3066_s15 + $0xa8] sm:$0xf] %v2029_v40  ;;  %2032 = vst [vmem:[%s3066_s15 + $0xac] sm:$0xf] %v2031_v41  ;;  %v2035_v44 = vld [vmem:[%s3070_s20 + $0xb4] sm:$0xf] }
 0x1ee   : >> { %2034 = vst [vmem:[%s3066_s15 + $0xb0] sm:$0xf] %v2033_v42  ;;  %v2037_v45 = vld [vmem:[%s3070_s20 + $0xb8] sm:$0xf]  ;;  %v2039_v46 = vld [vmem:[%s3070_s20 + $0xbc] sm:$0xf] }
 0x1ef   : >> { %2036 = vst [vmem:[%s3066_s15 + $0xb4] sm:$0xf] %v2035_v44  ;;  %2038 = vst [vmem:[%s3066_s15 + $0xb8] sm:$0xf] %v2037_v45  ;;  %v2041_v47 = vld [vmem:[%s3070_s20 + $0xc0] sm:$0xf] }
 0x1f0   : >> { %2040 = vst [vmem:[%s3066_s15 + $0xbc] sm:$0xf] %v2039_v46  ;;  %v2043_v48 = vld [vmem:[%s3070_s20 + $0xc4] sm:$0xf]  ;;  %v2045_v49 = vld [vmem:[%s3070_s20 + $0xc8] sm:$0xf] }
 0x1f1   : >> { %2042 = vst [vmem:[%s3066_s15 + $0xc0] sm:$0xf] %v2041_v47  ;;  %2044 = vst [vmem:[%s3066_s15 + $0xc4] sm:$0xf] %v2043_v48  ;;  %v2047_v50 = vld [vmem:[%s3070_s20 + $0xcc] sm:$0xf] }
 0x1f2   : >> { %2046 = vst [vmem:[%s3066_s15 + $0xc8] sm:$0xf] %v2045_v49  ;;  %v2049_v51 = vld [vmem:[%s3070_s20 + $0xd0] sm:$0xf]  ;;  %v2051_v52 = vld [vmem:[%s3070_s20 + $0xd4] sm:$0xf] }
 0x1f3   : >> { %2048 = vst [vmem:[%s3066_s15 + $0xcc] sm:$0xf] %v2047_v50  ;;  %2050 = vst [vmem:[%s3066_s15 + $0xd0] sm:$0xf] %v2049_v51  ;;  %v2053_v53 = vld [vmem:[%s3070_s20 + $0xd8] sm:$0xf] }
 0x1f4   : >> { %2052 = vst [vmem:[%s3066_s15 + $0xd4] sm:$0xf] %v2051_v52  ;;  %v2055_v54 = vld [vmem:[%s3070_s20 + $0xdc] sm:$0xf]  ;;  %v2057_v55 = vld [vmem:[%s3070_s20 + $0xe0] sm:$0xf] }
 0x1f5   : >> { %2054 = vst [vmem:[%s3066_s15 + $0xd8] sm:$0xf] %v2053_v53  ;;  %2056 = vst [vmem:[%s3066_s15 + $0xdc] sm:$0xf] %v2055_v54  ;;  %v2059_v56 = vld [vmem:[%s3070_s20 + $0xe4] sm:$0xf] }
 0x1f6   : >> { %2058 = vst [vmem:[%s3066_s15 + $0xe0] sm:$0xf] %v2057_v55  ;;  %v2061_v57 = vld [vmem:[%s3070_s20 + $0xe8] sm:$0xf]  ;;  %v2063_v58 = vld [vmem:[%s3070_s20 + $0xec] sm:$0xf] }
 0x1f7   : >> { %2060 = vst [vmem:[%s3066_s15 + $0xe4] sm:$0xf] %v2059_v56  ;;  %2062 = vst [vmem:[%s3066_s15 + $0xe8] sm:$0xf] %v2061_v57  ;;  %v2065_v59 = vld [vmem:[%s3070_s20 + $0xf0] sm:$0xf] }
 0x1f8   : >> { %2064 = vst [vmem:[%s3066_s15 + $0xec] sm:$0xf] %v2063_v58  ;;  %v2067_v60 = vld [vmem:[%s3070_s20 + $0xf4] sm:$0xf]  ;;  %v2069_v61 = vld [vmem:[%s3070_s20 + $0xf8] sm:$0xf] }
 0x1f9   : >> { %2066 = vst [vmem:[%s3066_s15 + $0xf0] sm:$0xf] %v2065_v59  ;;  %2068 = vst [vmem:[%s3066_s15 + $0xf4] sm:$0xf] %v2067_v60  ;;  %v2071_v62 = vld [vmem:[%s3070_s20 + $0xfc] sm:$0xf] }
 0x1fa   : >> { %2070 = vst [vmem:[%s3066_s15 + $0xf8] sm:$0xf] %v2069_v61  ;;  %2072 = vst [vmem:[%s3066_s15 + $0xfc] sm:$0xf] %v2071_v62  ;;  %s3853_s27 = smov (%p2074_p11, %s2073_s27), 0  ;;  %s1939_s26 = sadd.s32 1, %s3078_s26  }
 0x1fb   : >> { %s2634_s28 = sshll.u32 %s3853_s27, 8  ;;  %p1938_p12 = scmp.ge.s32.totalorder %s1939_s26, %s3653_s24 }
 0x1fc   : >> { %s2078_s20 = scalar_lea.vmem %s3369_s12, %s2634_s28 [#allocation2]   ;;  %s2079_s15 = scalar_lea.vmem %s3647_s22, %s2634_s28  }
 0x1fd   : >> { %s3846_s25 = smov %s3853_s27  ;;  %1941 = sbr.rel (!%p1938_p12) target bundleno = 464 (0x1d0), region = 118 }
 0x202 PF: > { %s3821_s29 = sand.u32 63, %s3851_s14   ;;  %s2738_s30 = sshll.u32 %s3653_s24, 8 }
 0x203   : > { %s2084_s4 = scalar_lea.vmem %s3369_s12, %s2738_s30 [#allocation2]   ;;  %s2086_s5 = scalar_lea.vmem %s3647_s22, %s2738_s30  }
 0x204   : > { %p2639_p13 = scmp.le.s32.totalorder %s3821_s29, 0 }
 0x205   : > { %s3080_s6 = smov (!%p2639_p13), %s2086_s5   ;;  %s3084_s8 = smov (!%p2639_p13), %s2084_s4  }
 0x206   : > { %2349 = sbr.rel (%p2639_p13) target bundleno = 531 (0x213), region = 123  ;;  %s3088_s9 = smov (!%p2639_p13), 0  }
 0x207   : > { %s3092_s10 = smov (!%p2639_p13), 0  }
 0x20b LB: >> { %v2096_v63 = vld [vmem:[%s3086_s8] sm:$0xf]  ;;  %s2098_s7 = sadd.s32 1, %s3090_s9  ;;  %s2090_s10 = sadd.s32 1, %s3094_s10   ;;  %s3094_s10 = sphi %s3092_s10, %s2090_s10   ;;  %s3090_s9 = sphi %s3088_s9, %s3089_s9   ;;  %s3086_s8 = sphi %s3084_s8, %s2103_s8   ;;  %s3082_s6 = sphi %s3080_s6, %s2104_s6  }
 0x20c   : >> { %2097 = vst [vmem:[%s3082_s6] sm:$0xf] %v2096_v63  ;;  %p2099_p0 = scmp.ge.s32.totalorder %s2098_s7, %s3821_s29  ;;  %p2089_p1 = scmp.ge.s32.totalorder %s2090_s10, %s3821_s29 }
 0x20e   : >> { %s3855_s7 = smov (%p2099_p0, %s2098_s7), 0  ;;  %2092 = sbr.rel (!%p2089_p1) target bundleno = 523 (0x20b), region = 129 }
 0x20f   : >> { %s2640_s12 = sshll.u32 %s3855_s7, 2  ;;  %s3089_s9 = smov %s3855_s7  }
 0x210   : >> { %s2103_s8 = scalar_lea.vmem %s2084_s4, %s2640_s12 [#allocation2]   ;;  %s2104_s6 = scalar_lea.vmem %s2086_s5, %s2640_s12  }
 0x213 PF: > { %p10_p2 = scmp.ge.s32.totalorder %s3132_s16, 4   ;;  %s3847_s12 = smov %s3058_s13 }
 0x214   : > { %s3848_s13 = smov %s3140_s19  ;;  %s3849_s14 = smov %s3132_s16 }
 0x215   :  { %12 = sbr.rel (!%p10_p2) target bundleno = 2 (0x2), region = 140 }

// kernel: forward.8
= control target key start
LH: loop header
LB: loop body
LE: loop exit
PB: predicated region body
PF: predicated region fallthrough
CT: control target
= control target key end

     0   :  { %v1127_v0 = vmov 0   ;;  %vm332_vm0 = vcmask 130048   ;;  %vm823_vm1 = vcmask 125952   ;;  %vm866_vm2 = vcmask 122880   ;;  %s1545_s1 = inlined_call_operand.vmem [shape: bf16[144,16], index: 1, kind: input, shape index: {}]   ;;  %s1546_s0 = inlined_call_operand.vmem [shape: bf16[338,144], index: 0, kind: input, shape index: {}]   ;;  %s1547_s2 = inlined_call_operand.vmem [shape: f32[1,16], index: 2, kind: input, shape index: {}]   ;;  %s1548_s3 = inlined_call_operand.vmem [shape: bf16[338,16], index: 3, kind: output, shape index: {}]  }
   0x1   :  { %399 = vmatprep.subr.bf16.mxu0 %v1127_v0  ;;  %1034 = vmatprep.subr.bf16.mxu1 %v1127_v0  ;;  %v1053_v1 = vld [vmem:[%s1545_s1 + $0x38] sm:$0xff]   ;;  %v1054_v2 = vld [vmem:[%s1545_s1 + $0x30] sm:$0xff]   ;;  %v1055_v3 = vld [vmem:[%s1545_s1 + $0x28] sm:$0xff]  }
   0x2   :  { %400 = vmatpush1.bf16.msra.mxu0 %v1053_v1  ;;  %1043 = vmatpush1.bf16.msra.mxu1 %v1053_v1  ;;  %v1056_v4 = vld [vmem:[%s1545_s1 + $0x20] sm:$0xff]   ;;  %v1067_v6 = vld [vmem:[%s1546_s0 + $0xb4] ss:$8 sps:$4 sm:$0xff]   ;;  %v1059_v9 = vld [vmem:[%s1545_s1 + $0x8] sm:$0xff]  }
   0x3   :  { %401 = vmatprep.subr.bf16.mxu0 %v1127_v0  ;;  %1035 = vmatprep.subr.bf16.mxu1 %v1127_v0  ;;  %v1064_v5 = vld [vmem:[%s1546_s0 + $0x4] ss:$8 sps:$4 sm:$0xff]   ;;  %v1057_v7 = vld [vmem:[%s1545_s1 + $0x18] sm:$0xff]   ;;  %v1058_v8 = vld [vmem:[%s1545_s1 + $0x10] sm:$0xff]  }
   0x4   :  { %926 = vmatprep.mubr.msk.bf16.mxu0 %vm332_vm0, %v1064_v5  ;;  %937 = vmatprep.mubr.msk.bf16.mxu1 %vm332_vm0, %v1067_v6  ;;  %v1060_v10 = vld [vmem:[%s1545_s1] sm:$0xff]   ;;  %v1065_v13 = vld [vmem:[%s1546_s0 + $0xb0] ss:$8 sps:$4 sm:$0xff]   ;;  %v1068_v14 = vld [vmem:[%s1546_s0 + $0x14] ss:$8 sps:$4 sm:$0xff]  }
   0x5   :  { %v1061_v11 = vld [vmem:[%s1545_s1 + $0x40] sm:$0xff]   ;;  %v1072_v16 = vld [vmem:[%s1546_s0 + $0x10] ss:$8 sps:$4 sm:$0xff]   ;;  %v1076_v19 = vld [vmem:[%s1546_s0 + $0xd4] ss:$8 sps:$4 sm:$0xff]  }
   0x6   :  { %402 = vmatpush1.bf16.msra.mxu0 %v1054_v2  ;;  %1044 = vmatpush1.bf16.msra.mxu1 %v1054_v2  ;;  %v1062_v12 = vld [vmem:[%s1546_s0] ss:$8 sps:$4 sm:$0xff]   ;;  %v1070_v15 = vld [vmem:[%s1546_s0 + $0xc4] ss:$8 sps:$4 sm:$0xff]   ;;  %v1079_v21 = vld [vmem:[%s1546_s0 + $0xd0] ss:$8 sps:$4 sm:$0xff]  }
   0x7   :  { %403 = vmatprep.subr.bf16.mxu0 %v1127_v0  ;;  %1036 = vmatprep.subr.bf16.mxu1 %v1127_v0  ;;  %v1073_v17 = vld [vmem:[%s1546_s0 + $0xc0] ss:$8 sps:$4 sm:$0xff]   ;;  %v1074_v18 = vld [vmem:[%s1546_s0 + $0x24] ss:$8 sps:$4 sm:$0xff]   ;;  %v1080_v22 = vld [vmem:[%s1546_s0 + $0x34] ss:$8 sps:$4 sm:$0xff]  }
   0x8   :  { %v1078_v20 = vld [vmem:[%s1546_s0 + $0x20] ss:$8 sps:$4 sm:$0xff]   ;;  %v1082_v23 = vld [vmem:[%s1546_s0 + $0xe4] ss:$8 sps:$4 sm:$0xff]   ;;  %v1084_v24 = vld [vmem:[%s1546_s0 + $0x30] ss:$8 sps:$4 sm:$0xff]  }
   0x9   :  { %v1085_v25 = vld [vmem:[%s1546_s0 + $0xe0] ss:$8 sps:$4 sm:$0xff]   ;;  %v1086_v26 = vld [vmem:[%s1546_s0 + $0x44] ss:$8 sps:$4 sm:$0xff]   ;;  %v1088_v27 = vld [vmem:[%s1546_s0 + $0xf4] ss:$8 sps:$4 sm:$0xff]  }
   0xa   :  { %404 = vmatpush1.bf16.msra.mxu0 %v1055_v3  ;;  %1045 = vmatpush1.bf16.msra.mxu1 %v1055_v3  ;;  %v1090_v28 = vld [vmem:[%s1546_s0 + $0x40] ss:$8 sps:$4 sm:$0xff]   ;;  %v1091_v29 = vld [vmem:[%s1546_s0 + $0xf0] ss:$8 sps:$4 sm:$0xff]   ;;  %v1092_v30 = vld [vmem:[%s1546_s0 + $0x54] ss:$8 sps:$4 sm:$0xff]  }
   0xb   :  { %405 = vmatprep.subr.bf16.mxu0 %v1127_v0  ;;  %1037 = vmatprep.subr.bf16.mxu1 %v1127_v0  ;;  %v1094_v31 = vld [vmem:[%s1546_s0 + $0x104] ss:$8 sps:$4 sm:$0xff]   ;;  %v1096_v32 = vld [vmem:[%s1546_s0 + $0x50] ss:$8 sps:$4 sm:$0xff]   ;;  %v1097_v33 = vld [vmem:[%s1546_s0 + $0x100] ss:$8 sps:$4 sm:$0xff]  }
   0xc   :  { %v1098_v34 = vld [vmem:[%s1546_s0 + $0x64] ss:$8 sps:$4 sm:$0xff]   ;;  %v1100_v35 = vld [vmem:[%s1546_s0 + $0x114] ss:$8 sps:$4 sm:$0xff]   ;;  %v1102_v36 = vld [vmem:[%s1546_s0 + $0x60] ss:$8 sps:$4 sm:$0xff]  }
   0xd   :  { %v1103_v37 = vld [vmem:[%s1546_s0 + $0x110] ss:$8 sps:$4 sm:$0xff]   ;;  %v1104_v38 = vld [vmem:[%s1546_s0 + $0x74] ss:$8 sps:$4 sm:$0xff]   ;;  %v1106_v39 = vld [vmem:[%s1546_s0 + $0x124] ss:$8 sps:$4 sm:$0xff]  }
   0xe   :  { %406 = vmatpush1.bf16.msra.mxu0 %v1056_v4  ;;  %1046 = vmatpush1.bf16.msra.mxu1 %v1056_v4  ;;  %v1108_v40 = vld [vmem:[%s1546_s0 + $0x70] ss:$8 sps:$4 sm:$0xff]   ;;  %v1109_v41 = vld [vmem:[%s1546_s0 + $0x120] ss:$8 sps:$4 sm:$0xff]   ;;  %v1110_v42 = vld [vmem:[%s1546_s0 + $0x84] ss:$8 sps:$4 sm:$0xff]  }
   0xf   :  { %407 = vmatprep.subr.bf16.mxu0 %v1127_v0  ;;  %1038 = vmatprep.subr.bf16.mxu1 %v1127_v0  ;;  %v1112_v43 = vld [vmem:[%s1546_s0 + $0x134] ss:$8 sps:$4 sm:$0xff]   ;;  %v1114_v44 = vld [vmem:[%s1546_s0 + $0x80] ss:$8 sps:$4 sm:$0xff]   ;;  %v1115_v45 = vld [vmem:[%s1546_s0 + $0x130] ss:$8 sps:$4 sm:$0xff]  }
  0x10   :  { %v1116_v46 = vld [vmem:[%s1546_s0 + $0x94] ss:$8 sps:$4 sm:$0xff]   ;;  %v1118_v47 = vld [vmem:[%s1546_s0 + $0x144] ss:$8 sps:$4 sm:$0xff]   ;;  %v1120_v49 = vld [vmem:[%s1546_s0 + $0x90] ss:$8 sps:$4 sm:$0xff]  }
  0x11   :  { %v57_v48 = vld [vmem:[%s1546_s0 + $0x150] sm:$0x11]  ;;  %v1121_v50 = vld [vmem:[%s1546_s0 + $0x140] ss:$8 sps:$4 sm:$0xff]   ;;  %v1122_v51 = vld [vmem:[%s1546_s0 + $0xa4] ss:$8 sps:$4 sm:$0xff]  }
  0x12   :  { %408 = vmatpush1.bf16.msra.mxu0 %v1057_v7  ;;  %1047 = vmatpush1.bf16.msra.mxu1 %v1057_v7  ;;  %v916_v52 = vcombine.high %v57_v48, %v57_v48  ;;  %v1125_v53 = vld [vmem:[%s1546_s0 + $0xa0] ss:$8 sps:$4 sm:$0xff]   ;;  %v915_v54 = vcombine.low %v57_v48, %v57_v48 }
  0x13   :  { %409 = vmatprep.subr.bf16.mxu0 %v1127_v0  ;;  %1039 = vmatprep.subr.bf16.mxu1 %v1127_v0  ;;  %v1329_v55 = vld [vmem:[%s1547_s2] ss:$0 sm:$0xff] }
  0x16   :  { %410 = vmatpush1.bf16.msra.mxu0 %v1058_v8  ;;  %1048 = vmatpush1.bf16.msra.mxu1 %v1058_v8 }
  0x17   :  { %411 = vmatprep.subr.bf16.mxu0 %v1127_v0  ;;  %1040 = vmatprep.subr.bf16.mxu1 %v1127_v0 }
  0x1a   :  { %412 = vmatpush1.bf16.msra.mxu0 %v1059_v9  ;;  %1049 = vmatpush1.bf16.msra.mxu1 %v1059_v9 }
  0x1b   :  { %413 = vmatprep.subr.bf16.mxu0 %v1127_v0  ;;  %1041 = vmatprep.subr.bf16.mxu1 %v1127_v0 }
  0x1e   :  { %414 = vmatpush1.bf16.msra.mxu0 %v1060_v10  ;;  %1050 = vmatpush1.bf16.msra.mxu1 %v1060_v10 }
  0x1f   :  { %429 = vmatprep.subr.bf16.mxu0 %v1127_v0  ;;  %1042 = vmatprep.subr.bf16.mxu1 %v1127_v0 }
  0x22   :  { %430 = vmatpush2.bf16.msra.mxu0 %v1061_v11  ;;  %1051 = vmatpush2.bf16.msra.mxu1 %v1061_v11 }
  0x25   :  { %432 = vmatmul.mubr.bf16.vlgmr.msra.gmra.mxu0 %v1062_v12  ;;  %520 = vmatmul.mubr.bf16.vlgmr.msra.gmra.mxu1 %v1065_v13 }
  0x26   :  { %927 = vmatprep.mubr.msk.bf16.mxu0 %vm332_vm0, %v1068_v14  ;;  %938 = vmatprep.mubr.msk.bf16.mxu1 %vm332_vm0, %v1070_v15 }
  0x2d   :  { %440 = vmatmul.mubr.bf16.gmra.mxu0 %v1072_v16  ;;  %528 = vmatmul.mubr.bf16.gmra.mxu1 %v1073_v17 }
  0x2e   :  { %928 = vmatprep.mubr.msk.bf16.mxu0 %vm332_vm0, %v1074_v18  ;;  %939 = vmatprep.mubr.msk.bf16.mxu1 %vm332_vm0, %v1076_v19 }
  0x35   :  { %448 = vmatmul.mubr.bf16.gmra.mxu0 %v1078_v20  ;;  %536 = vmatmul.mubr.bf16.gmra.mxu1 %v1079_v21 }
  0x36   :  { %929 = vmatprep.mubr.msk.bf16.mxu0 %vm332_vm0, %v1080_v22  ;;  %940 = vmatprep.mubr.msk.bf16.mxu1 %vm332_vm0, %v1082_v23 }
  0x3d   :  { %456 = vmatmul.mubr.bf16.gmra.mxu0 %v1084_v24  ;;  %544 = vmatmul.mubr.bf16.gmra.mxu1 %v1085_v25 }
  0x3e   :  { %930 = vmatprep.mubr.msk.bf16.mxu0 %vm332_vm0, %v1086_v26  ;;  %941 = vmatprep.mubr.msk.bf16.mxu1 %vm332_vm0, %v1088_v27 }
  0x45   :  { %464 = vmatmul.mubr.bf16.gmra.mxu0 %v1090_v28  ;;  %552 = vmatmul.mubr.bf16.gmra.mxu1 %v1091_v29 }
  0x46   :  { %931 = vmatprep.mubr.msk.bf16.mxu0 %vm332_vm0, %v1092_v30  ;;  %942 = vmatprep.mubr.msk.bf16.mxu1 %vm332_vm0, %v1094_v31 }
  0x4d   :  { %472 = vmatmul.mubr.bf16.gmra.mxu0 %v1096_v32  ;;  %560 = vmatmul.mubr.bf16.gmra.mxu1 %v1097_v33 }
  0x4e   :  { %932 = vmatprep.mubr.msk.bf16.mxu0 %vm332_vm0, %v1098_v34  ;;  %943 = vmatprep.mubr.msk.bf16.mxu1 %vm332_vm0, %v1100_v35 }
  0x55   :  { %480 = vmatmul.mubr.bf16.gmra.mxu0 %v1102_v36  ;;  %568 = vmatmul.mubr.bf16.gmra.mxu1 %v1103_v37 }
  0x56   :  { %933 = vmatprep.mubr.msk.bf16.mxu0 %vm332_vm0, %v1104_v38  ;;  %944 = vmatprep.mubr.msk.bf16.mxu1 %vm332_vm0, %v1106_v39 }
  0x5d   :  { %488 = vmatmul.mubr.bf16.gmra.mxu0 %v1108_v40  ;;  %576 = vmatmul.mubr.bf16.gmra.mxu1 %v1109_v41 }
  0x5e   :  { %934 = vmatprep.mubr.msk.bf16.mxu0 %vm332_vm0, %v1110_v42  ;;  %945 = vmatprep.mubr.msk.bf16.mxu1 %vm332_vm0, %v1112_v43 }
  0x65   :  { %496 = vmatmul.mubr.bf16.gmra.mxu0 %v1114_v44  ;;  %584 = vmatmul.mubr.bf16.gmra.mxu1 %v1115_v45 }
  0x66   :  { %935 = vmatprep.mubr.msk.bf16.mxu0 %vm332_vm0, %v1116_v46  ;;  %946 = vmatprep.mubr.msk.bf16.mxu1 %vm332_vm0, %v1118_v47 }
  0x6d   :  { %504 = vmatmul.mubr.bf16.gmra.mxu0 %v1120_v49  ;;  %592 = vmatmul.mubr.bf16.gmra.mxu1 %v1121_v50 }
  0x6e   :  { %936 = vmatprep.mubr.msk.bf16.mxu0 %vm332_vm0, %v1122_v51  ;;  %947 = vmatprep.mubr.msk.bf16.mxu1 %vm332_vm0, %v916_v52 }
  0x75   :  { %512 = vmatmul.mubr.bf16.gmra.mxu0 %v1125_v53  ;;  %600 = vmatmul.mubr.bf16.gmra.mxu1 %v915_v54 }
  0xe5   :  { %v433_v56 = vpop.f32.mrf.mxu0  ;;  %v521_v57 = vpop.f32.mrf.mxu1 }
  0xe6   :  { %v434_v58 = vadd.f32 %v1329_v55, %v433_v56  ;;  %v522_v59 = vadd.f32 %v1329_v55, %v521_v57 }
  0xe7   :  { %v435_v60 = vpop.f32.mrf.mxu0  ;;  %v523_v61 = vpop.f32.mrf.mxu1 }
  0xe8   :  { %v607_v62 = vmax.f32 %v434_v58, 0.0  ;;  %v629_v63 = vmax.f32 %v522_v59, 0.0 }
  0xe9   :  { %v436_v0 = vpop.f32.mrf.mxu0  ;;  %v524_v1 = vpop.f32.mrf.mxu1 }
  0xea   :  { %v991_v2 = vpack.c.bf16 %v607_v62, %v607_v62  ;;  %v1013_v3 = vpack.c.bf16 %v629_v63, %v629_v63  ;;  %v437_v4 = vadd.f32 %v1329_v55, %v436_v0  ;;  %v525_v5 = vadd.f32 %v1329_v55, %v524_v1 }
  0xeb   :  { %v438_v6 = vpop.f32.mrf.mxu0  ;;  %v526_v7 = vpop.f32.mrf.mxu1 }
  0xec   :  { %824 = vst.msk [vmem:[%s1548_s3] sm:$0xf] %vm823_vm1, %v991_v2  ;;  %846 = vst.msk [vmem:[%s1548_s3 + $0x58] sm:$0xf] %vm823_vm1, %v1013_v3  ;;  %v608_v8 = vmax.f32 %v437_v4, 0.0  ;;  %v630_v9 = vmax.f32 %v525_v5, 0.0 }
  0xed   :  { %v441_v10 = vpop.f32.mrf.mxu0  ;;  %v529_v11 = vpop.f32.mrf.mxu1 }
  0xee   :  { %v992_v12 = vpack.c.bf16 %v608_v8, %v608_v8  ;;  %v1014_v13 = vpack.c.bf16 %v630_v9, %v630_v9  ;;  %v442_v14 = vadd.f32 %v1329_v55, %v441_v10  ;;  %v530_v15 = vadd.f32 %v1329_v55, %v529_v11 }
  0xef   :  { %v443_v16 = vpop.f32.mrf.mxu0  ;;  %v531_v17 = vpop.f32.mrf.mxu1 }
  0xf0   :  { %825 = vst.msk [vmem:[%s1548_s3 + $0x4] sm:$0xf] %vm823_vm1, %v992_v12  ;;  %847 = vst.msk [vmem:[%s1548_s3 + $0x5c] sm:$0xf] %vm823_vm1, %v1014_v13  ;;  %v609_v18 = vmax.f32 %v442_v14, 0.0  ;;  %v631_v19 = vmax.f32 %v530_v15, 0.0 }
  0xf1   :  { %v444_v20 = vpop.f32.mrf.mxu0  ;;  %v532_v21 = vpop.f32.mrf.mxu1 }
  0xf2   :  { %v993_v22 = vpack.c.bf16 %v609_v18, %v609_v18  ;;  %v1015_v23 = vpack.c.bf16 %v631_v19, %v631_v19  ;;  %v445_v24 = vadd.f32 %v1329_v55, %v444_v20  ;;  %v533_v25 = vadd.f32 %v1329_v55, %v532_v21 }
  0xf3   :  { %v446_v26 = vpop.f32.mrf.mxu0  ;;  %v534_v27 = vpop.f32.mrf.mxu1 }
  0xf4   :  { %826 = vst.msk [vmem:[%s1548_s3 + $0x8] sm:$0xf] %vm823_vm1, %v993_v22  ;;  %848 = vst.msk [vmem:[%s1548_s3 + $0x60] sm:$0xf] %vm823_vm1, %v1015_v23  ;;  %v610_v28 = vmax.f32 %v445_v24, 0.0  ;;  %v632_v29 = vmax.f32 %v533_v25, 0.0 }
  0xf5   :  { %v449_v30 = vpop.f32.mrf.mxu0  ;;  %v537_v31 = vpop.f32.mrf.mxu1 }
  0xf6   :  { %v994_v32 = vpack.c.bf16 %v610_v28, %v610_v28  ;;  %v1016_v33 = vpack.c.bf16 %v632_v29, %v632_v29  ;;  %v450_v34 = vadd.f32 %v1329_v55, %v449_v30  ;;  %v538_v35 = vadd.f32 %v1329_v55, %v537_v31 }
  0xf7   :  { %v451_v36 = vpop.f32.mrf.mxu0  ;;  %v539_v37 = vpop.f32.mrf.mxu1 }
  0xf8   :  { %827 = vst.msk [vmem:[%s1548_s3 + $0xc] sm:$0xf] %vm823_vm1, %v994_v32  ;;  %849 = vst.msk [vmem:[%s1548_s3 + $0x64] sm:$0xf] %vm823_vm1, %v1016_v33  ;;  %v611_v38 = vmax.f32 %v450_v34, 0.0  ;;  %v633_v39 = vmax.f32 %v538_v35, 0.0 }
  0xf9   :  { %v452_v40 = vpop.f32.mrf.mxu0  ;;  %v540_v41 = vpop.f32.mrf.mxu1 }
  0xfa   :  { %v995_v42 = vpack.c.bf16 %v611_v38, %v611_v38  ;;  %v1017_v43 = vpack.c.bf16 %v633_v39, %v633_v39  ;;  %v453_v44 = vadd.f32 %v1329_v55, %v452_v40  ;;  %v541_v45 = vadd.f32 %v1329_v55, %v540_v41 }
  0xfb   :  { %v454_v46 = vpop.f32.mrf.mxu0  ;;  %v542_v47 = vpop.f32.mrf.mxu1 }
  0xfc   :  { %828 = vst.msk [vmem:[%s1548_s3 + $0x10] sm:$0xf] %vm823_vm1, %v995_v42  ;;  %850 = vst.msk [vmem:[%s1548_s3 + $0x68] sm:$0xf] %vm823_vm1, %v1017_v43  ;;  %v612_v48 = vmax.f32 %v453_v44, 0.0  ;;  %v634_v49 = vmax.f32 %v541_v45, 0.0 }
  0xfd   :  { %v457_v50 = vpop.f32.mrf.mxu0  ;;  %v545_v51 = vpop.f32.mrf.mxu1 }
  0xfe   :  { %v996_v52 = vpack.c.bf16 %v612_v48, %v612_v48  ;;  %v1018_v53 = vpack.c.bf16 %v634_v49, %v634_v49  ;;  %v458_v54 = vadd.f32 %v1329_v55, %v457_v50  ;;  %v546_v56 = vadd.f32 %v1329_v55, %v545_v51 }
  0xff   :  { %v459_v57 = vpop.f32.mrf.mxu0  ;;  %v547_v58 = vpop.f32.mrf.mxu1 }
 0x100   :  { %829 = vst.msk [vmem:[%s1548_s3 + $0x14] sm:$0xf] %vm823_vm1, %v996_v52  ;;  %851 = vst.msk [vmem:[%s1548_s3 + $0x6c] sm:$0xf] %vm823_vm1, %v1018_v53  ;;  %v613_v59 = vmax.f32 %v458_v54, 0.0  ;;  %v635_v60 = vmax.f32 %v546_v56, 0.0 }
 0x101   :  { %v460_v61 = vpop.f32.mrf.mxu0  ;;  %v548_v62 = vpop.f32.mrf.mxu1 }
 0x102   :  { %v997_v63 = vpack.c.bf16 %v613_v59, %v613_v59  ;;  %v1019_v0 = vpack.c.bf16 %v635_v60, %v635_v60  ;;  %v461_v1 = vadd.f32 %v1329_v55, %v460_v61  ;;  %v549_v2 = vadd.f32 %v1329_v55, %v548_v62 }
 0x103   :  { %v462_v3 = vpop.f32.mrf.mxu0  ;;  %v550_v4 = vpop.f32.mrf.mxu1 }
 0x104   :  { %830 = vst.msk [vmem:[%s1548_s3 + $0x18] sm:$0xf] %vm823_vm1, %v997_v63  ;;  %852 = vst.msk [vmem:[%s1548_s3 + $0x70] sm:$0xf] %vm823_vm1, %v1019_v0  ;;  %v614_v5 = vmax.f32 %v461_v1, 0.0  ;;  %v636_v6 = vmax.f32 %v549_v2, 0.0 }
 0x105   :  { %v465_v7 = vpop.f32.mrf.mxu0  ;;  %v553_v8 = vpop.f32.mrf.mxu1 }
 0x106   :  { %v998_v9 = vpack.c.bf16 %v614_v5, %v614_v5  ;;  %v1020_v10 = vpack.c.bf16 %v636_v6, %v636_v6  ;;  %v466_v11 = vadd.f32 %v1329_v55, %v465_v7  ;;  %v554_v12 = vadd.f32 %v1329_v55, %v553_v8 }
 0x107   :  { %v467_v13 = vpop.f32.mrf.mxu0  ;;  %v555_v14 = vpop.f32.mrf.mxu1 }
 0x108   :  { %831 = vst.msk [vmem:[%s1548_s3 + $0x1c] sm:$0xf] %vm823_vm1, %v998_v9  ;;  %853 = vst.msk [vmem:[%s1548_s3 + $0x74] sm:$0xf] %vm823_vm1, %v1020_v10  ;;  %v615_v15 = vmax.f32 %v466_v11, 0.0  ;;  %v637_v16 = vmax.f32 %v554_v12, 0.0 }
 0x109   :  { %v468_v17 = vpop.f32.mrf.mxu0  ;;  %v556_v18 = vpop.f32.mrf.mxu1 }
 0x10a   :  { %v999_v19 = vpack.c.bf16 %v615_v15, %v615_v15  ;;  %v1021_v20 = vpack.c.bf16 %v637_v16, %v637_v16  ;;  %v469_v21 = vadd.f32 %v1329_v55, %v468_v17  ;;  %v557_v22 = vadd.f32 %v1329_v55, %v556_v18 }
 0x10b   :  { %v470_v23 = vpop.f32.mrf.mxu0  ;;  %v558_v24 = vpop.f32.mrf.mxu1 }
 0x10c   :  { %832 = vst.msk [vmem:[%s1548_s3 + $0x20] sm:$0xf] %vm823_vm1, %v999_v19  ;;  %854 = vst.msk [vmem:[%s1548_s3 + $0x78] sm:$0xf] %vm823_vm1, %v1021_v20  ;;  %v616_v25 = vmax.f32 %v469_v21, 0.0  ;;  %v638_v26 = vmax.f32 %v557_v22, 0.0 }
 0x10d   :  { %v473_v27 = vpop.f32.mrf.mxu0  ;;  %v561_v28 = vpop.f32.mrf.mxu1 }
 0x10e   :  { %v1000_v29 = vpack.c.bf16 %v616_v25, %v616_v25  ;;  %v1022_v30 = vpack.c.bf16 %v638_v26, %v638_v26  ;;  %v474_v31 = vadd.f32 %v1329_v55, %v473_v27  ;;  %v562_v32 = vadd.f32 %v1329_v55, %v561_v28 }
 0x10f   :  { %v475_v33 = vpop.f32.mrf.mxu0  ;;  %v563_v34 = vpop.f32.mrf.mxu1 }
 0x110   :  { %833 = vst.msk [vmem:[%s1548_s3 + $0x24] sm:$0xf] %vm823_vm1, %v1000_v29  ;;  %855 = vst.msk [vmem:[%s1548_s3 + $0x7c] sm:$0xf] %vm823_vm1, %v1022_v30  ;;  %v617_v35 = vmax.f32 %v474_v31, 0.0  ;;  %v639_v36 = vmax.f32 %v562_v32, 0.0 }
 0x111   :  { %v476_v37 = vpop.f32.mrf.mxu0  ;;  %v564_v38 = vpop.f32.mrf.mxu1 }
 0x112   :  { %v1001_v39 = vpack.c.bf16 %v617_v35, %v617_v35  ;;  %v1023_v40 = vpack.c.bf16 %v639_v36, %v639_v36  ;;  %v477_v41 = vadd.f32 %v1329_v55, %v476_v37  ;;  %v565_v42 = vadd.f32 %v1329_v55, %v564_v38 }
 0x113   :  { %v478_v43 = vpop.f32.mrf.mxu0  ;;  %v566_v44 = vpop.f32.mrf.mxu1 }
 0x114   :  { %834 = vst.msk [vmem:[%s1548_s3 + $0x28] sm:$0xf] %vm823_vm1, %v1001_v39  ;;  %856 = vst.msk [vmem:[%s1548_s3 + $0x80] sm:$0xf] %vm823_vm1, %v1023_v40  ;;  %v618_v45 = vmax.f32 %v477_v41, 0.0  ;;  %v640_v46 = vmax.f32 %v565_v42, 0.0 }
 0x115   :  { %v481_v47 = vpop.f32.mrf.mxu0  ;;  %v569_v48 = vpop.f32.mrf.mxu1 }
 0x116   :  { %v1002_v49 = vpack.c.bf16 %v618_v45, %v618_v45  ;;  %v1024_v50 = vpack.c.bf16 %v640_v46, %v640_v46  ;;  %v482_v51 = vadd.f32 %v1329_v55, %v481_v47  ;;  %v570_v52 = vadd.f32 %v1329_v55, %v569_v48 }
 0x117   :  { %v483_v53 = vpop.f32.mrf.mxu0  ;;  %v571_v54 = vpop.f32.mrf.mxu1 }
 0x118   :  { %835 = vst.msk [vmem:[%s1548_s3 + $0x2c] sm:$0xf] %vm823_vm1, %v1002_v49  ;;  %857 = vst.msk [vmem:[%s1548_s3 + $0x84] sm:$0xf] %vm823_vm1, %v1024_v50  ;;  %v619_v56 = vmax.f32 %v482_v51, 0.0  ;;  %v641_v57 = vmax.f32 %v570_v52, 0.0 }
 0x119   :  { %v484_v58 = vpop.f32.mrf.mxu0  ;;  %v572_v59 = vpop.f32.mrf.mxu1 }
 0x11a   :  { %v1003_v60 = vpack.c.bf16 %v619_v56, %v619_v56  ;;  %v1025_v61 = vpack.c.bf16 %v641_v57, %v641_v57  ;;  %v485_v62 = vadd.f32 %v1329_v55, %v484_v58  ;;  %v573_v63 = vadd.f32 %v1329_v55, %v572_v59 }
 0x11b   :  { %v486_v0 = vpop.f32.mrf.mxu0  ;;  %v574_v1 = vpop.f32.mrf.mxu1 }
 0x11c   :  { %836 = vst.msk [vmem:[%s1548_s3 + $0x30] sm:$0xf] %vm823_vm1, %v1003_v60  ;;  %858 = vst.msk [vmem:[%s1548_s3 + $0x88] sm:$0xf] %vm823_vm1, %v1025_v61  ;;  %v620_v2 = vmax.f32 %v485_v62, 0.0  ;;  %v642_v3 = vmax.f32 %v573_v63, 0.0 }
 0x11d   :  { %v489_v4 = vpop.f32.mrf.mxu0  ;;  %v577_v5 = vpop.f32.mrf.mxu1 }
 0x11e   :  { %v1004_v6 = vpack.c.bf16 %v620_v2, %v620_v2  ;;  %v1026_v7 = vpack.c.bf16 %v642_v3, %v642_v3  ;;  %v490_v8 = vadd.f32 %v1329_v55, %v489_v4  ;;  %v578_v9 = vadd.f32 %v1329_v55, %v577_v5 }
 0x11f   :  { %v491_v10 = vpop.f32.mrf.mxu0  ;;  %v579_v11 = vpop.f32.mrf.mxu1 }
 0x120   :  { %837 = vst.msk [vmem:[%s1548_s3 + $0x34] sm:$0xf] %vm823_vm1, %v1004_v6  ;;  %859 = vst.msk [vmem:[%s1548_s3 + $0x8c] sm:$0xf] %vm823_vm1, %v1026_v7  ;;  %v621_v12 = vmax.f32 %v490_v8, 0.0  ;;  %v643_v13 = vmax.f32 %v578_v9, 0.0 }
 0x121   :  { %v492_v14 = vpop.f32.mrf.mxu0  ;;  %v580_v15 = vpop.f32.mrf.mxu1 }
 0x122   :  { %v1005_v16 = vpack.c.bf16 %v621_v12, %v621_v12  ;;  %v1027_v17 = vpack.c.bf16 %v643_v13, %v643_v13  ;;  %v493_v18 = vadd.f32 %v1329_v55, %v492_v14  ;;  %v581_v19 = vadd.f32 %v1329_v55, %v580_v15 }
 0x123   :  { %v494_v20 = vpop.f32.mrf.mxu0  ;;  %v582_v21 = vpop.f32.mrf.mxu1 }
 0x124   :  { %838 = vst.msk [vmem:[%s1548_s3 + $0x38] sm:$0xf] %vm823_vm1, %v1005_v16  ;;  %860 = vst.msk [vmem:[%s1548_s3 + $0x90] sm:$0xf] %vm823_vm1, %v1027_v17  ;;  %v622_v22 = vmax.f32 %v493_v18, 0.0  ;;  %v644_v23 = vmax.f32 %v581_v19, 0.0 }
 0x125   :  { %v497_v24 = vpop.f32.mrf.mxu0  ;;  %v585_v25 = vpop.f32.mrf.mxu1 }
 0x126   :  { %v1006_v26 = vpack.c.bf16 %v622_v22, %v622_v22  ;;  %v1028_v27 = vpack.c.bf16 %v644_v23, %v644_v23  ;;  %v498_v28 = vadd.f32 %v1329_v55, %v497_v24  ;;  %v586_v29 = vadd.f32 %v1329_v55, %v585_v25 }
 0x127   :  { %v499_v30 = vpop.f32.mrf.mxu0  ;;  %v587_v31 = vpop.f32.mrf.mxu1 }
 0x128   :  { %839 = vst.msk [vmem:[%s1548_s3 + $0x3c] sm:$0xf] %vm823_vm1, %v1006_v26  ;;  %861 = vst.msk [vmem:[%s1548_s3 + $0x94] sm:$0xf] %vm823_vm1, %v1028_v27  ;;  %v623_v32 = vmax.f32 %v498_v28, 0.0  ;;  %v645_v33 = vmax.f32 %v586_v29, 0.0 }
 0x129   :  { %v500_v34 = vpop.f32.mrf.mxu0  ;;  %v588_v35 = vpop.f32.mrf.mxu1 }
 0x12a   :  { %v1007_v36 = vpack.c.bf16 %v623_v32, %v623_v32  ;;  %v1029_v37 = vpack.c.bf16 %v645_v33, %v645_v33  ;;  %v501_v38 = vadd.f32 %v1329_v55, %v500_v34  ;;  %v589_v39 = vadd.f32 %v1329_v55, %v588_v35 }
 0x12b   :  { %v502_v40 = vpop.f32.mrf.mxu0  ;;  %v590_v41 = vpop.f32.mrf.mxu1 }
 0x12c   :  { %840 = vst.msk [vmem:[%s1548_s3 + $0x40] sm:$0xf] %vm823_vm1, %v1007_v36  ;;  %862 = vst.msk [vmem:[%s1548_s3 + $0x98] sm:$0xf] %vm823_vm1, %v1029_v37  ;;  %v624_v42 = vmax.f32 %v501_v38, 0.0  ;;  %v646_v43 = vmax.f32 %v589_v39, 0.0 }
 0x12d   :  { %v505_v44 = vpop.f32.mrf.mxu0  ;;  %v593_v45 = vpop.f32.mrf.mxu1 }
 0x12e   :  { %v1008_v46 = vpack.c.bf16 %v624_v42, %v624_v42  ;;  %v1030_v47 = vpack.c.bf16 %v646_v43, %v646_v43  ;;  %v506_v48 = vadd.f32 %v1329_v55, %v505_v44  ;;  %v594_v49 = vadd.f32 %v1329_v55, %v593_v45 }
 0x12f   :  { %v507_v50 = vpop.f32.mrf.mxu0  ;;  %v595_v51 = vpop.f32.mrf.mxu1 }
 0x130   :  { %841 = vst.msk [vmem:[%s1548_s3 + $0x44] sm:$0xf] %vm823_vm1, %v1008_v46  ;;  %863 = vst.msk [vmem:[%s1548_s3 + $0x9c] sm:$0xf] %vm823_vm1, %v1030_v47  ;;  %v625_v52 = vmax.f32 %v506_v48, 0.0  ;;  %v647_v53 = vmax.f32 %v594_v49, 0.0 }
 0x131   :  { %v508_v54 = vpop.f32.mrf.mxu0  ;;  %v596_v56 = vpop.f32.mrf.mxu1 }
 0x132   :  { %v1009_v57 = vpack.c.bf16 %v625_v52, %v625_v52  ;;  %v1031_v58 = vpack.c.bf16 %v647_v53, %v647_v53  ;;  %v509_v59 = vadd.f32 %v1329_v55, %v508_v54  ;;  %v597_v60 = vadd.f32 %v1329_v55, %v596_v56 }
 0x133   :  { %v510_v61 = vpop.f32.mrf.mxu0  ;;  %v598_v62 = vpop.f32.mrf.mxu1 }
 0x134   :  { %842 = vst.msk [vmem:[%s1548_s3 + $0x48] sm:$0xf] %vm823_vm1, %v1009_v57  ;;  %864 = vst.msk [vmem:[%s1548_s3 + $0xa0] sm:$0xf] %vm823_vm1, %v1031_v58  ;;  %v626_v63 = vmax.f32 %v509_v59, 0.0  ;;  %v648_v0 = vmax.f32 %v597_v60, 0.0 }
 0x135   :  { %v513_v1 = vpop.f32.mrf.mxu0  ;;  %v601_v2 = vpop.f32.mrf.mxu1 }
 0x136   :  { %v1010_v3 = vpack.c.bf16 %v626_v63, %v626_v63  ;;  %v1032_v4 = vpack.c.bf16 %v648_v0, %v648_v0  ;;  %v514_v5 = vadd.f32 %v1329_v55, %v513_v1  ;;  %v602_v6 = vadd.f32 %v1329_v55, %v601_v2 }
 0x137   :  { %v515_v7 = vpop.f32.mrf.mxu0  ;;  %v603_v8 = vpop.f32.mrf.mxu1 }
 0x138   :  { %843 = vst.msk [vmem:[%s1548_s3 + $0x4c] sm:$0xf] %vm823_vm1, %v1010_v3  ;;  %865 = vst.msk [vmem:[%s1548_s3 + $0xa4] sm:$0xf] %vm823_vm1, %v1032_v4  ;;  %v627_v9 = vmax.f32 %v514_v5, 0.0  ;;  %v649_v10 = vmax.f32 %v602_v6, 0.0 }
 0x139   :  { %v516_v11 = vpop.f32.mrf.mxu0  ;;  %v604_v12 = vpop.f32.mrf.mxu1 }
 0x13a   :  { %v1011_v13 = vpack.c.bf16 %v627_v9, %v627_v9  ;;  %v1033_v14 = vpack.c.bf16 %v649_v10, %v649_v10  ;;  %v517_v15 = vadd.f32 %v1329_v55, %v516_v11 }
 0x13b   :  { %v518_v16 = vpop.f32.mrf.mxu0  ;;  %v605_v17 = vpop.f32.mrf.mxu1 }
 0x13c   :  { %844 = vst.msk [vmem:[%s1548_s3 + $0x50] sm:$0xf] %vm823_vm1, %v1011_v13  ;;  %v628_v18 = vmax.f32 %v517_v15, 0.0 }
 0x13d   :  { %867 = vst.msk [vmem:[%s1548_s3 + $0xa8] sm:$0x1] %vm866_vm2, %v1033_v14 }
 0x13e   :  { %v1012_v19 = vpack.c.bf16 %v628_v18, %v628_v18 }
 0x140   :  { %845 = vst.msk [vmem:[%s1548_s3 + $0x54] sm:$0xf] %vm823_vm1, %v1012_v19 }

// kernel: forward.11
= control target key start
LH: loop header
LB: loop body
LE: loop exit
PB: predicated region body
PF: predicated region fallthrough
CT: control target
= control target key end

     0   :  { %v113_v29 = vlaneseq  ;;  %v841_v32 = vmov 1966171168   ;;  %v842_v36 = vmov 0.0   ;;  %s1036_s0 = inlined_call_operand.vmem [shape: bf16[2,576], index: 0, kind: input, shape index: {}]   ;;  %s1037_s1 = inlined_call_operand.vmem [shape: bf16[576,32], index: 1, kind: input, shape index: {}]   ;;  %s1038_s2 = inlined_call_operand.vmem [shape: f32[1,32], index: 2, kind: input, shape index: {}]   ;;  %s1039_s3 = inlined_call_operand.vmem [shape: bf16[32,32], index: 3, kind: input, shape index: {}]   ;;  %s1040_s4 = inlined_call_operand.vmem [shape: f32[1,32], index: 4, kind: input, shape index: {}]   ;;  %s1041_s5 = inlined_call_operand.vmem [shape: bf16[32,10], index: 5, kind: input, shape index: {}]   ;;  %s1042_s6 = inlined_call_operand.vmem [shape: f32[1,10], index: 6, kind: input, shape index: {}]   ;;  %s1043_s7 = inlined_call_operand.hbm [shape: f32[2,10], index: 7, kind: output, shape index: {}]  }
   0x1   :  { %v778_v0 = vld [vmem:[%s1037_s1 + $0x78] sm:$0xff]   ;;  %v782_v4 = vld [vmem:[%s1037_s1 + $0x70] sm:$0xff]   ;;  %v786_v8 = vld [vmem:[%s1037_s1 + $0x68] sm:$0xff]   ;;  %v111_v33 = vunpack.c.l.s4 %v841_v32 }
   0x2   :  { %v779_v1 = vld [vmem:[%s1037_s1 + $0x38] sm:$0xff]   ;;  %691 = vmatprep.subr.bf16.mxu0 %v778_v0  ;;  %v783_v5 = vld [vmem:[%s1037_s1 + $0x30] sm:$0xff]   ;;  %v787_v9 = vld [vmem:[%s1037_s1 + $0x28] sm:$0xff]   ;;  %v114_v34 = vshrl.u32 %v113_v29, 7 }
   0x3   :  { %v780_v2 = vld [vmem:[%s1037_s1 + $0xf8] sm:$0xff]   ;;  %692 = vmatpush3.bf16.msra.mxu0 %v779_v1  ;;  %v784_v6 = vld [vmem:[%s1037_s1 + $0xf0] sm:$0xff]   ;;  %v788_v10 = vld [vmem:[%s1037_s1 + $0xe8] sm:$0xff]   ;;  %v112_v37 = vunpack.c.0.s8 %v111_v33 }
   0x4   :  { %v781_v3 = vld [vmem:[%s1037_s1 + $0xb8] sm:$0xff]   ;;  %713 = vmatprep.subr.bf16.mxu1 %v780_v2  ;;  %693 = vmatprep.subr.bf16.mxu0 %v782_v4  ;;  %v785_v7 = vld [vmem:[%s1037_s1 + $0xb0] sm:$0xff]   ;;  %v789_v11 = vld [vmem:[%s1037_s1 + $0xa8] sm:$0xff]  }
   0x5   :  { %714 = vmatpush3.bf16.msra.mxu1 %v781_v3  ;;  %v790_v12 = vld [vmem:[%s1037_s1 + $0x60] sm:$0xff]   ;;  %v794_v16 = vld [vmem:[%s1037_s1 + $0x58] sm:$0xff]   ;;  %v798_v20 = vld [vmem:[%s1037_s1 + $0x50] sm:$0xff]   ;;  %v115_v39 = vsub.s32 %v112_v37, %v114_v34 }
   0x6   :  { %715 = vmatprep.subr.bf16.mxu1 %v784_v6  ;;  %v791_v13 = vld [vmem:[%s1037_s1 + $0x20] sm:$0xff]   ;;  %v795_v17 = vld [vmem:[%s1037_s1 + $0x18] sm:$0xff]   ;;  %v799_v21 = vld [vmem:[%s1037_s1 + $0x10] sm:$0xff]  }
   0x7   :  { %694 = vmatpush3.bf16.msra.mxu0 %v783_v5  ;;  %v792_v14 = vld [vmem:[%s1037_s1 + $0xe0] sm:$0xff]   ;;  %v796_v18 = vld [vmem:[%s1037_s1 + $0xd8] sm:$0xff]   ;;  %v800_v22 = vld [vmem:[%s1037_s1 + $0xd0] sm:$0xff]  }
   0x8   :  { %695 = vmatprep.subr.bf16.mxu0 %v786_v8  ;;  %v793_v15 = vld [vmem:[%s1037_s1 + $0xa0] sm:$0xff]   ;;  %v797_v19 = vld [vmem:[%s1037_s1 + $0x98] sm:$0xff]   ;;  %v801_v23 = vld [vmem:[%s1037_s1 + $0x90] sm:$0xff]  }
   0x9   :  { %716 = vmatpush3.bf16.msra.mxu1 %v785_v7  ;;  %v802_v24 = vld [vmem:[%s1037_s1 + $0x48] sm:$0xff]   ;;  %v806_v28 = vld [vmem:[%s1037_s1 + $0x40] sm:$0xff]  }
   0xa   :  { %717 = vmatprep.subr.bf16.mxu1 %v788_v10  ;;  %v803_v25 = vld [vmem:[%s1037_s1 + $0x8] sm:$0xff]   ;;  %v807_v30 = vld [vmem:[%s1037_s1] sm:$0xff]  }
   0xb   :  { %696 = vmatpush3.bf16.msra.mxu0 %v787_v9  ;;  %v804_v26 = vld [vmem:[%s1037_s1 + $0xc8] sm:$0xff]   ;;  %v808_v31 = vld [vmem:[%s1037_s1 + $0xc0] sm:$0xff]  }
   0xc   :  { %697 = vmatprep.subr.bf16.mxu0 %v790_v12  ;;  %v805_v27 = vld [vmem:[%s1037_s1 + $0x88] sm:$0xff]   ;;  %v810_v35 = vld [vmem:[%s1037_s1 + $0x80] sm:$0xff]  }
   0xd   :  { %718 = vmatpush3.bf16.msra.mxu1 %v789_v11  ;;  %v28_v38 = vld [vmem:[%s1036_s0] sm:$0x1f] }
   0xe   :  { %719 = vmatprep.subr.bf16.mxu1 %v792_v14  ;;  %v116_v40 = vrot.slane %v28_v38, %v115_v39 }
   0xf   :  { %698 = vmatpush3.bf16.msra.mxu0 %v791_v13 }
  0x10   :  { %699 = vmatprep.subr.bf16.mxu0 %v794_v16 }
  0x11   :  { %720 = vmatpush3.bf16.msra.mxu1 %v793_v15 }
  0x12   :  { %721 = vmatprep.subr.bf16.mxu1 %v796_v18 }
  0x13   :  { %700 = vmatpush3.bf16.msra.mxu0 %v795_v17 }
  0x14   :  { %701 = vmatprep.subr.bf16.mxu0 %v798_v20 }
  0x15   :  { %722 = vmatpush3.bf16.msra.mxu1 %v797_v19 }
  0x16   :  { %723 = vmatprep.subr.bf16.mxu1 %v800_v22 }
  0x17   :  { %702 = vmatpush3.bf16.msra.mxu0 %v799_v21 }
  0x18   :  { %703 = vmatprep.subr.bf16.mxu0 %v802_v24 }
  0x19   :  { %724 = vmatpush3.bf16.msra.mxu1 %v801_v23 }
  0x1a   :  { %725 = vmatprep.subr.bf16.mxu1 %v804_v26 }
  0x1b   :  { %704 = vmatpush3.bf16.msra.mxu0 %v803_v25 }
  0x1c   :  { %705 = vmatprep.subr.bf16.mxu0 %v806_v28 }
  0x1d   :  { %726 = vmatpush3.bf16.msra.mxu1 %v805_v27 }
  0x1e   :  { %727 = vmatprep.subr.bf16.mxu1 %v808_v31 }
  0x1f   :  { %706 = vmatpush3.bf16.msra.mxu0 %v807_v30 }
  0x20   :  { %746 = vmatprep.subr.bf16.mxu0 %v842_v36 }
  0x21   :  { %728 = vmatpush3.bf16.msra.mxu1 %v810_v35 }
  0x22   :  { %758 = vmatprep.subr.bf16.mxu1 %v842_v36 }
  0x23   :  { %12 = vsyncpa [#allocation3], 0  ;;  %v124_v41 = vcombine.high %v116_v40, %v116_v40  ;;  %v131_v42 = vrot.slane %v116_v40, %v115_v39  ;;  %v811_v44 = vld [vmem:[%s1037_s1 + $0x118] sm:$0xff]   ;;  %v812_v47 = vld [vmem:[%s1037_s1 + $0x110] sm:$0xff]   ;;  %vm843_vm0 = vmmov 0   ;;  %v109_v48 = vcombine.high %v28_v38, %v28_v38  ;;  %s844_s16 = smov [#allocation2]  }
  0x24   :  { %v813_v49 = vld [vmem:[%s1037_s1 + $0x108] sm:$0xff]   ;;  %v814_v51 = vld [vmem:[%s1037_s1 + $0x100] sm:$0xff]   ;;  %vm368_vm1 = vcmask 523264   ;;  %vm517_vm2 = vcmask 261120   ;;  %vm629_vm3 = vcmask 74752  }
  0x25   :  { %v145_v43 = vrot.slane %v124_v41, %v115_v39  ;;  %v146_v45 = vcombine.high %v131_v42, %v131_v42  ;;  %v123_v50 = vrot.slane %v109_v48, %v115_v39  ;;  %v815_v53 = vld [vmem:[%s1039_s3 + $0x8] sm:$0xff]   ;;  %v816_v54 = vld [vmem:[%s1039_s3] sm:$0xff]  }
  0x26   :  { %v645_v63 = vld [vmem:[%s1038_s2] ss:$0 sm:$0xff]  ;;  %v817_v9 = vld [vmem:[%s1041_s5 + $0x8] sm:$0xff]  }
  0x27   :  { %404 = vmatprep.mubr.bf16.mxu0 %v145_v43  ;;  %v147_v46 = vcombine.high %v145_v43, %v145_v43  ;;  %v138_v52 = vrot.slane %v123_v50, %v115_v39  ;;  %v818_v12 = vld [vmem:[%s1041_s5] sm:$0xff]   ;;  %s637_s5 = sshll.u32 %s844_s16, 4  ;;  %s638_s5 = int_to_ptr.vmem [resolvable:$true] %s637_s5 }
  0x28   :  { %405 = vmatmul.mubr.bf16.vlgmr.msra.gmra.mxu0 %v131_v42  ;;  %v683_v13 = vld [vmem:[%s1040_s4] ss:$0 sm:$0xff]  ;;  %s819_s4 = scalar_lea.vmem %s638_s5, 32  ;;  %p824_p1 = scmp.lt.s32.totalorder %s638_s5, %s638_s5 }
  0x29   :  { %444 = vmatprep.mubr.bf16.mxu1 %v147_v46  ;;  %747 = vmatpush3.bf16.msra.mxu0 %v811_v44  ;;  %v687_v21 = vld [vmem:[%s1042_s6] ss:$0 sm:$0xff]  ;;  %p820_p0 = scmp.ne.s32.totalorder %s638_s5, %s819_s4  ;;  %p825_p2 = scmp.lt.s32.totalorder %s819_s4, %s819_s4 }
  0x2a   :  { %445 = vmatmul.mubr.bf16.vlgmr.msra.gmra.mxu1 %v146_v45  ;;  %748 = vmatprep.subr.bf16.mxu0 %v842_v36 }
  0x2b   :  { %754 = vmatprep.mubr.msk.bf16.mxu0 %vm843_vm0, %v842_v36  ;;  %762 = vmatprep.mubr.msk.bf16.mxu1 %vm843_vm0, %v842_v36  ;;  %p826_p3 = por %p825_p2, %p824_p1 }
  0x2c   :  { %759 = vmatpush3.bf16.msra.mxu1 %v815_v53 }
  0x2d   :  { %749 = vmatpush3.bf16.msra.mxu0 %v812_v47  ;;  %760 = vmatprep.subr.bf16.mxu1 %v842_v36  ;;  %p827_p4 = pnand %p826_p3, %p820_p0 }
  0x2e   :  { %750 = vmatprep.subr.bf16.mxu0 %v842_v36 }
  0x30   :  { %761 = vmatpush3.bf16.msra.mxu1 %v816_v54 }
  0x31   :  { %751 = vmatpush3.bf16.msra.mxu0 %v813_v49  ;;  %766 = vmatprep.subr.bf16.mxu1 %v842_v36 }
  0x32   :  { %752 = vmatprep.subr.bf16.mxu0 %v842_v36 }
  0x35   :  { %753 = vmatpush3.bf16.msra.mxu0 %v814_v51 }
  0x38   :  { %755 = vmatmul.mubr.msk.bf16.vlgmr.msra.gmra.mxu0 %vm368_vm1, %v138_v52 }
  0xe8   :  { %v707_v55 = vpop.f32.mrf.mxu0 }
  0xea   :  { %v708_v56 = vpop.f32.mrf.mxu0  ;;  %v729_v57 = vpop.f32.mrf.mxu1 }
  0xeb   :  { %v709_v62 = vadd.f32 %v708_v56, %v707_v55 }
  0xec   :  { %v710_v58 = vpop.f32.mrf.mxu0  ;;  %v730_v59 = vpop.f32.mrf.mxu1 }
  0xed   :  { %v407_v1 = vadd.f32 %v709_v62, %v645_v63  ;;  %v731_v2 = vadd.f32 %v730_v59, %v729_v57 }
  0xee   :  { %v711_v60 = vpop.f32.mrf.mxu0  ;;  %v732_v61 = vpop.f32.mrf.mxu1 }
  0xef   :  { %v447_v3 = vadd.f32 %v731_v2, %v407_v1 }
  0xf0   :  { %v733_v0 = vpop.f32.mrf.mxu1 }
  0xf8   :  { %v486_v4 = vpop.f32.mrf.mxu0 }
  0xf9   :  { %v487_v5 = vadd.f32 %v486_v4, %v447_v3 }
  0xfa   :  { %v756_v6 = vpop.f32.mrf.mxu0 }
  0xfb   :  { %v492_v7 = vmax.f32 %v487_v5, 0.0 }
  0xfc   :  { %v489_v8 = vpop.f32.mrf.mxu0 }
  0xfd   :  { %v493_v10 = vpack.c.bf16 %v492_v7, %v492_v7 }
  0xfe   :  { %v757_v11 = vpop.f32.mrf.mxu0 }
  0xff   :  { %763 = vmatmul.mubr.msk.bf16.vlgmr.msra.gmra.mxu1 %vm517_vm2, %v493_v10 }
 0x100   :  { %767 = vmatpush3.bf16.msra.mxu1 %v817_v9  ;;  %770 = vmatprep.mubr.msk.bf16.mxu1 %vm843_vm0, %v842_v36 }
 0x101   :  { %768 = vmatprep.subr.bf16.mxu1 %v842_v36 }
 0x104   :  { %769 = vmatpush3.bf16.msra.mxu1 %v818_v12 }
 0x1bf   :  { %v555_v14 = vpop.f32.mrf.mxu1 }
 0x1c0   :  { %v556_v15 = vadd.f32 %v683_v13, %v555_v14 }
 0x1c1   :  { %v764_v16 = vpop.f32.mrf.mxu1 }
 0x1c2   :  { %v561_v17 = vmax.f32 %v556_v15, 0.0 }
 0x1c3   :  { %v558_v18 = vpop.f32.mrf.mxu1 }
 0x1c4   :  { %v562_v19 = vpack.c.bf16 %v561_v17, %v561_v17 }
 0x1c5   :  { %v765_v20 = vpop.f32.mrf.mxu1 }
 0x1c6   :  { %771 = vmatmul.mubr.msk.bf16.vlgmr.msra.gmra.mxu1 %vm517_vm2, %v562_v19 }
 0x286   :  { %v623_v22 = vpop.f32.mrf.mxu1 }
 0x287   :  { %v624_v23 = vadd.f32 %v687_v21, %v623_v22 }
 0x288   :  { %v772_v24 = vpop.f32.mrf.mxu1 }
 0x289   :  { %630 = vst.msk [vmem:[#allocation2] sm:$0x3] %vm629_vm3, %v624_v23 }
 0x28a   :  { %v626_v25 = vpop.f32.mrf.mxu1 }
 0x28b   :  { %830 = shalt.err (!%p827_p4)
}
 0x28c   :  { %640 = dma.vmem_to_hbm [thread:$0]  %s638_s5, 32, %s1043_s7, [#allocation3]   ;;  %v773_v26 = vpop.f32.mrf.mxu1 }
 0x28d   :  { %839 = dma.done.wait [#allocation3], 32  }
 0x28e   :  { %840 = vsyncadd [#allocation3], 4294967264 }
 0x28f   :  { %644 = vsyncpa [#allocation3], 1 }

</bundles_post_ra>
